<compile_context>
chip_gen: v5e
topology: v5e:2x2
jax: 0.10.0
libtpu: 0.0.40
codegen_flags: <defaults>
</compile_context>

<pallas_src>
import math

import jax
import jax.numpy as jnp
import numpy as np
from jax.experimental import pallas as pl
from jax.experimental.pallas import tpu as pltpu


# -----------------------------------------------------------------------------
# Pallas kernel factory
# -----------------------------------------------------------------------------
def _make_decoder_kernel(return_weights):
    def kernel(x_ref,        # (BB, T, F)  bf16  embedded + PE input
               f_ref,        # (BB, S, F)  bf16  encoder features
               imask_ref,    # (BB, 1, T)  int32 decoder padding mask (1 = real token)
               fmask_ref,    # (BB, 1, S)  int32 encoder padding mask
               wqkv1_ref,    # (F, 3F) bf16   fused self-attn Q|K|V projection
               bqkv1_ref,    # (1, 3F) f32
               wq2_ref,      # (F, F)  bf16   cross-attn Q projection
               bq2_ref,      # (1, F)  f32
               wkv2_ref,     # (F, 2F) bf16   fused cross-attn K|V projection
               bkv2_ref,     # (1, 2F) f32
               wout_ref,     # (F, TV) bf16   output linear (vocab tile)
               bout_ref,     # (1, TV) f32
               *out_and_scratch):
        if return_weights:
            logits_ref, selfw_ref, encw_ref, x_acc = out_and_scratch
        else:
            logits_ref, x_acc = out_and_scratch
            selfw_ref = encw_ref = None

        BB, T, F = x_ref.shape
        S = f_ref.shape[1]
        scale = 1.0 / math.sqrt(F)

        # ---- attention: runs once per batch block (first vocab step only) ----
        @pl.when(pl.program_id(1) == 0)
        def _attention():
            x_bf = x_ref[...]                          # (BB, T, F) bf16
            x = x_bf.astype(jnp.float32)               # f32 residual stream

            def masked_softmax(scores, mask):
                # f32 softmax math; EUP reciprocal keeps the VPU free.
                s = jnp.where(mask, scores, jnp.float32(-1e9))
                m = jnp.max(s, axis=-1, keepdims=True)
                p = jnp.exp(s - m)
                denom = jnp.sum(p, axis=-1, keepdims=True)
                return p * pl.reciprocal(denom, approx=True)

            # ---------------- self attention (causal + padding mask) ----------------
            qkv = (jnp.dot(x_bf.reshape(BB * T, F), wqkv1_ref[...],
                           preferred_element_type=jnp.float32) + bqkv1_ref[...])
            # fold 1/sqrt(F) into q (F columns) rather than scaling the (T,T) scores
            q = (qkv[:, 0 * F:1 * F] * scale).reshape(BB, T, F).astype(jnp.bfloat16)
            k = qkv[:, 1 * F:2 * F].reshape(BB, T, F).astype(jnp.bfloat16)
            v = qkv[:, 2 * F:3 * F].reshape(BB, T, F).astype(jnp.bfloat16)

            scores = jnp.einsum("bqd,bkd->bqk", q, k,
                                preferred_element_type=jnp.float32)        # (BB, T, T)
            qi = jax.lax.broadcasted_iota(jnp.int32, (T, T), 0)
            ki = jax.lax.broadcasted_iota(jnp.int32, (T, T), 1)
            causal = (ki <= qi)[None, :, :]                                # (1, T, T)
            smask = (imask_ref[...] > 0) & causal                          # (BB, T, T)

            p_self = masked_softmax(scores, smask)
            if return_weights:
                selfw_ref[...] = p_self
            ctx = jnp.einsum("bqk,bkd->bqd", p_self.astype(jnp.bfloat16), v,
                             preferred_element_type=jnp.float32)           # (BB, T, F)
            x = x + ctx                                # dropout is identity in eval mode

            # ---------------- cross attention over encoder features ----------------
            x2 = x.reshape(BB * T, F).astype(jnp.bfloat16)
            q = ((jnp.dot(x2, wq2_ref[...], preferred_element_type=jnp.float32)
                  + bq2_ref[...]) * scale).reshape(BB, T, F).astype(jnp.bfloat16)
            kv = (jnp.dot(f_ref[...].reshape(BB * S, F), wkv2_ref[...],
                          preferred_element_type=jnp.float32) + bkv2_ref[...])
            k = kv[:, 0 * F:1 * F].reshape(BB, S, F).astype(jnp.bfloat16)
            v = kv[:, 1 * F:2 * F].reshape(BB, S, F).astype(jnp.bfloat16)

            scores = jnp.einsum("bqd,bkd->bqk", q, k,
                                preferred_element_type=jnp.float32)        # (BB, T, S)
            cmask = fmask_ref[...] > 0                                     # (BB, 1, S)

            p_enc = masked_softmax(scores, cmask)
            if return_weights:
                encw_ref[...] = p_enc
            ctx = jnp.einsum("bqk,bkd->bqd", p_enc.astype(jnp.bfloat16), v,
                             preferred_element_type=jnp.float32)           # (BB, T, F)
            x = x + ctx

            # cache post-attention activations for every vocab tile of this batch block
            x_acc[...] = x.astype(jnp.bfloat16)

        # ---- output projection for this vocab tile (every grid step) ----
        TV = logits_ref.shape[2]
        logits = (jnp.dot(x_acc[...].reshape(BB * T, F), wout_ref[...],
                          preferred_element_type=jnp.float32) + bout_ref[...])
        logits_ref[...] = logits.reshape(BB, T, TV)

    return kernel


# -----------------------------------------------------------------------------
# One-time parameter preparation (hoisted out of the per-call forward)
# -----------------------------------------------------------------------------
def prepare_params(params):
    """Fuse Q/K/V projections and pre-cast weights to bf16 (biases stay f32)."""
    return {
        "wqkv1": jnp.concatenate([params["wq1"], params["wk1"], params["wv1"]],
                                 axis=1).astype(jnp.bfloat16),
        "bqkv1": jnp.concatenate([params["bq1"], params["bk1"], params["bv1"]], axis=1),
        "wq2": params["wq2"].astype(jnp.bfloat16),
        "bq2": params["bq2"],
        "wkv2": jnp.concatenate([params["wk2"], params["wv2"]], axis=1).astype(jnp.bfloat16),
        "bkv2": jnp.concatenate([params["bk2"], params["bv2"]], axis=1),
        "wout": params["wout"].astype(jnp.bfloat16),
        "bout": params["bout"],
    }


def _estimate_vmem_bytes(BB, T, S, F, TV, return_weights):
    """Rough per-step VMEM budget (double-buffered varying blocks, single-buffered weights)."""
    bf16, f32, i32 = 2, 4, 4
    acts = 2 * (BB * T * F + BB * S * F) * bf16 + 2 * (BB * T + BB * S) * i32
    wts = (F * 3 * F + F * F + F * 2 * F) * bf16 + (3 * F + F + 2 * F) * f32   # single-buffered
    wout = 2 * (F * TV * bf16 + TV * f32)                                      # tile varies over v
    outs = 2 * BB * T * TV * f32
    if return_weights:
        outs += 2 * (BB * T * T + BB * T * S) * f32
    scratch = BB * T * F * bf16
    live = (BB * T * 3 * F + BB * S * 2 * F + 2 * BB * T * max(T, S) + 2 * BB * T * F) * f32
    return acts + wts + wout + outs + scratch + live


# -----------------------------------------------------------------------------
# Wrapper: grid + BlockSpecs + pallas_call
# -----------------------------------------------------------------------------
def attention_decoder_forward(x_emb, feats, input_mask, features_mask, prepared, *,
                              block_b=None, vocab_tile=None, return_weights=True):
    """x_emb:(B,T,F) f32 (already embedded+PE); feats:(B,S,F) f32;
    input_mask:(B,T) bool/int; features_mask:(B,S) bool/int; prepared = prepare_params(...)."""
    B, T, F = x_emb.shape
    S = feats.shape[1]
    V = prepared["wout"].shape[1]

    if block_b is None:
        # >= 4 batch grid steps for DMA/compute overlap; >= 2 so both v7x TCs run.
        target = max(1, B // 4) if B >= 4 else max(1, B // 2)
        block_b = next(d for d in range(target, 0, -1) if B % d == 0)
        # TODO(synk): at production shapes also size block_b so block_b*T >= 256 (MXU M fill),
        #             subject to the VMEM budget below.
    BB = block_b
    assert B % BB == 0

    if vocab_tile is None:
        vocab_tile = 128 if (V % 128 == 0 and V > 128) else V
        # TODO(synk): tune vocab_tile (e.g. 512-2048) for large vocabularies.
    TV = vocab_tile
    assert V % TV == 0

    nb, nv = B // BB, V // TV

    # bf16 activations: halve the per-step DMA + double-buffered VMEM.
    x_bf = x_emb.astype(jnp.bfloat16)
    f_bf = feats.astype(jnp.bfloat16)
    # (B,1,T)/(B,1,S): last two block dims equal the full array dims -> no (8,128) issue.
    imask = input_mask.astype(jnp.int32).reshape(B, 1, T)
    fmask = features_mask.astype(jnp.int32).reshape(B, 1, S)

    vmem_limit = min(
        max(int(1.25 * _estimate_vmem_bytes(BB, T, S, F, TV, return_weights)),
            32 * 1024 * 1024),
        64 * 1024 * 1024)   # cap at v7x physical VMEM

    out_shapes = [jax.ShapeDtypeStruct((B, T, V), jnp.float32)]
    if return_weights:
        out_shapes += [jax.ShapeDtypeStruct((B, T, T), jnp.float32),
                       jax.ShapeDtypeStruct((B, T, S), jnp.float32)]

    kernel = _make_decoder_kernel(return_weights)

    def call(single_buffer_weights):
        if single_buffer_weights:
            # Constant-index weights never change across grid steps: single-buffer them.
            wspec = lambda shape: pl.BlockSpec(shape, lambda b, v: (0, 0),
                                               pipeline_mode=pl.Buffered(1))
        else:
            wspec = lambda shape: pl.BlockSpec(shape, lambda b, v: (0, 0))

        in_specs = [
            pl.BlockSpec((BB, T, F), lambda b, v: (b, 0, 0)),   # x  (bf16)
            pl.BlockSpec((BB, S, F), lambda b, v: (b, 0, 0)),   # feats (bf16)
            pl.BlockSpec((BB, 1, T), lambda b, v: (b, 0, 0)),   # input_mask
            pl.BlockSpec((BB, 1, S), lambda b, v: (b, 0, 0)),   # features_mask
            wspec((F, 3 * F)), wspec((1, 3 * F)),               # wqkv1, bqkv1
            wspec((F, F)), wspec((1, F)),                       # wq2,  bq2
            wspec((F, 2 * F)), wspec((1, 2 * F)),               # wkv2, bkv2
            pl.BlockSpec((F, TV), lambda b, v: (0, v)),         # wout vocab tile
            pl.BlockSpec((1, TV), lambda b, v: (0, v)),         # bout vocab tile
        ]
        out_specs = [pl.BlockSpec((BB, T, TV), lambda b, v: (b, 0, v))]   # logits
        if return_weights:
            out_specs += [pl.BlockSpec((BB, T, T), lambda b, v: (b, 0, 0)),   # self weights
                          pl.BlockSpec((BB, T, S), lambda b, v: (b, 0, 0))]   # enc weights

        grid_spec = pltpu.PrefetchScalarGridSpec(
            num_scalar_prefetch=0,
            grid=(nb, nv),                           # vocab (re-use) axis innermost
            in_specs=in_specs,
            out_specs=out_specs,
            scratch_shapes=[pltpu.VMEM((BB, T, F), jnp.bfloat16)],
        )
        fn = pl.pallas_call(
            kernel,
            out_shape=tuple(out_shapes),
            grid_spec=grid_spec,
            compiler_params=pltpu.CompilerParams(
                dimension_semantics=("parallel", "arbitrary"),
                vmem_limit_bytes=vmem_limit),
        )
        return fn(x_bf, f_bf, imask, fmask,
                  prepared["wqkv1"], prepared["bqkv1"],
                  prepared["wq2"], prepared["bq2"],
                  prepared["wkv2"], prepared["bkv2"],
                  prepared["wout"], prepared["bout"])

    try:
        outs = call(single_buffer_weights=True)
    except Exception:  # pragma: no cover — fall back if pl.Buffered(1) is unsupported here
        outs = call(single_buffer_weights=False)

    if return_weights:
        logits, w_self, w_enc = outs
        return logits, w_self, w_enc
    logits = outs[0] if isinstance(outs, (tuple, list)) else outs
    return logits, None, None


# -----------------------------------------------------------------------------
# Plain-JAX glue: embedding, positional encoding, reference for verification
# -----------------------------------------------------------------------------
def sinusoidal_pe(T, F):
    pos = np.arange(T, dtype=np.float32)[:, None]
    i = np.arange(0, F, 2, dtype=np.float32)
    div = np.exp(-np.log(10000.0) * i / F)
    pe = np.zeros((T, F), dtype=np.float32)
    pe[:, 0::2] = np.sin(pos * div)
    pe[:, 1::2] = np.cos(pos * div)
    return jnp.asarray(pe)


def reference_forward(x_emb, feats, input_mask, features_mask, params):
    """Pure-JAX f32 reference mirroring the module math."""
    B, T, F = x_emb.shape
    S = feats.shape[1]
    scale = 1.0 / math.sqrt(F)
    causal = jnp.tril(jnp.ones((T, T), dtype=bool))
    smask = input_mask[:, None, :] & causal[None]
    cmask = jnp.broadcast_to(features_mask[:, None, :], (B, T, S))

    def attn(xq, xkv, mask, wq, bq, wk, bk, wv, bv):
        q = xq @ wq + bq
        k = xkv @ wk + bk
        v = xkv @ wv + bv
        s = jnp.einsum("btf,bsf->bts", q, k) * scale
        s = jnp.where(mask, s, -1e9)
        p = jax.nn.softmax(s, axis=-1)
        return jnp.einsum("bts,bsf->btf", p, v), p

    ctx, w_self = attn(x_emb, x_emb, smask,
                       params["wq1"], params["bq1"], params["wk1"], params["bk1"],
                       params["wv1"], params["bv1"])
    x = x_emb + ctx
    ctx, w_enc = attn(x, feats, cmask,
                      params["wq2"], params["bq2"], params["wk2"], params["bk2"],
                      params["wv2"], params["bv2"])
    x = x + ctx
    logits = x @ params["wout"] + params["bout"]
    return logits, w_self, w_enc


if __name__ == "__main__":
    # Small, deterministic, lane-friendly sizes chosen so the grid has multiple steps:
    #   batch axis: B=8 / BB=2  -> 4 "parallel" steps (pipelining + v7x megacore)
    #   vocab axis: V=256 / TV=128 -> 2 "arbitrary" steps (vocab-tiled output projection)
    B, T, S, FEAT, VOCAB = 8, 32, 32, 128, 256

    key = jax.random.PRNGKey(0)
    keys = jax.random.split(key, 20)

    # Embedding table (padding_idx=0 -> zero row)
    emb = 0.02 * jax.random.normal(keys[0], (VOCAB, FEAT), jnp.float32)
    emb = emb.at[0].set(0.0)

    def linear_params(kw, kb, din, dout):
        w = 0.02 * jax.random.normal(kw, (din, dout), jnp.float32)
        b = 0.02 * jax.random.normal(kb, (1, dout), jnp.float32)
        return w, b

    params = {}
    params["wq1"], params["bq1"] = linear_params(keys[1], keys[2], FEAT, FEAT)
    params["wk1"], params["bk1"] = linear_params(keys[3], keys[4], FEAT, FEAT)
    params["wv1"], params["bv1"] = linear_params(keys[5], keys[6], FEAT, FEAT)
    params["wq2"], params["bq2"] = linear_params(keys[7], keys[8], FEAT, FEAT)
    params["wk2"], params["bk2"] = linear_params(keys[9], keys[10], FEAT, FEAT)
    params["wv2"], params["bv2"] = linear_params(keys[11], keys[12], FEAT, FEAT)
    params["wout"], params["bout"] = linear_params(keys[13], keys[14], FEAT, VOCAB)

    # Example inputs.
    tokens = jax.random.randint(keys[15], (B, T), 1, VOCAB)          # (B, T) int32
    tokens = tokens.at[1, T - 5:].set(0)                             # some decoder padding
    tokens = tokens.at[5, T - 2:].set(0)
    feats = jax.random.normal(keys[16], (B, S, FEAT), jnp.float32)   # encoder features
    input_mask = tokens != 0                                         # (B, T) bool
    features_mask = jnp.ones((B, S), dtype=bool)
    features_mask = features_mask.at[3, S - 4:].set(False)
    features_mask = features_mask.at[6, S - 7:].set(False)

    # Embedding + positional encoding + dropout(identity) in plain JAX glue.
    x_emb = emb[tokens] + sinusoidal_pe(T, FEAT)[None, :, :]         # (B, T, FEAT) f32

    prepared = prepare_params(params)            # one-time weight fusion / bf16 cast

    logits, w_self, w_enc = attention_decoder_forward(
        x_emb, feats, input_mask, features_mask, prepared, return_weights=True)
    jax.block_until_ready((logits, w_self, w_enc))

    # Also exercise the weights-free fast path (no O(B*T^2) HBM writes).
    logits_nw, _, _ = attention_decoder_forward(
        x_emb, feats, input_mask, features_mask, prepared, return_weights=False)
    jax.block_until_ready(logits_nw)

    # Verify against the pure-JAX f32 reference (kernel uses bf16 activations/weights
    # for the MXU with f32 accumulation, so tolerances are relaxed accordingly).
    r_logits, r_self, r_enc = reference_forward(
        x_emb, feats, input_mask, features_mask, params)
    np.testing.assert_allclose(np.asarray(logits), np.asarray(r_logits), rtol=2e-2, atol=2e-2)
    np.testing.assert_allclose(np.asarray(w_self), np.asarray(r_self), rtol=2e-2, atol=2e-2)
    np.testing.assert_allclose(np.asarray(w_enc), np.asarray(r_enc), rtol=2e-2, atol=2e-2)
    np.testing.assert_allclose(np.asarray(logits_nw), np.asarray(logits), rtol=1e-5, atol=1e-5)

    print("KERNEL_OK")
</pallas_src>

<mosaic_0001>
module attributes {stable_mosaic.version = 11 : i64} {
  func.func @kernel(%arg0: i32, %arg1: i32, %arg2: memref<2x32x128xbf16, #tpu.memory_space<vmem>>, %arg3: memref<2x32x128xbf16, #tpu.memory_space<vmem>>, %arg4: memref<2x1x32xi32, #tpu.memory_space<vmem>>, %arg5: memref<2x1x32xi32, #tpu.memory_space<vmem>>, %arg6: memref<128x384xbf16, #tpu.memory_space<vmem>>, %arg7: memref<1x384xf32, #tpu.memory_space<vmem>>, %arg8: memref<128x128xbf16, #tpu.memory_space<vmem>>, %arg9: memref<1x128xf32, #tpu.memory_space<vmem>>, %arg10: memref<128x256xbf16, #tpu.memory_space<vmem>>, %arg11: memref<1x256xf32, #tpu.memory_space<vmem>>, %arg12: memref<128x128xbf16, #tpu.memory_space<vmem>>, %arg13: memref<1x128xf32, #tpu.memory_space<vmem>>, %arg14: memref<2x32x128xf32, #tpu.memory_space<vmem>>, %arg15: memref<2x32x32xf32, #tpu.memory_space<vmem>>, %arg16: memref<2x32x32xf32, #tpu.memory_space<vmem>>, %arg17: memref<2x32x128xbf16, #tpu.memory_space<vmem>>) attributes {dimension_semantics = [#tpu.dimension_semantics<parallel>, #tpu.dimension_semantics<arbitrary>], iteration_bounds = array<i64: 4, 2>, scalar_prefetch = 0 : i64, scratch_operands = 1 : i64, tpu.core_type = #tpu.core_type<tc>, window_params = [{transform_indices = @transform_0, window_bounds = array<i64: 2, 32, 128>}, {transform_indices = @transform_1, window_bounds = array<i64: 2, 32, 128>}, {transform_indices = @transform_2, window_bounds = array<i64: 2, 1, 32>}, {transform_indices = @transform_3, window_bounds = array<i64: 2, 1, 32>}, {pipeline_mode = #tpu.pipeline_mode<synchronous>, transform_indices = @transform_4, window_bounds = array<i64: 128, 384>}, {pipeline_mode = #tpu.pipeline_mode<synchronous>, transform_indices = @transform_5, window_bounds = array<i64: 1, 384>}, {pipeline_mode = #tpu.pipeline_mode<synchronous>, transform_indices = @transform_6, window_bounds = array<i64: 128, 128>}, {pipeline_mode = #tpu.pipeline_mode<synchronous>, transform_indices = @transform_7, window_bounds = array<i64: 1, 128>}, {pipeline_mode = #tpu.pipeline_mode<synchronous>, transform_indices = @transform_8, window_bounds = array<i64: 128, 256>}, {pipeline_mode = #tpu.pipeline_mode<synchronous>, transform_indices = @transform_9, window_bounds = array<i64: 1, 256>}, {transform_indices = @transform_10, window_bounds = array<i64: 128, 128>}, {transform_indices = @transform_11, window_bounds = array<i64: 1, 128>}, {transform_indices = @transform_12, window_bounds = array<i64: 2, 32, 128>}, {transform_indices = @transform_13, window_bounds = array<i64: 2, 32, 32>}, {transform_indices = @transform_14, window_bounds = array<i64: 2, 32, 32>}]} {
    %c0_i32 = arith.constant 0 : i32
    %0 = arith.cmpi eq, %arg1, %c0_i32 : i32
    %1 = arith.extui %0 : i1 to i32
    %c0_i32_0 = arith.constant 0 : i32
    %2 = arith.cmpi ne, %1, %c0_i32_0 : i32
    scf.if %2 {
      %c0_10 = arith.constant 0 : index
      %c0_11 = arith.constant 0 : index
      %c0_12 = arith.constant 0 : index
      %12 = vector.load %arg2[%c0_10, %c0_11, %c0_12] : memref<2x32x128xbf16, #tpu.memory_space<vmem>>, vector<2x32x128xbf16>
      %13 = arith.extf %12 : vector<2x32x128xbf16> to vector<2x32x128xf32>
      %14 = vector.shape_cast %12 : vector<2x32x128xbf16> to vector<64x128xbf16>
      %c0_13 = arith.constant 0 : index
      %c0_14 = arith.constant 0 : index
      %15 = vector.load %arg6[%c0_13, %c0_14] : memref<128x384xbf16, #tpu.memory_space<vmem>>, vector<128x384xbf16>
      %cst_15 = arith.constant dense<0.000000e+00> : vector<64x384xf32>
      %16 = tpu.matmul %14, %15, %cst_15 {dimension_numbers = #tpu.dot_dimension_numbers<[1], [0], [0], [1], [0, 0, 1, 1], [], []>} : vector<64x128xbf16>, vector<128x384xbf16>, vector<64x384xf32> -> vector<64x384xf32>
      %c0_16 = arith.constant 0 : index
      %c0_17 = arith.constant 0 : index
      %17 = vector.load %arg7[%c0_16, %c0_17] : memref<1x384xf32, #tpu.memory_space<vmem>>, vector<1x384xf32>
      %18 = vector.broadcast %17 : vector<1x384xf32> to vector<64x384xf32>
      %19 = arith.addf %16, %18 : vector<64x384xf32>
      %20 = vector.extract_strided_slice %19 {offsets = [0, 0], sizes = [64, 128], strides = [1, 1]} : vector<64x384xf32> to vector<64x128xf32>
      %cst_18 = arith.constant 0.0883883461 : f32
      %21 = vector.broadcast %cst_18 : f32 to vector<64x128xf32>
      %22 = arith.mulf %20, %21 : vector<64x128xf32>
      %23 = vector.shape_cast %22 : vector<64x128xf32> to vector<2x32x128xf32>
      %24 = arith.truncf %23 : vector<2x32x128xf32> to vector<2x32x128xbf16>
      %25 = vector.extract_strided_slice %19 {offsets = [0, 128], sizes = [64, 128], strides = [1, 1]} : vector<64x384xf32> to vector<64x128xf32>
      %26 = vector.shape_cast %25 : vector<64x128xf32> to vector<2x32x128xf32>
      %27 = arith.truncf %26 : vector<2x32x128xf32> to vector<2x32x128xbf16>
      %28 = vector.extract_strided_slice %19 {offsets = [0, 256], sizes = [64, 128], strides = [1, 1]} : vector<64x384xf32> to vector<64x128xf32>
      %29 = vector.shape_cast %28 : vector<64x128xf32> to vector<2x32x128xf32>
      %30 = arith.truncf %29 : vector<2x32x128xf32> to vector<2x32x128xbf16>
      "tpu.trace_start"() <{level = 10 : i32, message = "bqd,bkd->bqk"}> : () -> ()
      %cst_19 = arith.constant dense<0.000000e+00> : vector<2x32x32xf32>
      %31 = tpu.matmul %24, %27, %cst_19 {dimension_numbers = #tpu.dot_dimension_numbers<[2], [2], [1], [1], [0, 0, 0, 1, 1, 1], [0], [0]>} : vector<2x32x128xbf16>, vector<2x32x128xbf16>, vector<2x32x32xf32> -> vector<2x32x32xf32>
      "tpu.trace_stop"() : () -> ()
      %32 = tpu.iota {dimensions = array<i32: 0>} : vector<32x32xi32>
      %33 = tpu.iota {dimensions = array<i32: 1>} : vector<32x32xi32>
      %34 = arith.cmpi sle, %33, %32 : vector<32x32xi32>
      %35 = vector.shape_cast %34 : vector<32x32xi1> to vector<1x32x32xi1>
      %c0_20 = arith.constant 0 : index
      %c0_21 = arith.constant 0 : index
      %c0_22 = arith.constant 0 : index
      %36 = vector.load %arg4[%c0_20, %c0_21, %c0_22] : memref<2x1x32xi32, #tpu.memory_space<vmem>>, vector<2x1x32xi32>
      %c0_i32_23 = arith.constant 0 : i32
      %37 = vector.broadcast %c0_i32_23 : i32 to vector<2x1x32xi32>
      %38 = arith.cmpi sgt, %36, %37 : vector<2x1x32xi32>
      %39 = vector.broadcast %38 : vector<2x1x32xi1> to vector<2x32x32xi1>
      %40 = vector.broadcast %35 : vector<1x32x32xi1> to vector<2x32x32xi1>
      %41 = arith.andi %39, %40 : vector<2x32x32xi1>
      %cst_24 = arith.constant -1.000000e+09 : f32
      %42 = vector.broadcast %cst_24 : f32 to vector<2x32x32xf32>
      %43 = arith.select %41, %31, %42 : vector<2x32x32xi1>, vector<2x32x32xf32>
      %cst_25 = arith.constant dense<0xFF800000> : vector<2x32xf32>
      %44 = vector.multi_reduction <maximumf>, %43, %cst_25 [2] : vector<2x32x32xf32> to vector<2x32xf32>
      %45 = vector.shape_cast %44 : vector<2x32xf32> to vector<2x32x1xf32>
      %46 = vector.broadcast %45 : vector<2x32x1xf32> to vector<2x32x32xf32>
      %47 = arith.subf %43, %46 : vector<2x32x32xf32>
      %48 = math.exp %47 : vector<2x32x32xf32>
      %cst_26 = arith.constant dense<0.000000e+00> : vector<2x32xf32>
      %49 = vector.multi_reduction <add>, %48, %cst_26 [2] : vector<2x32x32xf32> to vector<2x32xf32>
      %50 = vector.shape_cast %49 : vector<2x32xf32> to vector<2x32x1xf32>
      %51 = tpu.reciprocal %50 {approx = true} : vector<2x32x1xf32> -> vector<2x32x1xf32>
      %52 = vector.broadcast %51 : vector<2x32x1xf32> to vector<2x32x32xf32>
      %53 = arith.mulf %48, %52 : vector<2x32x32xf32>
      %c0_27 = arith.constant 0 : index
      %c0_28 = arith.constant 0 : index
      %c0_29 = arith.constant 0 : index
      %54 = vector.load %arg15[%c0_27, %c0_28, %c0_29] : memref<2x32x32xf32, #tpu.memory_space<vmem>>, vector<2x32x32xf32>
      tpu.vector_store %arg15[%c0_27, %c0_28, %c0_29], %53 {strides = array<i32>} : memref<2x32x32xf32, #tpu.memory_space<vmem>>, vector<2x32x32xf32>,
      %55 = arith.truncf %53 : vector<2x32x32xf32> to vector<2x32x32xbf16>
      "tpu.trace_start"() <{level = 10 : i32, message = "bqk,bkd->bqd"}> : () -> ()
      %cst_30 = arith.constant dense<0.000000e+00> : vector<2x32x128xf32>
      %56 = tpu.matmul %55, %30, %cst_30 {dimension_numbers = #tpu.dot_dimension_numbers<[2], [1], [1], [2], [0, 0, 0, 1, 1, 2], [0], [0]>} : vector<2x32x32xbf16>, vector<2x32x128xbf16>, vector<2x32x128xf32> -> vector<2x32x128xf32>
      "tpu.trace_stop"() : () -> ()
      %57 = arith.addf %13, %56 : vector<2x32x128xf32>
      %58 = vector.shape_cast %57 : vector<2x32x128xf32> to vector<64x128xf32>
      %59 = arith.truncf %58 : vector<64x128xf32> to vector<64x128xbf16>
      %c0_31 = arith.constant 0 : index
      %c0_32 = arith.constant 0 : index
      %60 = vector.load %arg8[%c0_31, %c0_32] : memref<128x128xbf16, #tpu.memory_space<vmem>>, vector<128x128xbf16>
      %cst_33 = arith.constant dense<0.000000e+00> : vector<64x128xf32>
      %61 = tpu.matmul %59, %60, %cst_33 {dimension_numbers = #tpu.dot_dimension_numbers<[1], [0], [0], [1], [0, 0, 1, 1], [], []>} : vector<64x128xbf16>, vector<128x128xbf16>, vector<64x128xf32> -> vector<64x128xf32>
      %c0_34 = arith.constant 0 : index
      %c0_35 = arith.constant 0 : index
      %62 = vector.load %arg9[%c0_34, %c0_35] : memref<1x128xf32, #tpu.memory_space<vmem>>, vector<1x128xf32>
      %63 = vector.broadcast %62 : vector<1x128xf32> to vector<64x128xf32>
      %64 = arith.addf %61, %63 : vector<64x128xf32>
      %cst_36 = arith.constant 0.0883883461 : f32
      %65 = vector.broadcast %cst_36 : f32 to vector<64x128xf32>
      %66 = arith.mulf %64, %65 : vector<64x128xf32>
      %67 = vector.shape_cast %66 : vector<64x128xf32> to vector<2x32x128xf32>
      %68 = arith.truncf %67 : vector<2x32x128xf32> to vector<2x32x128xbf16>
      %c0_37 = arith.constant 0 : index
      %c0_38 = arith.constant 0 : index
      %c0_39 = arith.constant 0 : index
      %69 = vector.load %arg3[%c0_37, %c0_38, %c0_39] : memref<2x32x128xbf16, #tpu.memory_space<vmem>>, vector<2x32x128xbf16>
      %70 = vector.shape_cast %69 : vector<2x32x128xbf16> to vector<64x128xbf16>
      %c0_40 = arith.constant 0 : index
      %c0_41 = arith.constant 0 : index
      %71 = vector.load %arg10[%c0_40, %c0_41] : memref<128x256xbf16, #tpu.memory_space<vmem>>, vector<128x256xbf16>
      %cst_42 = arith.constant dense<0.000000e+00> : vector<64x256xf32>
      %72 = tpu.matmul %70, %71, %cst_42 {dimension_numbers = #tpu.dot_dimension_numbers<[1], [0], [0], [1], [0, 0, 1, 1], [], []>} : vector<64x128xbf16>, vector<128x256xbf16>, vector<64x256xf32> -> vector<64x256xf32>
      %c0_43 = arith.constant 0 : index
      %c0_44 = arith.constant 0 : index
      %73 = vector.load %arg11[%c0_43, %c0_44] : memref<1x256xf32, #tpu.memory_space<vmem>>, vector<1x256xf32>
      %74 = vector.broadcast %73 : vector<1x256xf32> to vector<64x256xf32>
      %75 = arith.addf %72, %74 : vector<64x256xf32>
      %76 = vector.extract_strided_slice %75 {offsets = [0, 0], sizes = [64, 128], strides = [1, 1]} : vector<64x256xf32> to vector<64x128xf32>
      %77 = vector.shape_cast %76 : vector<64x128xf32> to vector<2x32x128xf32>
      %78 = arith.truncf %77 : vector<2x32x128xf32> to vector<2x32x128xbf16>
      %79 = vector.extract_strided_slice %75 {offsets = [0, 128], sizes = [64, 128], strides = [1, 1]} : vector<64x256xf32> to vector<64x128xf32>
      %80 = vector.shape_cast %79 : vector<64x128xf32> to vector<2x32x128xf32>
      %81 = arith.truncf %80 : vector<2x32x128xf32> to vector<2x32x128xbf16>
      "tpu.trace_start"() <{level = 10 : i32, message = "bqd,bkd->bqk"}> : () -> ()
      %cst_45 = arith.constant dense<0.000000e+00> : vector<2x32x32xf32>
      %82 = tpu.matmul %68, %78, %cst_45 {dimension_numbers = #tpu.dot_dimension_numbers<[2], [2], [1], [1], [0, 0, 0, 1, 1, 1], [0], [0]>} : vector<2x32x128xbf16>, vector<2x32x128xbf16>, vector<2x32x32xf32> -> vector<2x32x32xf32>
      "tpu.trace_stop"() : () -> ()
      %c0_46 = arith.constant 0 : index
      %c0_47 = arith.constant 0 : index
      %c0_48 = arith.constant 0 : index
      %83 = vector.load %arg5[%c0_46, %c0_47, %c0_48] : memref<2x1x32xi32, #tpu.memory_space<vmem>>, vector<2x1x32xi32>
      %c0_i32_49 = arith.constant 0 : i32
      %84 = vector.broadcast %c0_i32_49 : i32 to vector<2x1x32xi32>
      %85 = arith.cmpi sgt, %83, %84 : vector<2x1x32xi32>
      %cst_50 = arith.constant -1.000000e+09 : f32
      %86 = vector.shape_cast %85 : vector<2x1x32xi1> to vector<2x1x32xi1>
      %87 = vector.broadcast %86 : vector<2x1x32xi1> to vector<2x32x32xi1>
      %88 = vector.broadcast %cst_50 : f32 to vector<2x32x32xf32>
      %89 = arith.select %87, %82, %88 : vector<2x32x32xi1>, vector<2x32x32xf32>
      %cst_51 = arith.constant dense<0xFF800000> : vector<2x32xf32>
      %90 = vector.multi_reduction <maximumf>, %89, %cst_51 [2] : vector<2x32x32xf32> to vector<2x32xf32>
      %91 = vector.shape_cast %90 : vector<2x32xf32> to vector<2x32x1xf32>
      %92 = vector.broadcast %91 : vector<2x32x1xf32> to vector<2x32x32xf32>
      %93 = arith.subf %89, %92 : vector<2x32x32xf32>
      %94 = math.exp %93 : vector<2x32x32xf32>
      %cst_52 = arith.constant dense<0.000000e+00> : vector<2x32xf32>
      %95 = vector.multi_reduction <add>, %94, %cst_52 [2] : vector<2x32x32xf32> to vector<2x32xf32>
      %96 = vector.shape_cast %95 : vector<2x32xf32> to vector<2x32x1xf32>
      %97 = tpu.reciprocal %96 {approx = true} : vector<2x32x1xf32> -> vector<2x32x1xf32>
      %98 = vector.broadcast %97 : vector<2x32x1xf32> to vector<2x32x32xf32>
      %99 = arith.mulf %94, %98 : vector<2x32x32xf32>
      %c0_53 = arith.constant 0 : index
      %c0_54 = arith.constant 0 : index
      %c0_55 = arith.constant 0 : index
      %100 = vector.load %arg16[%c0_53, %c0_54, %c0_55] : memref<2x32x32xf32, #tpu.memory_space<vmem>>, vector<2x32x32xf32>
      tpu.vector_store %arg16[%c0_53, %c0_54, %c0_55], %99 {strides = array<i32>} : memref<2x32x32xf32, #tpu.memory_space<vmem>>, vector<2x32x32xf32>,
      %101 = arith.truncf %99 : vector<2x32x32xf32> to vector<2x32x32xbf16>
      "tpu.trace_start"() <{level = 10 : i32, message = "bqk,bkd->bqd"}> : () -> ()
      %cst_56 = arith.constant dense<0.000000e+00> : vector<2x32x128xf32>
      %102 = tpu.matmul %101, %81, %cst_56 {dimension_numbers = #tpu.dot_dimension_numbers<[2], [1], [1], [2], [0, 0, 0, 1, 1, 2], [0], [0]>} : vector<2x32x32xbf16>, vector<2x32x128xbf16>, vector<2x32x128xf32> -> vector<2x32x128xf32>
      "tpu.trace_stop"() : () -> ()
      %103 = arith.addf %57, %102 : vector<2x32x128xf32>
      %104 = arith.truncf %103 : vector<2x32x128xf32> to vector<2x32x128xbf16>
      %c0_57 = arith.constant 0 : index
      %c0_58 = arith.constant 0 : index
      %c0_59 = arith.constant 0 : index
      %105 = vector.load %arg17[%c0_57, %c0_58, %c0_59] : memref<2x32x128xbf16, #tpu.memory_space<vmem>>, vector<2x32x128xbf16>
      tpu.vector_store %arg17[%c0_57, %c0_58, %c0_59], %104 {strides = array<i32>} : memref<2x32x128xbf16, #tpu.memory_space<vmem>>, vector<2x32x128xbf16>,
    } else {
    }
    %c0 = arith.constant 0 : index
    %c0_1 = arith.constant 0 : index
    %c0_2 = arith.constant 0 : index
    %3 = vector.load %arg17[%c0, %c0_1, %c0_2] : memref<2x32x128xbf16, #tpu.memory_space<vmem>>, vector<2x32x128xbf16>
    %4 = vector.shape_cast %3 : vector<2x32x128xbf16> to vector<64x128xbf16>
    %c0_3 = arith.constant 0 : index
    %c0_4 = arith.constant 0 : index
    %5 = vector.load %arg12[%c0_3, %c0_4] : memref<128x128xbf16, #tpu.memory_space<vmem>>, vector<128x128xbf16>
    %cst = arith.constant dense<0.000000e+00> : vector<64x128xf32>
    %6 = tpu.matmul %4, %5, %cst {dimension_numbers = #tpu.dot_dimension_numbers<[1], [0], [0], [1], [0, 0, 1, 1], [], []>} : vector<64x128xbf16>, vector<128x128xbf16>, vector<64x128xf32> -> vector<64x128xf32>
    %c0_5 = arith.constant 0 : index
    %c0_6 = arith.constant 0 : index
    %7 = vector.load %arg13[%c0_5, %c0_6] : memref<1x128xf32, #tpu.memory_space<vmem>>, vector<1x128xf32>
    %8 = vector.broadcast %7 : vector<1x128xf32> to vector<64x128xf32>
    %9 = arith.addf %6, %8 : vector<64x128xf32>
    %10 = vector.shape_cast %9 : vector<64x128xf32> to vector<2x32x128xf32>
    %c0_7 = arith.constant 0 : index
    %c0_8 = arith.constant 0 : index
    %c0_9 = arith.constant 0 : index
    %11 = vector.load %arg14[%c0_7, %c0_8, %c0_9] : memref<2x32x128xf32, #tpu.memory_space<vmem>>, vector<2x32x128xf32>
    tpu.vector_store %arg14[%c0_7, %c0_8, %c0_9], %10 {strides = array<i32>} : memref<2x32x128xf32, #tpu.memory_space<vmem>>, vector<2x32x128xf32>,
    return
  }
  func.func @transform_0(%arg0: i32, %arg1: i32) -> (i32, i32, i32) {
    %c0_i32 = arith.constant 0 : i32
    %c0_i32_0 = arith.constant 0 : i32
    %c0_i32_1 = arith.constant 0 : i32
    return %arg0, %c0_i32, %c0_i32_0 : i32, i32, i32
  }
  func.func @transform_1(%arg0: i32, %arg1: i32) -> (i32, i32, i32) {
    %c0_i32 = arith.constant 0 : i32
    %c0_i32_0 = arith.constant 0 : i32
    %c0_i32_1 = arith.constant 0 : i32
    return %arg0, %c0_i32, %c0_i32_0 : i32, i32, i32
  }
  func.func @transform_2(%arg0: i32, %arg1: i32) -> (i32, i32, i32) {
    %c0_i32 = arith.constant 0 : i32
    %c0_i32_0 = arith.constant 0 : i32
    %c0_i32_1 = arith.constant 0 : i32
    return %arg0, %c0_i32, %c0_i32_0 : i32, i32, i32
  }
  func.func @transform_3(%arg0: i32, %arg1: i32) -> (i32, i32, i32) {
    %c0_i32 = arith.constant 0 : i32
    %c0_i32_0 = arith.constant 0 : i32
    %c0_i32_1 = arith.constant 0 : i32
    return %arg0, %c0_i32, %c0_i32_0 : i32, i32, i32
  }
  func.func @transform_4(%arg0: i32, %arg1: i32) -> (i32, i32) {
    %c0_i32 = arith.constant 0 : i32
    %c0_i32_0 = arith.constant 0 : i32
    %c0_i32_1 = arith.constant 0 : i32
    return %c0_i32, %c0_i32_0 : i32, i32
  }
  func.func @transform_5(%arg0: i32, %arg1: i32) -> (i32, i32) {
    %c0_i32 = arith.constant 0 : i32
    %c0_i32_0 = arith.constant 0 : i32
    %c0_i32_1 = arith.constant 0 : i32
    return %c0_i32, %c0_i32_0 : i32, i32
  }
  func.func @transform_6(%arg0: i32, %arg1: i32) -> (i32, i32) {
    %c0_i32 = arith.constant 0 : i32
    %c0_i32_0 = arith.constant 0 : i32
    %c0_i32_1 = arith.constant 0 : i32
    return %c0_i32, %c0_i32_0 : i32, i32
  }
  func.func @transform_7(%arg0: i32, %arg1: i32) -> (i32, i32) {
    %c0_i32 = arith.constant 0 : i32
    %c0_i32_0 = arith.constant 0 : i32
    %c0_i32_1 = arith.constant 0 : i32
    return %c0_i32, %c0_i32_0 : i32, i32
  }
  func.func @transform_8(%arg0: i32, %arg1: i32) -> (i32, i32) {
    %c0_i32 = arith.constant 0 : i32
    %c0_i32_0 = arith.constant 0 : i32
    %c0_i32_1 = arith.constant 0 : i32
    return %c0_i32, %c0_i32_0 : i32, i32
  }
  func.func @transform_9(%arg0: i32, %arg1: i32) -> (i32, i32) {
    %c0_i32 = arith.constant 0 : i32
    %c0_i32_0 = arith.constant 0 : i32
    %c0_i32_1 = arith.constant 0 : i32
    return %c0_i32, %c0_i32_0 : i32, i32
  }
  func.func @transform_10(%arg0: i32, %arg1: i32) -> (i32, i32) {
    %c0_i32 = arith.constant 0 : i32
    %c0_i32_0 = arith.constant 0 : i32
    return %c0_i32, %arg1 : i32, i32
  }
  func.func @transform_11(%arg0: i32, %arg1: i32) -> (i32, i32) {
    %c0_i32 = arith.constant 0 : i32
    %c0_i32_0 = arith.constant 0 : i32
    return %c0_i32, %arg1 : i32, i32
  }
  func.func @transform_12(%arg0: i32, %arg1: i32) -> (i32, i32, i32) {
    %c0_i32 = arith.constant 0 : i32
    %c0_i32_0 = arith.constant 0 : i32
    return %arg0, %c0_i32, %arg1 : i32, i32, i32
  }
  func.func @transform_13(%arg0: i32, %arg1: i32) -> (i32, i32, i32) {
    %c0_i32 = arith.constant 0 : i32
    %c0_i32_0 = arith.constant 0 : i32
    %c0_i32_1 = arith.constant 0 : i32
    return %arg0, %c0_i32, %c0_i32_0 : i32, i32, i32
  }
  func.func @transform_14(%arg0: i32, %arg1: i32) -> (i32, i32, i32) {
    %c0_i32 = arith.constant 0 : i32
    %c0_i32_0 = arith.constant 0 : i32
    %c0_i32_1 = arith.constant 0 : i32
    return %arg0, %c0_i32, %c0_i32_0 : i32, i32, i32
  }
}

module attributes {stable_mosaic.version = 11 : i64} {
  func.func @kernel(%arg0: i32, %arg1: i32, %arg2: memref<2x32x128xbf16, #tpu.memory_space<vmem>>, %arg3: memref<2x32x128xbf16, #tpu.memory_space<vmem>>, %arg4: memref<2x1x32xi32, #tpu.memory_space<vmem>>, %arg5: memref<2x1x32xi32, #tpu.memory_space<vmem>>, %arg6: memref<128x384xbf16, #tpu.memory_space<vmem>>, %arg7: memref<1x384xf32, #tpu.memory_space<vmem>>, %arg8: memref<128x128xbf16, #tpu.memory_space<vmem>>, %arg9: memref<1x128xf32, #tpu.memory_space<vmem>>, %arg10: memref<128x256xbf16, #tpu.memory_space<vmem>>, %arg11: memref<1x256xf32, #tpu.memory_space<vmem>>, %arg12: memref<128x128xbf16, #tpu.memory_space<vmem>>, %arg13: memref<1x128xf32, #tpu.memory_space<vmem>>, %arg14: memref<2x32x128xf32, #tpu.memory_space<vmem>>, %arg15: memref<2x32x32xf32, #tpu.memory_space<vmem>>, %arg16: memref<2x32x32xf32, #tpu.memory_space<vmem>>, %arg17: memref<2x32x128xbf16, #tpu.memory_space<vmem>>) attributes {dimension_semantics = [#tpu.dimension_semantics<parallel>, #tpu.dimension_semantics<arbitrary>], iteration_bounds = array<i64: 4, 2>, scalar_prefetch = 0 : i64, scratch_operands = 1 : i64, tpu.core_type = #tpu.core_type<tc>, window_params = [{transform_indices = @transform_0, window_bounds = array<i64: 2, 32, 128>}, {transform_indices = @transform_1, window_bounds = array<i64: 2, 32, 128>}, {transform_indices = @transform_2, window_bounds = array<i64: 2, 1, 32>}, {transform_indices = @transform_3, window_bounds = array<i64: 2, 1, 32>}, {pipeline_mode = #tpu.pipeline_mode<synchronous>, transform_indices = @transform_4, window_bounds = array<i64: 128, 384>}, {pipeline_mode = #tpu.pipeline_mode<synchronous>, transform_indices = @transform_5, window_bounds = array<i64: 1, 384>}, {pipeline_mode = #tpu.pipeline_mode<synchronous>, transform_indices = @transform_6, window_bounds = array<i64: 128, 128>}, {pipeline_mode = #tpu.pipeline_mode<synchronous>, transform_indices = @transform_7, window_bounds = array<i64: 1, 128>}, {pipeline_mode = #tpu.pipeline_mode<synchronous>, transform_indices = @transform_8, window_bounds = array<i64: 128, 256>}, {pipeline_mode = #tpu.pipeline_mode<synchronous>, transform_indices = @transform_9, window_bounds = array<i64: 1, 256>}, {transform_indices = @transform_10, window_bounds = array<i64: 128, 128>}, {transform_indices = @transform_11, window_bounds = array<i64: 1, 128>}, {transform_indices = @transform_12, window_bounds = array<i64: 2, 32, 128>}, {transform_indices = @transform_13, window_bounds = array<i64: 2, 32, 32>}, {transform_indices = @transform_14, window_bounds = array<i64: 2, 32, 32>}]} {
    %c0_i32 = arith.constant 0 : i32
    %0 = arith.cmpi eq, %arg1, %c0_i32 : i32
    %1 = arith.extui %0 : i1 to i32
    %c0_i32_0 = arith.constant 0 : i32
    %2 = arith.cmpi ne, %1, %c0_i32_0 : i32
    scf.if %2 {
      %c0_10 = arith.constant 0 : index
      %c0_11 = arith.constant 0 : index
      %c0_12 = arith.constant 0 : index
      %12 = vector.load %arg2[%c0_10, %c0_11, %c0_12] : memref<2x32x128xbf16, #tpu.memory_space<vmem>>, vector<2x32x128xbf16>
      %13 = arith.extf %12 : vector<2x32x128xbf16> to vector<2x32x128xf32>
      %14 = vector.shape_cast %12 : vector<2x32x128xbf16> to vector<64x128xbf16>
      %c0_13 = arith.constant 0 : index
      %c0_14 = arith.constant 0 : index
      %15 = vector.load %arg6[%c0_13, %c0_14] : memref<128x384xbf16, #tpu.memory_space<vmem>>, vector<128x384xbf16>
      %cst_15 = arith.constant dense<0.000000e+00> : vector<64x384xf32>
      %16 = tpu.matmul %14, %15, %cst_15 {dimension_numbers = #tpu.dot_dimension_numbers<[1], [0], [0], [1], [0, 0, 1, 1], [], []>} : vector<64x128xbf16>, vector<128x384xbf16>, vector<64x384xf32> -> vector<64x384xf32>
      %c0_16 = arith.constant 0 : index
      %c0_17 = arith.constant 0 : index
      %17 = vector.load %arg7[%c0_16, %c0_17] : memref<1x384xf32, #tpu.memory_space<vmem>>, vector<1x384xf32>
      %18 = vector.broadcast %17 : vector<1x384xf32> to vector<64x384xf32>
      %19 = arith.addf %16, %18 : vector<64x384xf32>
      %20 = vector.extract_strided_slice %19 {offsets = [0, 0], sizes = [64, 128], strides = [1, 1]} : vector<64x384xf32> to vector<64x128xf32>
      %cst_18 = arith.constant 0.0883883461 : f32
      %21 = vector.broadcast %cst_18 : f32 to vector<64x128xf32>
      %22 = arith.mulf %20, %21 : vector<64x128xf32>
      %23 = vector.shape_cast %22 : vector<64x128xf32> to vector<2x32x128xf32>
      %24 = arith.truncf %23 : vector<2x32x128xf32> to vector<2x32x128xbf16>
      %25 = vector.extract_strided_slice %19 {offsets = [0, 128], sizes = [64, 128], strides = [1, 1]} : vector<64x384xf32> to vector<64x128xf32>
      %26 = vector.shape_cast %25 : vector<64x128xf32> to vector<2x32x128xf32>
      %27 = arith.truncf %26 : vector<2x32x128xf32> to vector<2x32x128xbf16>
      %28 = vector.extract_strided_slice %19 {offsets = [0, 256], sizes = [64, 128], strides = [1, 1]} : vector<64x384xf32> to vector<64x128xf32>
      %29 = vector.shape_cast %28 : vector<64x128xf32> to vector<2x32x128xf32>
      %30 = arith.truncf %29 : vector<2x32x128xf32> to vector<2x32x128xbf16>
      "tpu.trace_start"() <{level = 10 : i32, message = "bqd,bkd->bqk"}> : () -> ()
      %cst_19 = arith.constant dense<0.000000e+00> : vector<2x32x32xf32>
      %31 = tpu.matmul %24, %27, %cst_19 {dimension_numbers = #tpu.dot_dimension_numbers<[2], [2], [1], [1], [0, 0, 0, 1, 1, 1], [0], [0]>} : vector<2x32x128xbf16>, vector<2x32x128xbf16>, vector<2x32x32xf32> -> vector<2x32x32xf32>
      "tpu.trace_stop"() : () -> ()
      %32 = tpu.iota {dimensions = array<i32: 0>} : vector<32x32xi32>
      %33 = tpu.iota {dimensions = array<i32: 1>} : vector<32x32xi32>
      %34 = arith.cmpi sle, %33, %32 : vector<32x32xi32>
      %35 = vector.shape_cast %34 : vector<32x32xi1> to vector<1x32x32xi1>
      %c0_20 = arith.constant 0 : index
      %c0_21 = arith.constant 0 : index
      %c0_22 = arith.constant 0 : index
      %36 = vector.load %arg4[%c0_20, %c0_21, %c0_22] : memref<2x1x32xi32, #tpu.memory_space<vmem>>, vector<2x1x32xi32>
      %c0_i32_23 = arith.constant 0 : i32
      %37 = vector.broadcast %c0_i32_23 : i32 to vector<2x1x32xi32>
      %38 = arith.cmpi sgt, %36, %37 : vector<2x1x32xi32>
      %39 = vector.broadcast %38 : vector<2x1x32xi1> to vector<2x32x32xi1>
      %40 = vector.broadcast %35 : vector<1x32x32xi1> to vector<2x32x32xi1>
      %41 = arith.andi %39, %40 : vector<2x32x32xi1>
      %cst_24 = arith.constant -1.000000e+09 : f32
      %42 = vector.broadcast %cst_24 : f32 to vector<2x32x32xf32>
      %43 = arith.select %41, %31, %42 : vector<2x32x32xi1>, vector<2x32x32xf32>
      %cst_25 = arith.constant dense<0xFF800000> : vector<2x32xf32>
      %44 = vector.multi_reduction <maximumf>, %43, %cst_25 [2] : vector<2x32x32xf32> to vector<2x32xf32>
      %45 = vector.shape_cast %44 : vector<2x32xf32> to vector<2x32x1xf32>
      %46 = vector.broadcast %45 : vector<2x32x1xf32> to vector<2x32x32xf32>
      %47 = arith.subf %43, %46 : vector<2x32x32xf32>
      %48 = math.exp %47 : vector<2x32x32xf32>
      %cst_26 = arith.constant dense<0.000000e+00> : vector<2x32xf32>
      %49 = vector.multi_reduction <add>, %48, %cst_26 [2] : vector<2x32x32xf32> to vector<2x32xf32>
      %50 = vector.shape_cast %49 : vector<2x32xf32> to vector<2x32x1xf32>
      %51 = tpu.reciprocal %50 {approx = true} : vector<2x32x1xf32> -> vector<2x32x1xf32>
      %52 = vector.broadcast %51 : vector<2x32x1xf32> to vector<2x32x32xf32>
      %53 = arith.mulf %48, %52 : vector<2x32x32xf32>
      %c0_27 = arith.constant 0 : index
      %c0_28 = arith.constant 0 : index
      %c0_29 = arith.constant 0 : index
      %54 = vector.load %arg15[%c0_27, %c0_28, %c0_29] : memref<2x32x32xf32, #tpu.memory_space<vmem>>, vector<2x32x32xf32>
      tpu.vector_store %arg15[%c0_27, %c0_28, %c0_29], %53 {strides = array<i32>} : memref<2x32x32xf32, #tpu.memory_space<vmem>>, vector<2x32x32xf32>,
      %55 = arith.truncf %53 : vector<2x32x32xf32> to vector<2x32x32xbf16>
      "tpu.trace_start"() <{level = 10 : i32, message = "bqk,bkd->bqd"}> : () -> ()
      %cst_30 = arith.constant dense<0.000000e+00> : vector<2x32x128xf32>
      %56 = tpu.matmul %55, %30, %cst_30 {dimension_numbers = #tpu.dot_dimension_numbers<[2], [1], [1], [2], [0, 0, 0, 1, 1, 2], [0], [0]>} : vector<2x32x32xbf16>, vector<2x32x128xbf16>, vector<2x32x128xf32> -> vector<2x32x128xf32>
      "tpu.trace_stop"() : () -> ()
      %57 = arith.addf %13, %56 : vector<2x32x128xf32>
      %58 = vector.shape_cast %57 : vector<2x32x128xf32> to vector<64x128xf32>
      %59 = arith.truncf %58 : vector<64x128xf32> to vector<64x128xbf16>
      %c0_31 = arith.constant 0 : index
      %c0_32 = arith.constant 0 : index
      %60 = vector.load %arg8[%c0_31, %c0_32] : memref<128x128xbf16, #tpu.memory_space<vmem>>, vector<128x128xbf16>
      %cst_33 = arith.constant dense<0.000000e+00> : vector<64x128xf32>
      %61 = tpu.matmul %59, %60, %cst_33 {dimension_numbers = #tpu.dot_dimension_numbers<[1], [0], [0], [1], [0, 0, 1, 1], [], []>} : vector<64x128xbf16>, vector<128x128xbf16>, vector<64x128xf32> -> vector<64x128xf32>
      %c0_34 = arith.constant 0 : index
      %c0_35 = arith.constant 0 : index
      %62 = vector.load %arg9[%c0_34, %c0_35] : memref<1x128xf32, #tpu.memory_space<vmem>>, vector<1x128xf32>
      %63 = vector.broadcast %62 : vector<1x128xf32> to vector<64x128xf32>
      %64 = arith.addf %61, %63 : vector<64x128xf32>
      %cst_36 = arith.constant 0.0883883461 : f32
      %65 = vector.broadcast %cst_36 : f32 to vector<64x128xf32>
      %66 = arith.mulf %64, %65 : vector<64x128xf32>
      %67 = vector.shape_cast %66 : vector<64x128xf32> to vector<2x32x128xf32>
      %68 = arith.truncf %67 : vector<2x32x128xf32> to vector<2x32x128xbf16>
      %c0_37 = arith.constant 0 : index
      %c0_38 = arith.constant 0 : index
      %c0_39 = arith.constant 0 : index
      %69 = vector.load %arg3[%c0_37, %c0_38, %c0_39] : memref<2x32x128xbf16, #tpu.memory_space<vmem>>, vector<2x32x128xbf16>
      %70 = vector.shape_cast %69 : vector<2x32x128xbf16> to vector<64x128xbf16>
      %c0_40 = arith.constant 0 : index
      %c0_41 = arith.constant 0 : index
      %71 = vector.load %arg10[%c0_40, %c0_41] : memref<128x256xbf16, #tpu.memory_space<vmem>>, vector<128x256xbf16>
      %cst_42 = arith.constant dense<0.000000e+00> : vector<64x256xf32>
      %72 = tpu.matmul %70, %71, %cst_42 {dimension_numbers = #tpu.dot_dimension_numbers<[1], [0], [0], [1], [0, 0, 1, 1], [], []>} : vector<64x128xbf16>, vector<128x256xbf16>, vector<64x256xf32> -> vector<64x256xf32>
      %c0_43 = arith.constant 0 : index
      %c0_44 = arith.constant 0 : index
      %73 = vector.load %arg11[%c0_43, %c0_44] : memref<1x256xf32, #tpu.memory_space<vmem>>, vector<1x256xf32>
      %74 = vector.broadcast %73 : vector<1x256xf32> to vector<64x256xf32>
      %75 = arith.addf %72, %74 : vector<64x256xf32>
      %76 = vector.extract_strided_slice %75 {offsets = [0, 0], sizes = [64, 128], strides = [1, 1]} : vector<64x256xf32> to vector<64x128xf32>
      %77 = vector.shape_cast %76 : vector<64x128xf32> to vector<2x32x128xf32>
      %78 = arith.truncf %77 : vector<2x32x128xf32> to vector<2x32x128xbf16>
      %79 = vector.extract_strided_slice %75 {offsets = [0, 128], sizes = [64, 128], strides = [1, 1]} : vector<64x256xf32> to vector<64x128xf32>
      %80 = vector.shape_cast %79 : vector<64x128xf32> to vector<2x32x128xf32>
      %81 = arith.truncf %80 : vector<2x32x128xf32> to vector<2x32x128xbf16>
      "tpu.trace_start"() <{level = 10 : i32, message = "bqd,bkd->bqk"}> : () -> ()
      %cst_45 = arith.constant dense<0.000000e+00> : vector<2x32x32xf32>
      %82 = tpu.matmul %68, %78, %cst_45 {dimension_numbers = #tpu.dot_dimension_numbers<[2], [2], [1], [1], [0, 0, 0, 1, 1, 1], [0], [0]>} : vector<2x32x128xbf16>, vector<2x32x128xbf16>, vector<2x32x32xf32> -> vector<2x32x32xf32>
      "tpu.trace_stop"() : () -> ()
      %c0_46 = arith.constant 0 : index
      %c0_47 = arith.constant 0 : index
      %c0_48 = arith.constant 0 : index
      %83 = vector.load %arg5[%c0_46, %c0_47, %c0_48] : memref<2x1x32xi32, #tpu.memory_space<vmem>>, vector<2x1x32xi32>
      %c0_i32_49 = arith.constant 0 : i32
      %84 = vector.broadcast %c0_i32_49 : i32 to vector<2x1x32xi32>
      %85 = arith.cmpi sgt, %83, %84 : vector<2x1x32xi32>
      %cst_50 = arith.constant -1.000000e+09 : f32
      %86 = vector.shape_cast %85 : vector<2x1x32xi1> to vector<2x1x32xi1>
      %87 = vector.broadcast %86 : vector<2x1x32xi1> to vector<2x32x32xi1>
      %88 = vector.broadcast %cst_50 : f32 to vector<2x32x32xf32>
      %89 = arith.select %87, %82, %88 : vector<2x32x32xi1>, vector<2x32x32xf32>
      %cst_51 = arith.constant dense<0xFF800000> : vector<2x32xf32>
      %90 = vector.multi_reduction <maximumf>, %89, %cst_51 [2] : vector<2x32x32xf32> to vector<2x32xf32>
      %91 = vector.shape_cast %90 : vector<2x32xf32> to vector<2x32x1xf32>
      %92 = vector.broadcast %91 : vector<2x32x1xf32> to vector<2x32x32xf32>
      %93 = arith.subf %89, %92 : vector<2x32x32xf32>
      %94 = math.exp %93 : vector<2x32x32xf32>
      %cst_52 = arith.constant dense<0.000000e+00> : vector<2x32xf32>
      %95 = vector.multi_reduction <add>, %94, %cst_52 [2] : vector<2x32x32xf32> to vector<2x32xf32>
      %96 = vector.shape_cast %95 : vector<2x32xf32> to vector<2x32x1xf32>
      %97 = tpu.reciprocal %96 {approx = true} : vector<2x32x1xf32> -> vector<2x32x1xf32>
      %98 = vector.broadcast %97 : vector<2x32x1xf32> to vector<2x32x32xf32>
      %99 = arith.mulf %94, %98 : vector<2x32x32xf32>
      %c0_53 = arith.constant 0 : index
      %c0_54 = arith.constant 0 : index
      %c0_55 = arith.constant 0 : index
      %100 = vector.load %arg16[%c0_53, %c0_54, %c0_55] : memref<2x32x32xf32, #tpu.memory_space<vmem>>, vector<2x32x32xf32>
      tpu.vector_store %arg16[%c0_53, %c0_54, %c0_55], %99 {strides = array<i32>} : memref<2x32x32xf32, #tpu.memory_space<vmem>>, vector<2x32x32xf32>,
      %101 = arith.truncf %99 : vector<2x32x32xf32> to vector<2x32x32xbf16>
      "tpu.trace_start"() <{level = 10 : i32, message = "bqk,bkd->bqd"}> : () -> ()
      %cst_56 = arith.constant dense<0.000000e+00> : vector<2x32x128xf32>
      %102 = tpu.matmul %101, %81, %cst_56 {dimension_numbers = #tpu.dot_dimension_numbers<[2], [1], [1], [2], [0, 0, 0, 1, 1, 2], [0], [0]>} : vector<2x32x32xbf16>, vector<2x32x128xbf16>, vector<2x32x128xf32> -> vector<2x32x128xf32>
      "tpu.trace_stop"() : () -> ()
      %103 = arith.addf %57, %102 : vector<2x32x128xf32>
      %104 = arith.truncf %103 : vector<2x32x128xf32> to vector<2x32x128xbf16>
      %c0_57 = arith.constant 0 : index
      %c0_58 = arith.constant 0 : index
      %c0_59 = arith.constant 0 : index
      %105 = vector.load %arg17[%c0_57, %c0_58, %c0_59] : memref<2x32x128xbf16, #tpu.memory_space<vmem>>, vector<2x32x128xbf16>
      tpu.vector_store %arg17[%c0_57, %c0_58, %c0_59], %104 {strides = array<i32>} : memref<2x32x128xbf16, #tpu.memory_space<vmem>>, vector<2x32x128xbf16>,
    } else {
    }
    %c0 = arith.constant 0 : index
    %c0_1 = arith.constant 0 : index
    %c0_2 = arith.constant 0 : index
    %3 = vector.load %arg17[%c0, %c0_1, %c0_2] : memref<2x32x128xbf16, #tpu.memory_space<vmem>>, vector<2x32x128xbf16>
    %4 = vector.shape_cast %3 : vector<2x32x128xbf16> to vector<64x128xbf16>
    %c0_3 = arith.constant 0 : index
    %c0_4 = arith.constant 0 : index
    %5 = vector.load %arg12[%c0_3, %c0_4] : memref<128x128xbf16, #tpu.memory_space<vmem>>, vector<128x128xbf16>
    %cst = arith.constant dense<0.000000e+00> : vector<64x128xf32>
    %6 = tpu.matmul %4, %5, %cst {dimension_numbers = #tpu.dot_dimension_numbers<[1], [0], [0], [1], [0, 0, 1, 1], [], []>} : vector<64x128xbf16>, vector<128x128xbf16>, vector<64x128xf32> -> vector<64x128xf32>
    %c0_5 = arith.constant 0 : index
    %c0_6 = arith.constant 0 : index
    %7 = vector.load %arg13[%c0_5, %c0_6] : memref<1x128xf32, #tpu.memory_space<vmem>>, vector<1x128xf32>
    %8 = vector.broadcast %7 : vector<1x128xf32> to vector<64x128xf32>
    %9 = arith.addf %6, %8 : vector<64x128xf32>
    %10 = vector.shape_cast %9 : vector<64x128xf32> to vector<2x32x128xf32>
    %c0_7 = arith.constant 0 : index
    %c0_8 = arith.constant 0 : index
    %c0_9 = arith.constant 0 : index
    %11 = vector.load %arg14[%c0_7, %c0_8, %c0_9] : memref<2x32x128xf32, #tpu.memory_space<vmem>>, vector<2x32x128xf32>
    tpu.vector_store %arg14[%c0_7, %c0_8, %c0_9], %10 {strides = array<i32>} : memref<2x32x128xf32, #tpu.memory_space<vmem>>, vector<2x32x128xf32>,
    return
  }
  func.func @transform_0(%arg0: i32, %arg1: i32) -> (i32, i32, i32) {
    %c0_i32 = arith.constant 0 : i32
    %c0_i32_0 = arith.constant 0 : i32
    %c0_i32_1 = arith.constant 0 : i32
    return %arg0, %c0_i32, %c0_i32_0 : i32, i32, i32
  }
  func.func @transform_1(%arg0: i32, %arg1: i32) -> (i32, i32, i32) {
    %c0_i32 = arith.constant 0 : i32
    %c0_i32_0 = arith.constant 0 : i32
    %c0_i32_1 = arith.constant 0 : i32
    return %arg0, %c0_i32, %c0_i32_0 : i32, i32, i32
  }
  func.func @transform_2(%arg0: i32, %arg1: i32) -> (i32, i32, i32) {
    %c0_i32 = arith.constant 0 : i32
    %c0_i32_0 = arith.constant 0 : i32
    %c0_i32_1 = arith.constant 0 : i32
    return %arg0, %c0_i32, %c0_i32_0 : i32, i32, i32
  }
  func.func @transform_3(%arg0: i32, %arg1: i32) -> (i32, i32, i32) {
    %c0_i32 = arith.constant 0 : i32
    %c0_i32_0 = arith.constant 0 : i32
    %c0_i32_1 = arith.constant 0 : i32
    return %arg0, %c0_i32, %c0_i32_0 : i32, i32, i32
  }
  func.func @transform_4(%arg0: i32, %arg1: i32) -> (i32, i32) {
    %c0_i32 = arith.constant 0 : i32
    %c0_i32_0 = arith.constant 0 : i32
    %c0_i32_1 = arith.constant 0 : i32
    return %c0_i32, %c0_i32_0 : i32, i32
  }
  func.func @transform_5(%arg0: i32, %arg1: i32) -> (i32, i32) {
    %c0_i32 = arith.constant 0 : i32
    %c0_i32_0 = arith.constant 0 : i32
    %c0_i32_1 = arith.constant 0 : i32
    return %c0_i32, %c0_i32_0 : i32, i32
  }
  func.func @transform_6(%arg0: i32, %arg1: i32) -> (i32, i32) {
    %c0_i32 = arith.constant 0 : i32
    %c0_i32_0 = arith.constant 0 : i32
    %c0_i32_1 = arith.constant 0 : i32
    return %c0_i32, %c0_i32_0 : i32, i32
  }
  func.func @transform_7(%arg0: i32, %arg1: i32) -> (i32, i32) {
    %c0_i32 = arith.constant 0 : i32
    %c0_i32_0 = arith.constant 0 : i32
    %c0_i32_1 = arith.constant 0 : i32
    return %c0_i32, %c0_i32_0 : i32, i32
  }
  func.func @transform_8(%arg0: i32, %arg1: i32) -> (i32, i32) {
    %c0_i32 = arith.constant 0 : i32
    %c0_i32_0 = arith.constant 0 : i32
    %c0_i32_1 = arith.constant 0 : i32
    return %c0_i32, %c0_i32_0 : i32, i32
  }
  func.func @transform_9(%arg0: i32, %arg1: i32) -> (i32, i32) {
    %c0_i32 = arith.constant 0 : i32
    %c0_i32_0 = arith.constant 0 : i32
    %c0_i32_1 = arith.constant 0 : i32
    return %c0_i32, %c0_i32_0 : i32, i32
  }
  func.func @transform_10(%arg0: i32, %arg1: i32) -> (i32, i32) {
    %c0_i32 = arith.constant 0 : i32
    %c0_i32_0 = arith.constant 0 : i32
    return %c0_i32, %arg1 : i32, i32
  }
  func.func @transform_11(%arg0: i32, %arg1: i32) -> (i32, i32) {
    %c0_i32 = arith.constant 0 : i32
    %c0_i32_0 = arith.constant 0 : i32
    return %c0_i32, %arg1 : i32, i32
  }
  func.func @transform_12(%arg0: i32, %arg1: i32) -> (i32, i32, i32) {
    %c0_i32 = arith.constant 0 : i32
    %c0_i32_0 = arith.constant 0 : i32
    return %arg0, %c0_i32, %arg1 : i32, i32, i32
  }
  func.func @transform_13(%arg0: i32, %arg1: i32) -> (i32, i32, i32) {
    %c0_i32 = arith.constant 0 : i32
    %c0_i32_0 = arith.constant 0 : i32
    %c0_i32_1 = arith.constant 0 : i32
    return %arg0, %c0_i32, %c0_i32_0 : i32, i32, i32
  }
  func.func @transform_14(%arg0: i32, %arg1: i32) -> (i32, i32, i32) {
    %c0_i32 = arith.constant 0 : i32
    %c0_i32_0 = arith.constant 0 : i32
    %c0_i32_1 = arith.constant 0 : i32
    return %arg0, %c0_i32, %c0_i32_0 : i32, i32, i32
  }
}

</mosaic_0001>

<bundles_post_ra>
// kernel: tpu_custom_call.1
= control target key start
LH: loop header
LB: loop body
LE: loop exit
PB: predicated region body
PF: predicated region fallthrough
CT: control target
= control target key end

     0   :  { %s4725_s0 = inlined_call_operand.hbm [shape: bf16[8,32,128], index: 0, kind: input, shape index: {}]   ;;  %s4726_s1 = inlined_call_operand.hbm [shape: bf16[8,32,128], index: 1, kind: input, shape index: {}]   ;;  %s4727_s2 = inlined_call_operand.hbm [shape: s32[8,1,32], index: 2, kind: input, shape index: {}]   ;;  %s4728_s3 = inlined_call_operand.hbm [shape: s32[8,1,32], index: 3, kind: input, shape index: {}]   ;;  %s4729_s4 = inlined_call_operand.hbm [shape: bf16[128,384], index: 4, kind: input, shape index: {}]   ;;  %s4730_s5 = inlined_call_operand.vmem [shape: f32[1,384], index: 5, kind: input, shape index: {}]   ;;  %s4731_s6 = inlined_call_operand.hbm [shape: bf16[128,128], index: 6, kind: input, shape index: {}]   ;;  %s4732_s7 = inlined_call_operand.hbm [shape: f32[1,128], index: 7, kind: input, shape index: {}]   ;;  %s4733_s8 = inlined_call_operand.hbm [shape: bf16[128,256], index: 8, kind: input, shape index: {}]   ;;  %s4734_s9 = inlined_call_operand.vmem [shape: f32[1,256], index: 9, kind: input, shape index: {}]   ;;  %s4735_s10 = inlined_call_operand.hbm [shape: bf16[128,256], index: 10, kind: input, shape index: {}]   ;;  %s4736_s11 = inlined_call_operand.vmem [shape: f32[1,256], index: 11, kind: input, shape index: {}]   ;;  %s4737_s12 = inlined_call_operand.hbm [shape: f32[8,32,256], index: 12, kind: output, shape index: {0}]   ;;  %s4738_s13 = inlined_call_operand.hbm [shape: f32[8,32,32], index: 13, kind: output, shape index: {1}]   ;;  %s4739_s14 = inlined_call_operand.hbm [shape: f32[8,32,32], index: 14, kind: output, shape index: {2}]  }
   0x1   :  { %4777 = sst [smem:[#allocation49_spill]] %s4725_s0 }
   0x2   :  { %4778 = sst [smem:[#allocation50_spill]] %s4726_s1 }
   0x3   :  { %4779 = sst [smem:[#allocation51_spill]] %s4727_s2 }
   0x4   :  { %4780 = sst [smem:[#allocation52_spill]] %s4728_s3 }
   0x5   :  { %4781 = sst [smem:[#allocation53_spill]] %s4729_s4 }
   0x6   :  { %4782 = sst [smem:[#allocation54_spill]] %s4730_s5 }
   0x7   :  { %4783 = sst [smem:[#allocation55_spill]] %s4731_s6 }
   0x8   :  { %4784 = sst [smem:[#allocation56_spill]] %s4732_s7 }
   0x9   :  { %4785 = sst [smem:[#allocation57_spill]] %s4733_s8 }
   0xa   :  { %4786 = sst [smem:[#allocation58_spill]] %s4734_s9 }
   0xb   :  { %4787 = sst [smem:[#allocation59_spill]] %s4735_s10 }
   0xc   :  { %4788 = sst [smem:[#allocation60_spill]] %s4736_s11 }
   0xd   :  { %4789 = sst [smem:[#allocation61_spill]] %s4737_s12 }
   0xe   :  { %4790 = sst [smem:[#allocation62_spill]] %s4738_s13 }
   0xf   :  { %4791 = sst [smem:[#allocation63_spill]] %s4739_s14 }
  0x10   :  { %20 = vsyncpa [#allocation4], 0 }
  0x11   :  { %22 = vsyncpa [#allocation4 + $0x1], 0 }
  0x12   :  { %23 = vsyncpa [#allocation7], 0 }
  0x13   :  { %25 = vsyncpa [#allocation7 + $0x1], 0 }
  0x14   :  { %26 = vsyncpa [#allocation10], 0 }
  0x15   :  { %28 = vsyncpa [#allocation10 + $0x1], 0 }
  0x16   :  { %29 = vsyncpa [#allocation13], 0 }
  0x17   :  { %30 = vsyncpa [#allocation16], 0 }
  0x18   :  { %31 = vsyncpa [#allocation5], 0 }
  0x19   :  { %33 = vsyncpa [#allocation5 + $0x1], 0 }
  0x1a   :  { %34 = vsyncpa [#allocation20], 0 }
  0x1b   :  { %36 = vsyncpa [#allocation20 + $0x1], 0  ;;  %s3892_s29 = smov 0   ;;  %s3894_s30 = smov 0  }
  0x1c   :  { %s3896_s15 = smov 0   ;;  %s3898_s16 = smov 0  }
  0x1d   :  { %s3900_s17 = smov 0   ;;  %s3902_s18 = smov 0  }
  0x1e   :  { %s3904_s19 = smov 0   ;;  %s3906_s20 = smov 0  }
  0x1f   :  { %s3908_s21 = smov 0   ;;  %s3910_s22 = smov 0  }
  0x20   :  { %s3912_s23 = smov 0   ;;  %s3914_s24 = smov 0  }
  0x21   :  { %s3916_s25 = smov 0   ;;  %s3918_s26 = smov 0  }
  0x22 LB: > { %4792 = sst [smem:[#allocation31_spill]] %s3747_s29  ;;  %s3961_s27 = sadd.s32 4294967295, %s3799_s26   ;;  %s3799_s26 = sphi %s3918_s26, %s42_s26   ;;  %s3795_s25 = sphi %s3916_s25, %s4881_s25   ;;  %s3791_s24 = sphi %s3914_s24, %s4880_s24   ;;  %s3787_s23 = sphi %s3912_s23, %s4879_s23   ;;  %s3783_s22 = sphi %s3910_s22, %s4878_s22   ;;  %s3779_s21 = sphi %s3908_s21, %s4888_s21   ;;  %s3775_s20 = sphi %s3906_s20, %s4887_s20   ;;  %s3771_s19 = sphi %s3904_s19, %s4876_s19   ;;  %s3767_s18 = sphi %s3902_s18, %s4886_s18   ;;  %s3763_s17 = sphi %s3900_s17, %s4885_s17   ;;  %s3759_s16 = sphi %s3898_s16, %s4884_s16   ;;  %s3755_s15 = sphi %s3896_s15, %s4883_s15   ;;  %s3751_s30 = sphi %s3894_s30, %s4882_s30   ;;  %s3747_s29 = sphi %s3892_s29, %s4875_s29  }
  0x23   : > { %4793 = sst [smem:[#allocation32_spill]] %s3751_s30  ;;  %p304_p0 = scmp.ne.s32.totalorder %s3763_s17, %s3759_s16 }
  0x24   : > { %4794 = sst [smem:[#allocation33_spill]] %s3775_s20  ;;  %p75_p1 = scmp.eq.s32.totalorder %s3961_s27, 0 }
  0x25   : > { %4795 = sst [smem:[#allocation34_spill]] %s3783_s22  ;;  %p355_p2 = scmp.ne.s32.totalorder %s3755_s15, %s3751_s30 }
  0x26   : > { %4796 = sst [smem:[#allocation35_spill]] %s3787_s23  ;;  %p356_p3 = scmp.eq.s32.totalorder %s3961_s27, 7 }
  0x27   : > { %4797 = sst [smem:[#allocation36_spill]] %s3791_s24  ;;  %p361_p4 = scmp.ne.s32.totalorder %s3751_s30, %s3747_s29 }
  0x28   : > { %4798 = sst [smem:[#allocation37_spill]] %s3795_s25  ;;  %p3972_p5 = por %p304_p0, %p75_p1 }
  0x29   : > { %4799 = sst [smem:[#allocation38_spill]] %s3961_s27  ;;  %p2572_p6 = scmp.ge.s32.totalorder %s3799_s26, 1 }
  0x2a   : > { %s4800_s28 = scalar_select %p3972_p5, 1, 0 }
  0x2b   : > { %p3979_p7 = por %p356_p3, %p355_p2  ;;  %p421_p8 = scmp.lt.s32.totalorder %s3799_s26, 9 }
  0x2c   : > { %4801 = sst [smem:[#allocation39_spill]] %s4800_s28  ;;  %s3801_s9 = smov [#allocation11]  }
  0x2d   : > { %s4802_s12 = scalar_select %p3979_p7, 1, 0 }
  0x2e   : > { %s4804_s4 = sld [smem:[#allocation53_spill]]  ;;  %p3987_p9 = pnand %p2572_p6, %p421_p8 }
  0x2f   : > { %4803 = sst [smem:[#allocation40_spill]] %s4802_s12  ;;  %s434_s5 = sshll.u32 %s3801_s9, 4  ;;  %s435_s5 = int_to_ptr.vmem [resolvable:$true] %s434_s5 }
  0x30   : > { %s4805_s23 = scalar_select %p3987_p9, 1, 0 }
  0x31   : > { %p3056_p10 = pneg %p3987_p9  ;;  %s4808_s6 = sld [smem:[#allocation55_spill]] }
  0x32   : > { %4806 = sst [smem:[#allocation41_spill]] %s4805_s23  ;;  %s3802_s9 = smov 192  }
  0x33   : > { %p3995_p11 = pnand %p3056_p10, %p75_p1  ;;  %s3803_s11 = smov 12  }
  0x34   : > { %s432_s16 = sshll.u32 %s4804_s4, 4  ;;  %s3804_s22 = smov [#allocation12]   ;;  %s433_s16 = int_to_ptr.hbm [resolvable:$true] %s432_s16 }
  0x35   : > { %3059 = dma.hbm_to_vmem [thread:$0]  (!%p3995_p11), %s433_s16, 3072, %s435_s5, [#allocation10], %s3802_s9, %s3802_s9, %s3803_s11  }
  0x36   : > { %s451_s28 = sshll.u32 %s3804_s22, 4  ;;  %s4753_s4 = smov 64   ;;  %s452_s28 = int_to_ptr.vmem [resolvable:$true] %s451_s28 }
  0x37   : > { %s449_s12 = sshll.u32 %s4808_s6, 4  ;;  %s4755_s14 = smov 4   ;;  %s450_s12 = int_to_ptr.hbm [resolvable:$true] %s449_s12 }
  0x38   : > { %3062 = dma.hbm_to_vmem [thread:$0]  (!%p3995_p11), %s450_s12, 1024, %s452_s28, [#allocation13], %s4753_s4, %s4753_s4, %s4755_s14  }
  0x39   : > { %s4752_s6 = sadd.s32 4294967294, %s3799_s26   ;;  %p68_p12 = scmp.ne.s32.totalorder %s3779_s21, %s3775_s20 }
  0x3a   : > { %p69_p13 = scmp.eq.s32.totalorder %s3799_s26, 0  ;;  %p74_p0 = scmp.ne.s32.totalorder %s3775_s20, %s3771_s19 }
  0x3b   : > { %p362_p2 = scmp.eq.s32.totalorder %s4752_s6, 7  ;;  %p4021_p6 = por %p356_p3, %p68_p12 }
  0x3c   : > { %p4027_p8 = por %p69_p13, %p68_p12  ;;  %p4033_p10 = por %p75_p1, %p74_p0 }
  0x3d   : > { %s4809_s11 = scalar_select %p4021_p6, 1, 0 }
  0x3e   : > { %s4812_s12 = scalar_select %p4033_p10, 1, 0 }
  0x3f   : > { %4810 = sst [smem:[#allocation42_spill]] %s4809_s11  ;;  %p4040_p7 = por %p362_p2, %p361_p4 }
  0x40   : > { %4813 = sst [smem:[#allocation43_spill]] %s4812_s12  ;;  %p4044_p3 = por %p362_p2, %p74_p0 }
  0x41   : > { %s4814_s19 = scalar_select %p4040_p7, 1, 0 }
  0x42   : > { %s4816_s28 = scalar_select %p4044_p3, 1, 0 }
  0x43   : > { %4815 = sst [smem:[#allocation44_spill]] %s4814_s19  ;;  %p3099_p6 = scmp.lt.s32.totalorder %s3799_s26, 8 }
  0x44   : > { %4817 = sst [smem:[#allocation45_spill]] %s4816_s28  ;;  %s4050_s16 = sand.u32 1, %s3799_s26  }
  0x45   : > { %s496_s9 = sand.u32 1, %s3779_s21   ;;  %s2901_s5 = sshll.u32 %s3795_s25, 5 }
  0x46   : > { %s2578_s6 = sshll.u32 %s496_s9, 5  ;;  %s4818_s0 = sld [smem:[#allocation49_spill]] }
  0x47   : > { %s498_s19 = scalar_lea.vmem [#allocation3], %s2578_s6  ;;  %p4061_p4 = pnand %p3099_p6, %p4027_p8 }
  0x48   : > { %s507_s11 = sshll.u32 %s498_s19, 4  ;;  %s4065_s30 = sshll.u32 %s496_s9, 1  ;;  %s508_s11 = int_to_ptr.vmem [resolvable:$true] %s507_s11 }
  0x49   : > { %s4820_s1 = sld [smem:[#allocation50_spill]]  ;;  %s4821_s19 = smov 4  }
  0x4a   : > { %s521_s20 = scalar_lea.vmem [#allocation6], %s2578_s6  ;;  %s4770_s9 = scalar_lea.sflag [#allocation7], %s4050_s16 }
  0x4b   : > { %s530_s27 = sshll.u32 %s521_s20, 4  ;;  %s4823_s7 = sld [smem:[#allocation56_spill]]  ;;  %s531_s27 = int_to_ptr.vmem [resolvable:$true] %s530_s27 }
  0x4c   : > { %s504_s14 = scalar_lea.hbm %s4818_s0, %s2901_s5  ;;  %s4822_s0 = smov 64  }
  0x4d   : > { %s505_s29 = sshll.u32 %s504_s14, 4  ;;  %s4769_s14 = scalar_lea.sflag [#allocation4], %s4050_s16  ;;  %s506_s29 = int_to_ptr.hbm [resolvable:$true] %s505_s29 }
  0x4e   : > { %3072 = dma.hbm_to_vmem [thread:$0]  (!%p4061_p4), %s506_s29, 512, %s508_s11, %s4769_s14, %s4822_s0, %s4822_s0, %s4821_s19  }
  0x4f   : > { %s527_s4 = scalar_lea.hbm %s4820_s1, %s2901_s5  ;;  %s3807_s29 = smov [#allocation14]  }
  0x50   : > { %s528_s22 = sshll.u32 %s527_s4, 4  ;;  %s466_s6 = sshll.u32 %s3807_s29, 4  ;;  %s529_s22 = int_to_ptr.hbm [resolvable:$true] %s528_s22  ;;  %s467_s6 = int_to_ptr.vmem [resolvable:$true] %s466_s6 }
  0x51   : > { %3075 = dma.hbm_to_vmem [thread:$0]  (!%p4061_p4), %s529_s22, 512, %s531_s27, %s4770_s9, %s4822_s0, %s4822_s0, %s4821_s19  }
  0x52   : > { %s464_s23 = sshll.u32 %s4823_s7, 4  ;;  %s4824_s8 = sld [smem:[#allocation57_spill]]  ;;  %s465_s23 = int_to_ptr.hbm [resolvable:$true] %s464_s23 }
  0x53   : > { %3065 = dma.hbm_to_vmem [thread:$0]  (!%p3995_p11), %s465_s23, 16, %s467_s6, [#allocation13]  }
  0x54   : > { %s3808_s14 = smov [#allocation15]   ;;  %s4771_s22 = smov 128  }
  0x55   : > { %s477_s27 = sshll.u32 %s3808_s14, 4  ;;  %s3810_s5 = smov 8   ;;  %s478_s27 = int_to_ptr.vmem [resolvable:$true] %s477_s27 }
  0x56   : > { %s2587_s12 = sshll.u32 %s3795_s25, 1  ;;  %s4825_s2 = sld [smem:[#allocation51_spill]] }
  0x57   : > { %s544_s23 = scalar_lea.vmem [#allocation8], %s4065_s30  ;;  %s3811_s13 = smov 16  }
  0x58   : > { %s475_s4 = sshll.u32 %s4824_s8, 4  ;;  %s551_s6 = sshll.u32 %s544_s23, 4  ;;  %s476_s4 = int_to_ptr.hbm [resolvable:$true] %s475_s4  ;;  %s552_s6 = int_to_ptr.vmem [resolvable:$true] %s551_s6 }
  0x59   : > { %3068 = dma.hbm_to_vmem [thread:$0]  (!%p3995_p11), %s476_s4, 2048, %s478_s27, [#allocation16], %s4771_s22, %s4771_s22, %s3810_s5  }
  0x5a   : > { %s3812_s11 = smov 1   ;;  %s4826_s4 = scalar_lea.sflag [#allocation7], %s4050_s16 }
  0x5b   : > { %s4827_s3 = sld [smem:[#allocation52_spill]]  ;;  %s562_s22 = scalar_lea.sflag [#allocation10], %s4050_s16 }
  0x5c   : > { %s548_s20 = scalar_lea.hbm %s4825_s2, %s2587_s12  ;;  %s51_s1 = sadd.s32 1, %s3791_s24 }
  0x5d   : > { %s549_s14 = sshll.u32 %s548_s20, 4  ;;  %s565_s20 = scalar_lea.vmem [#allocation9], %s4065_s30  ;;  %s550_s14 = int_to_ptr.hbm [resolvable:$true] %s549_s14 }
  0x5e   : > { %3078 = dma.hbm_to_vmem [thread:$0]  (!%p4061_p4), %s550_s14, 32, %s552_s6, %s4826_s4, %s3811_s13, %s3811_s13, %s3812_s11  }
  0x5f   : > { %s572_s23 = sshll.u32 %s565_s20, 4  ;;  %s291_s6 = sadd.s32 1, %s3767_s18  ;;  %s573_s23 = int_to_ptr.vmem [resolvable:$true] %s572_s23 }
  0x60   : > { %p52_p11 = scmp.ge.s32.totalorder %s51_s1, 2  ;;  %p298_p12 = scmp.ne.s32.totalorder %s3767_s18, %s3763_s17 }
  0x61   : > { %s569_s5 = scalar_lea.hbm %s4827_s3, %s2587_s12  ;;  %s345_s14 = sadd.s32 1, %s3755_s15 }
  0x62   : > { %s570_s29 = sshll.u32 %s569_s5, 4  ;;  %s584_s4 = sand.u32 1, %s3767_s18   ;;  %s571_s29 = int_to_ptr.hbm [resolvable:$true] %s570_s29 }
  0x63   : > { %3081 = dma.hbm_to_vmem [thread:$0]  (!%p4061_p4), %s571_s29, 32, %s573_s23, %s562_s22, %s3811_s13, %s3811_s13, %s3812_s11  }
  0x64   : > { %s4890_s1 = smov (%p52_p11, %s51_s1), 0  ;;  %s4829_s30 = sadd.s32 1, %s3795_s25 }
  0x65   : > { %4828 = sst [smem:[#allocation46_spill]] %s4890_s1  ;;  %s4892_s30 = smov (!%p52_p11, %s4829_s30), %s3795_s25 }
  0x66   : > { %s288_s12 = ssub.s32 %s3791_s24, %s4890_s1  ;;  %p4129_p0 = por %p298_p12, %p69_p13 }
  0x67   : > { %p56_p2 = scmp.ge.s32.totalorder %s4892_s30, 4  ;;  %p289_p8 = scmp.eq.s32.totalorder %s288_s12, 0 }
  0x68   : > { %s2590_s22 = sshll.u32 %s584_s4, 6  ;;  %s2591_s13 = sshll.u32 %s3791_s24, 2 }
  0x69   : > { %s4894_s30 = smov (%p56_p2, %s4892_s30), 0  ;;  %s4832_s10 = sld [smem:[#allocation59_spill]] }
  0x6a   : > { %4831 = sst [smem:[#allocation47_spill]] %s4894_s30  ;;  %s58_s9 = ssub.s32 %s3795_s25, %s4894_s30 }
  0x6b   : > { %s4137_s11 = scalar_select %p289_p8, %s3767_s18, %s291_s6  }
  0x6c   : > { %p59_p4 = scmp.eq.s32.totalorder %s58_s9, 0  ;;  %s342_s27 = sor.u32 %s288_s12, %s58_s9 }
  0x6d   : > { %p343_p11 = scmp.eq.s32.totalorder %s342_s27, 0  ;;  %s4833_s23 = sadd.s32 1, %s3779_s21 }
  0x6e   : > { %s4147_s2 = scalar_select %p59_p4, %s3779_s21, %s4833_s23  }
  0x6f   : > { %s590_s20 = scalar_lea.hbm %s4832_s10, %s2591_s13  ;;  %s586_s7 = scalar_lea.vmem [#allocation17], %s2590_s22 }
  0x70   : > { %4834 = sst [smem:[#allocation48_spill]] %s4147_s2  ;;  %s591_s3 = sshll.u32 %s590_s20, 4  ;;  %s592_s3 = int_to_ptr.hbm [resolvable:$true] %s591_s3 }
  0x71   : > { %s4150_s4 = scalar_select %p343_p11, %s3755_s15, %s345_s14  }
  0x72   : > { %s593_s8 = sshll.u32 %s586_s7, 4  ;;  %p3082_p13 = pnand %p3099_p6, %p4129_p0  ;;  %s594_s8 = int_to_ptr.vmem [resolvable:$true] %s593_s8 }
  0x73   : > { %s4835_s6 = smov 128   ;;  %s4836_s12 = scalar_lea.sflag [#allocation4], %s4050_s16 }
  0x74   : > { %3084 = dma.hbm_to_vmem [thread:$0]  (!%p3082_p13), %s592_s3, 1024, %s594_s8, %s4836_s12, %s4835_s6, %s4822_s0, %s4821_s19  }
  0x75   : > { %611 = sbr.rel (%p3987_p9) target bundleno = 1897 (0x769), region = 68  ;;  %s4838_s13 = sld [smem:[#allocation38_spill]] (!%p3987_p9) }
  0x76   : > { %s4839_s27 = sld [smem:[#allocation33_spill]] (!%p3987_p9) }
  0x7b   : > { %s4164_s5 = sand.u32 1, %s4838_s13  }
  0x7c   : > { %s4167_s7 = sand.u32 1, %s4839_s27   ;;  %s614_s22 = scalar_lea.sflag [#allocation4], %s4164_s5 }
  0x7d   : > { %s2593_s28 = sshll.u32 %s4167_s7, 5 }
  0x7e   : > { %s4171_s29 = scalar_lea.vmem [#allocation3], %s2593_s28 }
  0x7f   : > { %3710 = dma.done.wait (%p4033_p10), %s614_s22, 512  }
  0x80   : > { %3712 = vsyncadd (%p4033_p10), %s614_s22, 4294966784  ;;  %s624_s0 = scalar_lea.sflag [#allocation7], %s4164_s5  ;;  %s4178_s3 = scalar_lea.vmem [#allocation6], %s2593_s28 }
  0x81   : > { %3714 = dma.done.wait (%p4033_p10), %s624_s0, 544  }
  0x82   : > { %3716 = vsyncadd (%p4033_p10), %s624_s0, 4294966752  ;;  %s2595_s8 = sshll.u32 %s4167_s7, 1  ;;  %s644_s19 = scalar_lea.sflag [#allocation10], %s4164_s5 }
  0x83   : > { %s4185_s16 = scalar_lea.vmem [#allocation8], %s2595_s8  ;;  %s4188_s20 = scalar_lea.vmem [#allocation9], %s2595_s8 }
  0x84   : > { %3718 = dma.done.wait (%p4033_p10), %s644_s19, 32  }
  0x85   : > { %3720 = vsyncadd (%p4033_p10), %s644_s19, 4294967264 }
  0x86   : > { %3722 = dma.done.wait (%p75_p1), [#allocation10], 3072  }
  0x87   : > { %3724 = vsyncadd (%p75_p1), [#allocation10], 4294964224 }
  0x88   : > { %3726 = dma.done.wait (%p75_p1), [#allocation13], 1040  }
  0x89   : > { %3728 = vsyncadd (%p75_p1), [#allocation13], 4294966256 }
  0x8a   : > { %3730 = dma.done.wait (%p75_p1), [#allocation16], 2048  }
  0x8b   : > { %3732 = vsyncadd (%p75_p1), [#allocation16], 4294965248  ;;  %s675_s6 = sand.u32 1, %s3763_s17  }
  0x8c   : > { %s2601_s12 = sshll.u32 %s675_s6, 6 }
  0x8d   : > { %s4207_s9 = scalar_lea.vmem [#allocation17], %s2601_s12 }
  0x8e   : > { %3734 = dma.done.wait (%p3972_p5), %s614_s22, 1024  }
  0x8f   : > { %3736 = vsyncadd (%p3972_p5), %s614_s22, 4294966272  ;;  %s4842_s27 = sld [smem:[#allocation32_spill]]  ;;  %s2603_s0 = sshll.u32 %s4167_s7, 6 }
  0x90   : > { %s4843_s14 = sld [smem:[#allocation34_spill]]  ;;  %s4227_s22 = scalar_lea.vmem [#allocation19], %s2603_s0 }
  0x91   : > { %s4229_s23 = scalar_lea.vmem [#allocation21], %s2603_s0 }
  0x95   : > { %s4773_s28 = sand.u32 1, %s4842_s27  }
  0x96   : > { %s2602_s13 = sshll.u32 %s4773_s28, 6  ;;  %p760_p1 = scmp.lt.s32.totalorder %s4843_s14, 1 }
  0x97   : > { %s4225_s30 = scalar_lea.vmem [#allocation18], %s2602_s13  ;;  %p2605_p5 = scmp.ne.s32.totalorder %s4843_s14, 0 }
  0x98   : > { %s4219_s8 = scalar_select %p760_p1, %s4843_s14, 1 }
  0x99   : > { %770 = sbr.rel (%p2605_p5) target bundleno = 1717 (0x6b5), region = 108  ;;  %s4845_s14 = sld [smem:[#allocation54_spill]] (!%p2605_p5) }
  0x9a   : > { %s4850_s0 = sld [smem:[#allocation58_spill]] (!%p2605_p5) }
  0x9e   : > { %v2929_v0 = vld [vmem:[#allocation11 + $0xac] sm:$0xf]  ;;  %v2710_v1 = vld [vmem:[#allocation11 + $0xb4] sm:$0xf0]  ;;  %v2926_v2 = vld [vmem:[#allocation11 + $0x94] sm:$0xf] }
  0x9f   : > { %v2713_v3 = vor.u32 %v2929_v0, %v2710_v1  ;;  %v2698_v4 = vld [vmem:[#allocation11 + $0x9c] sm:$0xf0]  ;;  %v2923_v6 = vld [vmem:[#allocation11 + $0x7c] sm:$0xf]  ;;  %v2686_v7 = vld [vmem:[#allocation11 + $0x84] sm:$0xf0] }
  0xa0   : > { %v2701_v5 = vor.u32 %v2926_v2, %v2698_v4  ;;  %v2708_v8 = vld [vmem:[#allocation11 + $0xa8] sm:$0xf]  ;;  %v2930_v9 = vld [vmem:[#allocation11 + $0xb0] sm:$0xf0]  ;;  %v2696_v11 = vld [vmem:[#allocation11 + $0x90] sm:$0xf]  ;;  %v2689_v13 = vor.u32 %v2923_v6, %v2686_v7 }
  0xa1   : > { %1008 = vmatpush.bf16.msra.mxu1 %v2713_v3  ;;  %v2709_v10 = vor.u32 %v2930_v9, %v2708_v8  ;;  %v2927_v12 = vld [vmem:[#allocation11 + $0x98] sm:$0xf0]  ;;  %v2920_v14 = vld [vmem:[#allocation11 + $0x64] sm:$0xf]  ;;  %v2674_v16 = vld [vmem:[#allocation11 + $0x6c] sm:$0xf0] }
  0xa2   : > { %v2697_v15 = vor.u32 %v2927_v12, %v2696_v11  ;;  %v2684_v17 = vld [vmem:[#allocation11 + $0x78] sm:$0xf]  ;;  %v2924_v18 = vld [vmem:[#allocation11 + $0x80] sm:$0xf0]  ;;  %v2677_v19 = vor.u32 %v2920_v14, %v2674_v16  ;;  %v2917_v20 = vld [vmem:[#allocation11 + $0x4c] sm:$0xf] }
  0xa3   : > { %979 = vmatpush.bf16.msra.mxu0 %v2709_v10  ;;  %v2685_v21 = vor.u32 %v2924_v18, %v2684_v17  ;;  %v2662_v22 = vld [vmem:[#allocation11 + $0x54] sm:$0xf0]  ;;  %v2672_v23 = vld [vmem:[#allocation11 + $0x60] sm:$0xf]  ;;  %v2921_v24 = vld [vmem:[#allocation11 + $0x68] sm:$0xf0] }
  0xa4   : > { %v2665_v25 = vor.u32 %v2917_v20, %v2662_v22  ;;  %v2914_v26 = vld [vmem:[#allocation11 + $0x34] sm:$0xf]  ;;  %v2673_v27 = vor.u32 %v2921_v24, %v2672_v23  ;;  %v2650_v28 = vld [vmem:[#allocation11 + $0x3c] sm:$0xf0]  ;;  %v2660_v29 = vld [vmem:[#allocation11 + $0x48] sm:$0xf] }
  0xa5   : > { %1009 = vmatpush.bf16.msra.mxu1 %v2701_v5  ;;  %v2918_v30 = vld [vmem:[#allocation11 + $0x50] sm:$0xf0]  ;;  %v2653_v31 = vor.u32 %v2914_v26, %v2650_v28  ;;  %v2911_v32 = vld [vmem:[#allocation11 + $0x1c] sm:$0xf]  ;;  %v2638_v34 = vld [vmem:[#allocation11 + $0x24] sm:$0xf0] }
  0xa6   : > { %v2661_v33 = vor.u32 %v2918_v30, %v2660_v29  ;;  %v2648_v35 = vld [vmem:[#allocation11 + $0x30] sm:$0xf]  ;;  %v2915_v36 = vld [vmem:[#allocation11 + $0x38] sm:$0xf0]  ;;  %v2641_v37 = vor.u32 %v2911_v32, %v2638_v34  ;;  %v2908_v38 = vld [vmem:[#allocation11 + $0x4] sm:$0xf] }
  0xa7   : > { %980 = vmatpush.bf16.msra.mxu0 %v2697_v15  ;;  %v2649_v39 = vor.u32 %v2915_v36, %v2648_v35  ;;  %v2626_v40 = vld [vmem:[#allocation11 + $0xc] sm:$0xf0]  ;;  %v2636_v41 = vld [vmem:[#allocation11 + $0x18] sm:$0xf]  ;;  %v2912_v42 = vld [vmem:[#allocation11 + $0x20] sm:$0xf0] }
  0xa8   : > { %v2629_v43 = vor.u32 %v2908_v38, %v2626_v40  ;;  %v2637_v44 = vor.u32 %v2912_v42, %v2636_v41  ;;  %v2624_v45 = vld [vmem:[#allocation11] sm:$0xf]  ;;  %v2909_v46 = vld [vmem:[#allocation11 + $0x8] sm:$0xf0]  ;;  %v4233_v47 = vld [vmem:[%s4171_s29] sm:$0xff]  ;;  %vm1229_vm4 = vcmask 261120  }
  0xa9   : > { %1010 = vmatpush.bf16.msra.mxu1 %v2689_v13  ;;  %v2625_v48 = vor.u32 %v2909_v46, %v2624_v45  ;;  %v4238_v49 = vld [vmem:[%s4171_s29 + $0x8] sm:$0xff]  ;;  %v4243_v50 = vld [vmem:[%s4171_s29 + $0x10] sm:$0xff]  ;;  %v4248_v51 = vld [vmem:[%s4171_s29 + $0x18] sm:$0xff] }
  0xaa   : > { %v4255_v56 = vld [vmem:[%s4845_s14] sm:$0x7] }
  0xab   : > { %981 = vmatpush.bf16.msra.mxu0 %v2685_v21  ;;  %v822_v58 = vperm.slane %v4255_v56, 1  ;;  %v4259_v0 = vperm.slane %v4255_v56, 0 }
  0xad   : > { %1011 = vmatpush.bf16.msra.mxu1 %v2677_v19 }
  0xaf   : > { %982 = vmatpush.bf16.msra.mxu0 %v2673_v27 }
  0xb1   : > { %1012 = vmatpush.bf16.msra.mxu1 %v2665_v25 }
  0xb3   : > { %983 = vmatpush.bf16.msra.mxu0 %v2661_v33 }
  0xb5   : > { %1013 = vmatpush.bf16.msra.mxu1 %v2653_v31 }
  0xb7   : > { %984 = vmatpush.bf16.msra.mxu0 %v2649_v39 }
  0xb9   : > { %1014 = vmatpush.bf16.msra.mxu1 %v2641_v37 }
  0xbb   : > { %985 = vmatpush.bf16.msra.mxu0 %v2637_v44 }
  0xbd   : > { %1015 = vmatpush.bf16.msra.mxu1 %v2629_v43 }
  0xbf   : > { %986 = vmatpush.bf16.msra.mxu0 %v2625_v48 }
  0xc0   : > { %1016 = vmatmul.bf16.vlgmr.msra.gmra.mxu1 %v4233_v47 }
  0xc2   : > { %987 = vmatmul.bf16.vlgmr.msra.gmra.mxu0 %v4233_v47 }
  0xd0   : > { %1021 = vmatmul.bf16.gmra.mxu1 %v4238_v49 }
  0xd2   : > { %992 = vmatmul.bf16.gmra.mxu0 %v4238_v49 }
  0xe0   : > { %1026 = vmatmul.bf16.gmra.mxu1 %v4243_v50 }
  0xe2   : > { %997 = vmatmul.bf16.gmra.mxu0 %v4243_v50 }
  0xf0   : > { %1031 = vmatmul.bf16.gmra.mxu1 %v4248_v51 }
  0xf2   : > { %1002 = vmatmul.bf16.gmra.mxu0 %v4248_v51 }
 0x13d   : > { %v1017_v52 = vpop.f32.mrf.mxu1 }
 0x13e   : > { %v1018_v3 = vadd.f32 %v1017_v52, %v822_v58 }
 0x13f   : > { %v988_v53 = vpop.f32.mrf.mxu0 }
 0x140   : > { %v989_v6 = vadd.f32 %v988_v53, %v4259_v0  ;;  %v1082_v11 = vpack.c.bf16 %v1018_v3, %v1018_v3 }
 0x142   : > { %v1066_v13 = vmul.f32 0.088388346, %v989_v6  ;;  %v1114_v16 = vunpack.c.l.b16 %v1082_v11 }
 0x144   : > { %v1074_v17 = vpack.c.bf16 %v1066_v13, %v1066_v13  ;;  %v1195_v13 = vld [vmem:[%s4185_s16] sm:$0x1] }
 0x145   : > { %v1019_v54 = vpop.f32.mrf.mxu1  ;;  %vm1197_vm0 = vcmp.gt.s32.totalorder %v1195_v13, 0 }
 0x146   : > { %v1020_v1 = vadd.f32 %v1019_v54, %v822_v58  ;;  %v1102_v21 = vunpack.c.l.b16 %v1074_v17 }
 0x147   : > { %v990_v55 = vpop.f32.mrf.mxu0 }
 0x148   : > { %v991_v7 = vadd.f32 %v990_v55, %v4259_v0  ;;  %v1083_v8 = vpack.c.bf16 %v1020_v1, %v1020_v1 }
 0x14a   : > { %v1067_v14 = vmul.f32 0.088388346, %v991_v7  ;;  %v1115_v15 = vunpack.c.l.b16 %v1083_v8 }
 0x14c   : > { %v1075_v18 = vpack.c.bf16 %v1067_v14, %v1067_v14  ;;  %v1118_v19 = vpack.c.b16 %v1115_v15, %v1114_v16  ;;  %v1184_v14 = vlaneseq  ;;  %v3813_v15 = vmov 0  }
 0x14d   : > { %v1022_v57 = vpop.f32.mrf.mxu1  ;;  %v1199_v16 = vsel %vm1197_vm0, 1, %v3813_v15 }
 0x14e   : > { %v1023_v59 = vadd.f32 %v1022_v57, %v822_v58  ;;  %v1103_v22 = vunpack.c.l.b16 %v1075_v18  ;;  %v1185_v17 = vshrl.u32 %v1184_v14, 7  ;;  %v4271_v18 = vand.u32 127, %v1184_v14 }
 0x14f   : > { %v993_v60 = vpop.f32.mrf.mxu0 }
 0x150   : > { %v1084_v62 = vpack.c.bf16 %v1023_v59, %v1023_v59  ;;  %v994_v24 = vadd.f32 %v993_v60, %v4259_v0  ;;  %v1106_v26 = vpack.c.b16 %v1103_v22, %v1102_v21  ;;  %vm1191_vm1 = vcmp.le.s32.totalorder %v4271_v18, %v1185_v17 }
 0x152   : > { %v1116_v4 = vunpack.c.l.b16 %v1084_v62  ;;  %v1068_v27 = vmul.f32 0.088388346, %v994_v24  ;;  %v1187_v24 = vadd.s32 16, %v1185_v17 }
 0x154   : > { %v1076_v31 = vpack.c.bf16 %v1068_v27, %v1068_v27  ;;  %vm1193_vm7 = vcmp.le.s32.totalorder %v4271_v18, %v1187_v24 }
 0x155   : > { %v1024_v61 = vpop.f32.mrf.mxu1 }
 0x156   : > { %v1025_v63 = vadd.f32 %v1024_v61, %v822_v58  ;;  %v1104_v35 = vunpack.c.l.b16 %v1076_v31 }
 0x157   : > { %v995_v12 = vpop.f32.mrf.mxu0 }
 0x158   : > { %v1085_v2 = vpack.c.bf16 %v1025_v63, %v1025_v63  ;;  %v996_v25 = vadd.f32 %v995_v12, %v4259_v0 }
 0x15a   : > { %v1117_v5 = vunpack.c.l.b16 %v1085_v2  ;;  %v1069_v29 = vmul.f32 0.088388346, %v996_v25 }
 0x15c   : > { %v1119_v9 = vpack.c.b16 %v1117_v5, %v1116_v4  ;;  %v1077_v32 = vpack.c.bf16 %v1069_v29, %v1069_v29  ;;  %v4301_v29 = vadd.s32 24, %v1185_v17 }
 0x15d   : > { %v1027_v10 = vpop.f32.mrf.mxu1 }
 0x15e   : > { %1128 = vmatpush.bf16.xpose.msra.mxu3 %v1119_v9  ;;  %v1105_v36 = vunpack.c.l.b16 %v1077_v32  ;;  %v1028_v38 = vadd.f32 %v1027_v10, %v822_v58  ;;  %vm1194_vm10 = vcmp.le.s32.totalorder %v4271_v18, %v4301_v29 }
 0x15f   : > { %v998_v23 = vpop.f32.mrf.mxu0 }
 0x160   : > { %v999_v43 = vadd.f32 %v998_v23, %v4259_v0  ;;  %v1107_v44 = vpack.c.b16 %v1105_v36, %v1104_v35  ;;  %v1086_v46 = vpack.c.bf16 %v1028_v38, %v1028_v38  ;;  %v2704_v35 = vld [vmem:[#allocation11 + $0x98] sm:$0xf]  ;;  %v2928_v38 = vld [vmem:[#allocation11 + $0xa0] sm:$0xf0] }
 0x162   : > { %v1070_v55 = vmul.f32 0.088388346, %v999_v43  ;;  %v1157_v59 = vunpack.c.l.b16 %v1086_v46 }
 0x164   : > { %v1078_v61 = vpack.c.bf16 %v1070_v55, %v1070_v55  ;;  %v2668_v55 = vld [vmem:[#allocation11 + $0x50] sm:$0xf] }
 0x165   : > { %v1029_v20 = vpop.f32.mrf.mxu1 }
 0x166   : > { %1129 = vmatpush.bf16.xpose.msra.mxu3 %v1118_v19  ;;  %v1030_v39 = vadd.f32 %v1029_v20, %v822_v58  ;;  %v1145_v63 = vunpack.c.l.b16 %v1078_v61  ;;  %v1201_v19 = vperm.slane %v1199_v16, 0  ;;  %v1186_v20 = vadd.s32 8, %v1185_v17 }
 0x167   : > { %v1000_v33 = vpop.f32.mrf.mxu0 }
 0x168   : > { %v1001_v45 = vadd.f32 %v1000_v33, %v4259_v0  ;;  %v1087_v48 = vpack.c.bf16 %v1030_v39, %v1030_v39  ;;  %vm4274_vm2 = vcmp.eq.s32.totalorder %v1201_v19, 1  ;;  %vm1192_vm5 = vcmp.le.s32.totalorder %v4271_v18, %v1186_v20  ;;  %v2716_v33 = vld [vmem:[#allocation11 + $0xb0] sm:$0xf] }
 0x169   : > { %vm1213_vm3 = vmand %vm4274_vm2, %vm1191_vm1  ;;  %v2705_v39 = vor.u32 %v2928_v38, %v2704_v35 }
 0x16a   : > { %v1071_v57 = vmul.f32 0.088388346, %v1001_v45  ;;  %v1158_v60 = vunpack.c.l.b16 %v1087_v48  ;;  %vm1214_vm6 = vmand %vm4274_vm2, %vm1192_vm5 }
 0x16b   : > { %vm1215_vm8 = vmand %vm4274_vm2, %vm1193_vm7 }
 0x16c   : > { %v1161_v62 = vpack.c.b16 %v1158_v60, %v1157_v59  ;;  %vm1216_vm11 = vmand %vm4274_vm2, %vm1194_vm10 }
 0x16d   : > { %v1032_v28 = vpop.f32.mrf.mxu1  ;;  %1130 = vmatmul.bf16.vlgmr.msra.gmra.mxu3 %v1106_v26 }
 0x16e   : > { %v1033_v30 = vadd.f32 %v1032_v28, %v822_v58  ;;  %v1196_v28 = vld [vmem:[%s4185_s16 + $0x1] sm:$0x1] }
 0x16f   : > { %v1003_v54 = vpop.f32.mrf.mxu0  ;;  %vm1198_vm9 = vcmp.gt.s32.totalorder %v1196_v28, 0 }
 0x170   : > { %v1088_v34 = vpack.c.bf16 %v1033_v30, %v1033_v30  ;;  %v1004_v3 = vadd.f32 %v1003_v54, %v4259_v0  ;;  %v1200_v36 = vsel %vm1198_vm9, 1, %v3813_v15 }
 0x172   : > { %v1159_v41 = vunpack.c.l.b16 %v1088_v34  ;;  %v1072_v6 = vmul.f32 0.088388346, %v1004_v3  ;;  %v2931_v34 = vld [vmem:[#allocation11 + $0xb8] sm:$0xf0]  ;;  %v2913_v3 = vld [vmem:[#allocation11 + $0x28] sm:$0xf0] }
 0x174   : > { %v1080_v8 = vpack.c.bf16 %v1072_v6, %v1072_v6 }
 0x175   : > { %v1034_v37 = vpop.f32.mrf.mxu1 }
 0x176   : > { %v1035_v40 = vadd.f32 %v1034_v37, %v822_v58  ;;  %v1079_v58 = vpack.c.bf16 %v1071_v57, %v1071_v57  ;;  %v1147_v10 = vunpack.c.l.b16 %v1080_v8  ;;  %v2717_v37 = vor.u32 %v2931_v34, %v2716_v33  ;;  %v2919_v57 = vld [vmem:[#allocation11 + $0x58] sm:$0xf0]  ;;  %v2632_v8 = vld [vmem:[#allocation11 + $0x8] sm:$0xf] }
 0x177   : > { %v1005_v2 = vpop.f32.mrf.mxu0 }
 0x178   : > { %v1089_v42 = vpack.c.bf16 %v1035_v40, %v1035_v40  ;;  %v1146_v1 = vunpack.c.l.b16 %v1079_v58  ;;  %v1006_v5 = vadd.f32 %v1005_v2, %v4259_v0  ;;  %1037 = vmatpush.bf16.msra.mxu2 %v2717_v37  ;;  %v1202_v40 = vperm.slane %v1200_v36, 0  ;;  %v2644_v2 = vld [vmem:[#allocation11 + $0x20] sm:$0xf] }
 0x179   : > { %v2669_v58 = vor.u32 %v2919_v57, %v2668_v55  ;;  %v823_v55 = vperm.slane %v4255_v56, 2 }
 0x17a   : > { %v1160_v52 = vunpack.c.l.b16 %v1089_v42  ;;  %v1149_v4 = vpack.c.b16 %v1146_v1, %v1145_v63  ;;  %v1073_v7 = vmul.f32 0.088388346, %v1006_v5  ;;  %v2925_v42 = vld [vmem:[#allocation11 + $0x88] sm:$0xf0]  ;;  %vm4319_vm12 = vcmp.eq.s32.totalorder %v1202_v40, 1 }
 0x17b   : > { %vm1217_vm13 = vmand %vm4319_vm12, %vm1191_vm1  ;;  %v2916_v63 = vld [vmem:[#allocation11 + $0x40] sm:$0xf0] }
 0x17c   : > { %v1162_v53 = vpack.c.b16 %v1160_v52, %v1159_v41  ;;  %v1081_v9 = vpack.c.bf16 %v1073_v7, %v1073_v7  ;;  %v2692_v41 = vld [vmem:[#allocation11 + $0x80] sm:$0xf]  ;;  %1038 = vmatpush.bf16.msra.mxu2 %v2705_v39  ;;  %v2680_v52 = vld [vmem:[#allocation11 + $0x68] sm:$0xf]  ;;  %vm1218_vm14 = vmand %vm4319_vm12, %vm1192_vm5  ;;  %v2645_v7 = vor.u32 %v2913_v3, %v2644_v2 }
 0x17d   : > { %1135 = vmatmul.bf16.gmra.mxu3 %v1107_v44  ;;  %v2693_v46 = vor.u32 %v2925_v42, %v2692_v41  ;;  %vm1219_vm15 = vmand %vm4319_vm12, %vm1193_vm7 }
 0x17e   : > { %1171 = vmatpush.bf16.xpose.msrb.mxu3 %v1162_v53  ;;  %v1148_v11 = vunpack.c.l.b16 %v1081_v9  ;;  %v2922_v53 = vld [vmem:[#allocation11 + $0x70] sm:$0xf0]  ;;  %vm1220_vm0 = vmand %vm4319_vm12, %vm1194_vm10 }
 0x17f   : > { %v2681_v54 = vor.u32 %v2922_v53, %v2680_v52  ;;  %v2910_v9 = vld [vmem:[#allocation11 + $0x10] sm:$0xf0] }
 0x180   : > { %v1150_v12 = vpack.c.b16 %v1148_v11, %v1147_v10  ;;  %1039 = vmatpush.bf16.msra.mxu2 %v2693_v46  ;;  %v2633_v10 = vor.u32 %v2910_v9, %v2632_v8 }
 0x184   : > { %1040 = vmatpush.bf16.msra.mxu2 %v2681_v54 }
 0x186   : > { %1172 = vmatpush.bf16.xpose.msrb.mxu3 %v1161_v62  ;;  %v2656_v62 = vld [vmem:[#allocation11 + $0x38] sm:$0xf] }
 0x187   : > { %v2657_v1 = vor.u32 %v2916_v63, %v2656_v62 }
 0x188   : > { %1041 = vmatpush.bf16.msra.mxu2 %v2669_v58 }
 0x18c   : > { %1042 = vmatpush.bf16.msra.mxu2 %v2657_v1 }
 0x18d   : > { %1173 = vmatmul.bf16.vlgmr.msrb.gmra.mxu3 %v1149_v4 }
 0x190   : > { %1043 = vmatpush.bf16.msra.mxu2 %v2645_v7 }
 0x194   : > { %1044 = vmatpush.bf16.msra.mxu2 %v2633_v10 }
 0x197   : > { %1045 = vmatmul.bf16.vlgmr.msra.gmra.mxu2 %v4233_v47 }
 0x19d   : > { %1178 = vmatmul.bf16.gmra.mxu3 %v1150_v12 }
 0x1a7   : > { %1050 = vmatmul.bf16.gmra.mxu2 %v4238_v49 }
 0x1b7   : > { %1055 = vmatmul.bf16.gmra.mxu2 %v4243_v50 }
 0x1c7   : > { %1060 = vmatmul.bf16.gmra.mxu2 %v4248_v51 }
 0x1f0   : > { %v1131_v21 = vpop.f32.mrf.mxu3 }
 0x1f1   : > { %v4282_v22 = vsel %vm1213_vm3, %v1131_v21, -1e+09 }
 0x1f2   : > { %v1230_v23 = vsel %vm1229_vm4, %v4282_v22, -inf }
 0x1f3   : > { %1231 = vmax.xlane.f32.xlu0 %v1230_v23 }
 0x1f8   : > { %v1133_v25 = vpop.f32.mrf.mxu3 }
 0x1f9   : > { %v4291_v26 = vsel %vm1214_vm6, %v1133_v25, -1e+09 }
 0x1fa   : > { %v1233_v27 = vsel %vm1229_vm4, %v4291_v26, -inf }
 0x1fb   : > { %1234 = vmax.xlane.f32.xlu0 %v1233_v27 }
 0x200   : > { %v1136_v30 = vpop.f32.mrf.mxu3 }
 0x201   : > { %v4303_v31 = vsel %vm1215_vm8, %v1136_v30, -1e+09 }
 0x202   : > { %v1236_v32 = vsel %vm1229_vm4, %v4303_v31, -inf }
 0x203   : > { %1237 = vmax.xlane.f32.xlu1 %v1236_v32 }
 0x208   : > { %v1138_v43 = vpop.f32.mrf.mxu3 }
 0x209   : > { %v4315_v44 = vsel %vm1216_vm11, %v1138_v43, -1e+09 }
 0x20a   : > { %v1239_v45 = vsel %vm1229_vm4, %v4315_v44, -inf }
 0x20b   : > { %1240 = vmax.xlane.f32.xlu1 %v1239_v45 }
 0x210   : > { %v1174_v59 = vpop.f32.mrf.mxu3 }
 0x211   : > { %v4327_v60 = vsel %vm1217_vm13, %v1174_v59, -1e+09 }
 0x212   : > { %v1242_v61 = vsel %vm1229_vm4, %v4327_v60, -inf }
 0x213   : > { %1243 = vmax.xlane.f32.xlu2 %v1242_v61 }
 0x218   : > { %v1176_v4 = vpop.f32.mrf.mxu3 }
 0x219   : > { %v1226_v5 = vsel %vm1218_vm14, %v1176_v4, -1e+09 }
 0x21a   : > { %v1245_v6 = vsel %vm1229_vm4, %v1226_v5, -inf  ;;  %v1046_v52 = vpop.f32.mrf.mxu2 }
 0x21b   : > { %1246 = vmax.xlane.f32.xlu2 %v1245_v6  ;;  %v1047_v59 = vadd.f32 %v1046_v52, %v823_v55  ;;  %v2959_v52 = vld [vmem:[#allocation15 + $0x74] sm:$0xf0] }
 0x21d   : > { %v1090_v62 = vpack.c.bf16 %v1047_v59, %v1047_v59  ;;  %v2812_v59 = vld [vmem:[#allocation15 + $0x50] sm:$0xf] }
 0x21f   : > { %v1348_v4 = vunpack.c.l.b16 %v1090_v62 }
 0x220   : > { %v1179_v11 = vpop.f32.mrf.mxu3 }
 0x221   : > { %v1227_v12 = vsel %vm1219_vm15, %v1179_v11, -1e+09 }
 0x222   : > { %v1248_v13 = vsel %vm1229_vm4, %v1227_v12, -inf  ;;  %v1048_v53 = vpop.f32.mrf.mxu2 }
 0x223   : > { %1249 = vmax.xlane.f32.xlu2 %v1248_v13 }
 0x228   : > { %v1181_v49 = vpop.f32.mrf.mxu3 }
 0x229   : > { %v4356_v51 = vsel %vm1220_vm0, %v1181_v49, -1e+09 }
 0x22a   : > { %v1051_v54 = vpop.f32.mrf.mxu2 }
 0x22b   : > { %v1052_v57 = vadd.f32 %v1051_v54, %v823_v55  ;;  %v2820_v54 = vld [vmem:[#allocation15 + $0x60] sm:$0xf] }
 0x22d   : > { %v1092_v61 = vpack.c.bf16 %v1052_v57, %v1052_v57 }
 0x22f   : > { %v1350_v2 = vunpack.c.l.b16 %v1092_v61 }
 0x232   : > { %v1053_v58 = vpop.f32.mrf.mxu2 }
 0x233   : > { %v1054_v1 = vadd.f32 %v1053_v58, %v823_v55 }
 0x235   : > { %v1093_v3 = vpack.c.bf16 %v1054_v1, %v1054_v1 }
 0x237   : > { %v1351_v6 = vunpack.c.l.b16 %v1093_v3  ;;  %v2953_v3 = vld [vmem:[#allocation15 + $0x44] sm:$0xf0] }
 0x239   : > { %v1353_v7 = vpack.c.b16 %v1351_v6, %v1350_v2  ;;  %v2804_v2 = vld [vmem:[#allocation15 + $0x40] sm:$0xf] }
 0x23a   : > { %v1056_v8 = vpop.f32.mrf.mxu2  ;;  %v2805_v6 = vor.u32 %v2953_v3, %v2804_v2 }
 0x23b   : > { %1368 = vmatpush.bf16.msra.mxu3 %v1353_v7  ;;  %v1057_v13 = vadd.f32 %v1056_v8, %v823_v55  ;;  %v2796_v8 = vld [vmem:[#allocation15 + $0x30] sm:$0xf] }
 0x242   : > { %v1058_v56 = vpop.f32.mrf.mxu2 }
 0x24a   : > { %v1061_v11 = vpop.f32.mrf.mxu2 }
 0x252   : > { %v1063_v49 = vpop.f32.mrf.mxu2 }
 0x266   : > { %v1232_v14 = vpop.xlane.xlu0 %1231 }
 0x267   : > { %v1254_v16 = vsub.f32 %v4282_v22, %v1232_v14  ;;  %v1059_v14 = vadd.f32 %v1058_v56, %v823_v55 }
 0x269   : > { %v1262_v17 = vmul.f32 1.442695, %v1254_v16 }
 0x26b   : > { %3234 = vpow2.f32 %v1262_v17 }
 0x26e   : > { %v1235_v19 = vpop.xlane.xlu0 %1234 }
 0x26f   : > { %v1255_v0 = vsub.f32 %v4291_v26, %v1235_v19  ;;  %v1251_v26 = vsel %vm1229_vm4, %v4356_v51, -inf }
 0x271   : > { %v4347_v20 = vpop.eup %3234  ;;  %v1264_v21 = vmul.f32 1.442695, %v1255_v0 }
 0x272   : > { %v1278_v47 = vsel %vm1229_vm4, %v4347_v20, 0.0 }
 0x273   : > { %3236 = vpow2.f32 %v1264_v21  ;;  %1279 = vadd.xlane.f32.xlu0 %v1278_v47 }
 0x276   : > { %v1238_v50 = vpop.xlane.xlu1 %1237 }
 0x277   : > { %v1256_v22 = vsub.f32 %v4303_v31, %v1238_v50  ;;  %v1094_v50 = vpack.c.bf16 %v1057_v13, %v1057_v13  ;;  %v2949_v13 = vld [vmem:[#allocation15 + $0x24] sm:$0xf0] }
 0x279   : > { %v4359_v23 = vpop.eup %3236  ;;  %v1266_v24 = vmul.f32 1.442695, %v1256_v22  ;;  %v1095_v22 = vpack.c.bf16 %v1059_v14, %v1059_v14 }
 0x27a   : > { %v1281_v25 = vsel %vm1229_vm4, %v4359_v23, 0.0 }
 0x27b   : > { %3238 = vpow2.f32 %v1266_v24  ;;  %1282 = vadd.xlane.f32.xlu1 %v1281_v25  ;;  %1252 = vmax.xlane.f32.xlu0 %v1251_v26  ;;  %v1064_v24 = vadd.f32 %v1063_v49, %v823_v55 }
 0x27e   : > { %v1241_v18 = vpop.xlane.xlu1 %1240 }
 0x27f   : > { %v1257_v27 = vsub.f32 %v4315_v44, %v1241_v18  ;;  %v1097_v18 = vpack.c.bf16 %v1064_v24, %v1064_v24 }
 0x281   : > { %v4366_v28 = vpop.eup %3238  ;;  %v1268_v29 = vmul.f32 1.442695, %v1257_v27  ;;  %v1395_v27 = vunpack.c.l.b16 %v1094_v50  ;;  %v2772_v50 = vld [vmem:[#allocation15] sm:$0xf] }
 0x282   : > { %v1284_v30 = vsel %vm1229_vm4, %v4366_v28, 0.0 }
 0x283   : > { %3240 = vpow2.f32 %v1268_v29  ;;  %1285 = vadd.xlane.f32.xlu1 %v1284_v30  ;;  %v1396_v29 = vunpack.c.l.b16 %v1095_v22  ;;  %v2945_v22 = vld [vmem:[#allocation15 + $0x4] sm:$0xf0] }
 0x286   : > { %v1244_v31 = vpop.xlane.xlu2 %1243 }
 0x287   : > { %v1258_v32 = vsub.f32 %v4327_v60, %v1244_v31  ;;  %v1049_v60 = vadd.f32 %v1048_v53, %v823_v55 }
 0x289   : > { %v4371_v33 = vpop.eup %3240  ;;  %v1270_v34 = vmul.f32 1.442695, %v1258_v32  ;;  %v1091_v63 = vpack.c.bf16 %v1049_v60, %v1049_v60  ;;  %v2955_v60 = vld [vmem:[#allocation15 + $0x54] sm:$0xf0] }
 0x28a   : > { %v1287_v35 = vsel %vm1229_vm4, %v4371_v33, 0.0 }
 0x28b   : > { %3242 = vpow2.f32 %v1270_v34  ;;  %1288 = vadd.xlane.f32.xlu2 %v1287_v35 }
 0x28e   : > { %v1247_v36 = vpop.xlane.xlu2 %1246 }
 0x28f   : > { %v1259_v37 = vsub.f32 %v1226_v5, %v1247_v36  ;;  %v1349_v5 = vunpack.c.l.b16 %v1091_v63  ;;  %v1399_v36 = vpack.c.b16 %v1396_v29, %v1395_v27  ;;  %v2813_v63 = vor.u32 %v2955_v60, %v2812_v59  ;;  %v4416_v29 = vld [vmem:[%s4178_s3] sm:$0xff] }
 0x291   : > { %v4375_v38 = vpop.eup %3242  ;;  %v1272_v39 = vmul.f32 1.442695, %v1259_v37  ;;  %v1352_v9 = vpack.c.b16 %v1349_v5, %v1348_v4 }
 0x292   : > { %v1290_v40 = vsel %vm1229_vm4, %v4375_v38, 0.0 }
 0x293   : > { %3244 = vpow2.f32 %v1272_v39  ;;  %1291 = vadd.xlane.f32.xlu0 %v1290_v40  ;;  %1369 = vmatpush.bf16.msra.mxu3 %v1352_v9  ;;  %v2951_v9 = vld [vmem:[#allocation15 + $0x34] sm:$0xf0] }
 0x296   : > { %v1250_v41 = vpop.xlane.xlu2 %1249 }
 0x297   : > { %v1260_v42 = vsub.f32 %v1227_v12, %v1250_v41  ;;  %v1062_v12 = vadd.f32 %v1061_v11, %v823_v55  ;;  %v2957_v55 = vld [vmem:[#allocation15 + $0x64] sm:$0xf0]  ;;  %v2797_v11 = vor.u32 %v2951_v9, %v2796_v8 }
 0x298   : > { %v2821_v57 = vor.u32 %v2957_v55, %v2820_v54  ;;  %v771_v55 = vld [vmem:[%s4171_s29] sm:$0xff]  }
 0x299   : > { %v4379_v43 = vpop.eup %3244  ;;  %v1274_v44 = vmul.f32 1.442695, %v1260_v42  ;;  %v1096_v21 = vpack.c.bf16 %v1062_v12, %v1062_v12  ;;  %v2788_v12 = vld [vmem:[#allocation15 + $0x20] sm:$0xf]  ;;  %v780_v59 = vunpack.c.h.bf16 %v771_v55 }
 0x29a   : > { %v1293_v45 = vsel %vm1229_vm4, %v4379_v43, 0.0  ;;  %v2789_v14 = vor.u32 %v2949_v13, %v2788_v12 }
 0x29b   : > { %3246 = vpow2.f32 %v1274_v44  ;;  %1294 = vadd.xlane.f32.xlu1 %v1293_v45  ;;  %v1397_v26 = vunpack.c.l.b16 %v1096_v21 }
 0x2a1   : > { %v4383_v46 = vpop.eup %3246 }
 0x2a2   : > { %v1296_v48 = vsel %vm1229_vm4, %v4383_v46, 0.0 }
 0x2a3   : > { %1297 = vadd.xlane.f32.xlu2 %v1296_v48  ;;  %v2828_v48 = vld [vmem:[#allocation15 + $0x70] sm:$0xf] }
 0x2a4   : > { %v2829_v53 = vor.u32 %v2959_v52, %v2828_v48 }
 0x2a6   : > { %1687 = vmatpush.bf16.msrb.mxu2 %v2829_v53 }
 0x2aa   : > { %1688 = vmatpush.bf16.msrb.mxu2 %v2821_v57  ;;  %v779_v57 = vunpack.c.l.bf16 %v771_v55 }
 0x2ae   : > { %1689 = vmatpush.bf16.msrb.mxu2 %v2813_v63 }
 0x2b2   : > { %1690 = vmatpush.bf16.msrb.mxu2 %v2805_v6 }
 0x2b6   : > { %1691 = vmatpush.bf16.msrb.mxu2 %v2797_v11 }
 0x2ba   : > { %1692 = vmatpush.bf16.msrb.mxu2 %v2789_v14  ;;  %v4461_v14 = vld [vmem:[%s4850_s0] sm:$0x3] }
 0x2e6   : > { %v1280_v10 = vpop.xlane.xlu0 %1279 }
 0x2e7   : > { %3248 = vrcp.f32 %v1280_v10 }
 0x2ed   : > { %v3249_v16 = vpop.eup %3248 }
 0x2ee   : > { %v1310_v17 = vmul.f32 %v3249_v16, %v4347_v20  ;;  %v1283_v19 = vpop.xlane.xlu1 %1282  ;;  %v1253_v0 = vpop.xlane.xlu0 %1252  ;;  %v1398_v20 = vunpack.c.l.b16 %v1097_v18  ;;  %v2780_v16 = vld [vmem:[#allocation15 + $0x10] sm:$0xf] }
 0x2ef   : > { %3250 = vrcp.f32 %v1283_v19  ;;  %v1261_v47 = vsub.f32 %v4356_v51, %v1253_v0 }
 0x2f0   : > { %1318 = vst.msk [vmem:[%s4227_s22] sm:$0xff] %vm1229_vm4, %v1310_v17  ;;  %v1326_v31 = vpack.c.bf16 %v1310_v17, %v1310_v17  ;;  %v1400_v51 = vpack.c.b16 %v1398_v20, %v1397_v26  ;;  %v2947_v17 = vld [vmem:[#allocation15 + $0x14] sm:$0xf0]  ;;  %v2773_v26 = vor.u32 %v2945_v22, %v2772_v50 }
 0x2f1   : > { %v1276_v25 = vmul.f32 1.442695, %v1261_v47  ;;  %v2781_v47 = vor.u32 %v2947_v17, %v2780_v16  ;;  %v2939_v20 = vld [vmem:[#allocation12 + $0x38] sm:$0xff]  ;;  %v1579_v16 = vperm.slane %v4461_v14, 0 }
 0x2f2   : > { %1415 = vmatpush.bf16.msrb.mxu0 %v1400_v51  ;;  %v1338_v39 = vunpack.c.l.b16 %v1326_v31  ;;  %1508 = vmatpush.bf16.msrb.mxu1 %v2939_v20  ;;  %v2937_v31 = vld [vmem:[#allocation12 + $0x28] sm:$0xff]  ;;  %v2934_v51 = vld [vmem:[#allocation12 + $0x10] sm:$0xff] }
 0x2f3   : > { %3252 = vpow2.f32 %v1276_v25  ;;  %1693 = vmatpush.bf16.msrb.mxu2 %v2781_v47 }
 0x2f5   : > { %v3251_v30 = vpop.eup %3250 }
 0x2f6   : > { %v1311_v32 = vmul.f32 %v3251_v30, %v4359_v23  ;;  %v1286_v34 = vpop.xlane.xlu1 %1285  ;;  %1416 = vmatpush.bf16.msrb.mxu0 %v1399_v36  ;;  %v2938_v30 = vld [vmem:[#allocation12 + $0x30] sm:$0xff]  ;;  %v2932_v36 = vld [vmem:[#allocation12] sm:$0xff] }
 0x2f7   : > { %3254 = vrcp.f32 %v1286_v34  ;;  %1694 = vmatpush.bf16.msrb.mxu2 %v2773_v26  ;;  %1509 = vmatpush.bf16.msrb.mxu1 %v2938_v30  ;;  %v4422_v34 = vld [vmem:[%s4178_s3 + $0x8] sm:$0xff] }
 0x2f8   : > { %1319 = vst.msk [vmem:[%s4227_s22 + $0x8] sm:$0xff] %vm1229_vm4, %v1311_v32  ;;  %v1327_v35 = vpack.c.bf16 %v1311_v32, %v1311_v32  ;;  %v2936_v32 = vld [vmem:[#allocation12 + $0x20] sm:$0xff] }
 0x2f9   : > { %v4395_v37 = vpop.eup %3252 }
 0x2fa   : > { %v1339_v40 = vunpack.c.l.b16 %v1327_v35  ;;  %v1299_v41 = vsel %vm1229_vm4, %v4395_v37, 0.0  ;;  %1695 = vmatmul.bf16.vlgmr.msrb.gmra.mxu2 %v4416_v29  ;;  %v2933_v35 = vld [vmem:[#allocation12 + $0x8] sm:$0xff] }
 0x2fb   : > { %1300 = vadd.xlane.f32.xlu0 %v1299_v41  ;;  %1510 = vmatpush.bf16.msrb.mxu1 %v2937_v31 }
 0x2fc   : > { %v1342_v42 = vpack.c.b16 %v1339_v40, %v1338_v39  ;;  %v4426_v39 = vld [vmem:[%s4178_s3 + $0x10] sm:$0xff] }
 0x2fd   : > { %v3255_v23 = vpop.eup %3254 }
 0x2fe   : > { %v1312_v44 = vmul.f32 %v3255_v23, %v4366_v28  ;;  %2718 = vmatmul.msk.bf16.vlgmr.msra.gmra.mxu3 %vm1229_vm4, %v1342_v42  ;;  %v1289_v45 = vpop.xlane.xlu2 %1288 }
 0x2ff   : > { %3256 = vrcp.f32 %v1289_v45  ;;  %1511 = vmatpush.bf16.msrb.mxu1 %v2936_v32  ;;  %v4433_v45 = vld [vmem:[%s4178_s3 + $0x18] sm:$0xff] }
 0x300   : > { %1320 = vst.msk [vmem:[%s4227_s22 + $0x10] sm:$0xff] %vm1229_vm4, %v1312_v44  ;;  %v1328_v62 = vpack.c.bf16 %v1312_v44, %v1312_v44 }
 0x302   : > { %v1340_v4 = vunpack.c.l.b16 %v1328_v62  ;;  %v773_v62 = vld [vmem:[%s4171_s29 + $0x8] sm:$0xff]  }
 0x303   : > { %v781_v63 = vunpack.c.l.bf16 %v773_v62 }
 0x305   : > { %v3257_v61 = vpop.eup %3256 }
 0x306   : > { %v1313_v58 = vmul.f32 %v3257_v61, %v4371_v33  ;;  %v1292_v28 = vpop.xlane.xlu0 %1291 }
 0x307   : > { %3258 = vrcp.f32 %v1292_v28 }
 0x308   : > { %1321 = vst.msk [vmem:[%s4227_s22 + $0x18] sm:$0xff] %vm1229_vm4, %v1313_v58  ;;  %v1329_v1 = vpack.c.bf16 %v1313_v58, %v1313_v58 }
 0x30a   : > { %v1341_v5 = vunpack.c.l.b16 %v1329_v1  ;;  %1700 = vmatmul.bf16.gmra.mxu2 %v4422_v34  ;;  %v782_v1 = vunpack.c.h.bf16 %v773_v62 }
 0x30c   : > { %v1343_v7 = vpack.c.b16 %v1341_v5, %v1340_v4 }
 0x30d   : > { %v3259_v56 = vpop.eup %3258 }
 0x30e   : > { %v1314_v33 = vmul.f32 %v3259_v56, %v4375_v38  ;;  %v1295_v10 = vpop.xlane.xlu1 %1294  ;;  %2719 = vmatmul.msk.bf16.gmra.mxu3 %vm1229_vm4, %v1343_v7  ;;  %v775_v7 = vld [vmem:[%s4171_s29 + $0x10] sm:$0xff]  }
 0x30f   : > { %3260 = vrcp.f32 %v1295_v10  ;;  %v784_v8 = vunpack.c.h.bf16 %v775_v7  ;;  %v783_v56 = vunpack.c.l.bf16 %v775_v7 }
 0x310   : > { %1322 = vst.msk [vmem:[%s4227_s22 + $0x20] sm:$0xff] %vm1229_vm4, %v1314_v33  ;;  %v1330_v0 = vpack.c.bf16 %v1314_v33, %v1314_v33 }
 0x312   : > { %v1385_v24 = vunpack.c.l.b16 %v1330_v0 }
 0x315   : > { %v3261_v19 = vpop.eup %3260 }
 0x316   : > { %v1315_v21 = vmul.f32 %v3261_v19, %v4379_v43  ;;  %v1298_v38 = vpop.xlane.xlu2 %1297 }
 0x317   : > { %3262 = vrcp.f32 %v1298_v38 }
 0x318   : > { %1323 = vst.msk [vmem:[%s4227_s22 + $0x28] sm:$0xff] %vm1229_vm4, %v1315_v21  ;;  %v1331_v49 = vpack.c.bf16 %v1315_v21, %v1315_v21 }
 0x31a   : > { %v1386_v25 = vunpack.c.l.b16 %v1331_v49  ;;  %1705 = vmatmul.bf16.gmra.mxu2 %v4426_v39 }
 0x31c   : > { %v1389_v18 = vpack.c.b16 %v1386_v25, %v1385_v24 }
 0x31d   : > { %v3263_v27 = vpop.eup %3262 }
 0x31e   : > { %v1316_v43 = vmul.f32 %v3263_v27, %v4383_v46  ;;  %2720 = vmatmul.msk.bf16.vlgmr.msrb.gmra.mxu0 %vm1229_vm4, %v1389_v18  ;;  %v2935_v46 = vld [vmem:[#allocation12 + $0x18] sm:$0xff] }
 0x31f   : > { %1512 = vmatpush.bf16.msrb.mxu1 %v2935_v46  ;;  %v777_v46 = vld [vmem:[%s4171_s29 + $0x18] sm:$0xff]  }
 0x320   : > { %1324 = vst.msk [vmem:[%s4227_s22 + $0x30] sm:$0xff] %vm1229_vm4, %v1316_v43  ;;  %v1332_v23 = vpack.c.bf16 %v1316_v43, %v1316_v43 }
 0x322   : > { %v1387_v48 = vunpack.c.l.b16 %v1332_v23 }
 0x323   : > { %1513 = vmatpush.bf16.msrb.mxu1 %v2934_v51 }
 0x327   : > { %1514 = vmatpush.bf16.msrb.mxu1 %v2933_v35  ;;  %v785_v35 = vunpack.c.l.bf16 %v777_v46 }
 0x32a   : > { %1710 = vmatmul.bf16.gmra.mxu2 %v4433_v45 }
 0x32b   : > { %1515 = vmatpush.bf16.msrb.mxu1 %v2932_v36  ;;  %v786_v36 = vunpack.c.h.bf16 %v777_v46 }
 0x36e   : > { %v1301_v40 = vpop.xlane.xlu0 %1300 }
 0x36f   : > { %3264 = vrcp.f32 %v1301_v40 }
 0x375   : > { %v3265_v41 = vpop.eup %3264 }
 0x376   : > { %v1317_v42 = vmul.f32 %v3265_v41, %v4395_v37 }
 0x378   : > { %1325 = vst.msk [vmem:[%s4227_s22 + $0x38] sm:$0xff] %vm1229_vm4, %v1317_v42  ;;  %v1333_v44 = vpack.c.bf16 %v1317_v42, %v1317_v42 }
 0x37a   : > { %v1388_v52 = vunpack.c.l.b16 %v1333_v44 }
 0x37c   : > { %v1390_v53 = vpack.c.b16 %v1388_v52, %v1387_v48 }
 0x37d   : > { %v1696_v12 = vpop.f32.mrf.mxu2 }
 0x37e   : > { %2721 = vmatmul.msk.bf16.gmra.mxu0 %vm1229_vm4, %v1390_v53  ;;  %v1697_v38 = vadd.f32 %v1696_v12, %v1579_v16 }
 0x380   : > { %v1745_v24 = vpack.c.bf16 %v1697_v38, %v1697_v38 }
 0x381   : > { %v1371_v54 = vpop.f32.mrf.mxu3 }
 0x382   : > { %v4438_v60 = vadd.f32 %v1371_v54, %v779_v57  ;;  %v1777_v27 = vunpack.c.l.b16 %v1745_v24 }
 0x385   : > { %v1698_v13 = vpop.f32.mrf.mxu2 }
 0x386   : > { %v1699_v47 = vadd.f32 %v1698_v13, %v1579_v16 }
 0x388   : > { %v1746_v25 = vpack.c.bf16 %v1699_v47, %v1699_v47 }
 0x389   : > { %v1373_v37 = vpop.f32.mrf.mxu3 }
 0x38a   : > { %v4440_v61 = vadd.f32 %v1373_v37, %v780_v59  ;;  %v1778_v43 = vunpack.c.l.b16 %v1746_v25  ;;  %v3233_v37 = vld [vmem:[#allocation14] ss:$0 sm:$0xff] }
 0x38c   : > { %v1436_v58 = vpack.c.bf16 %v4440_v61, %v4438_v60  ;;  %v1781_v30 = vpack.c.b16 %v1778_v43, %v1777_v27 }
 0x38d   : > { %v1701_v17 = vpop.f32.mrf.mxu2 }
 0x38e   : > { %1516 = vmatmul.bf16.vlgmr.msrb.gmra.mxu1 %v1436_v58  ;;  %v1702_v19 = vadd.f32 %v1701_v17, %v1579_v16 }
 0x390   : > { %v1747_v0 = vpack.c.bf16 %v1702_v19, %v1702_v19 }
 0x391   : > { %v1376_v28 = vpop.f32.mrf.mxu3 }
 0x392   : > { %v4445_v3 = vadd.f32 %v1376_v28, %v781_v63  ;;  %v1779_v50 = vunpack.c.l.b16 %v1747_v0 }
 0x395   : > { %v1703_v21 = vpop.f32.mrf.mxu2 }
 0x396   : > { %v1704_v49 = vadd.f32 %v1703_v21, %v1579_v16 }
 0x398   : > { %v1748_v22 = vpack.c.bf16 %v1704_v49, %v1704_v49 }
 0x399   : > { %v1378_v2 = vpop.f32.mrf.mxu3 }
 0x39a   : > { %v4447_v4 = vadd.f32 %v1378_v2, %v782_v1  ;;  %v1780_v26 = vunpack.c.l.b16 %v1748_v22 }
 0x39b   : > { %v1418_v5 = vpop.f32.mrf.mxu0 }
 0x39c   : > { %v1437_v6 = vpack.c.bf16 %v4447_v4, %v4445_v3  ;;  %v4454_v10 = vadd.f32 %v1418_v5, %v783_v56  ;;  %v1782_v18 = vpack.c.b16 %v1780_v26, %v1779_v50 }
 0x39d   : > { %v1706_v20 = vpop.f32.mrf.mxu2 }
 0x39e   : > { %1521 = vmatmul.bf16.gmra.mxu1 %v1437_v6  ;;  %1791 = vmatpush.bf16.xpose.msra.mxu0 %v1782_v18  ;;  %v1707_v53 = vadd.f32 %v1706_v20, %v1579_v16 }
 0x3a0   : > { %v1749_v28 = vpack.c.bf16 %v1707_v53, %v1707_v53 }
 0x3a2   : > { %v1820_v5 = vunpack.c.l.b16 %v1749_v28 }
 0x3a3   : > { %v1420_v9 = vpop.f32.mrf.mxu0 }
 0x3a4   : > { %v4452_v33 = vadd.f32 %v1420_v9, %v784_v8 }
 0x3a5   : > { %v1708_v31 = vpop.f32.mrf.mxu2 }
 0x3a6   : > { %v1438_v11 = vpack.c.bf16 %v4452_v33, %v4454_v10  ;;  %1792 = vmatpush.bf16.xpose.msra.mxu0 %v1781_v30  ;;  %v1709_v54 = vadd.f32 %v1708_v31, %v1579_v16 }
 0x3a8   : > { %v1750_v62 = vpack.c.bf16 %v1709_v54, %v1709_v54 }
 0x3aa   : > { %v1821_v6 = vunpack.c.l.b16 %v1750_v62 }
 0x3ac   : > { %v1824_v9 = vpack.c.b16 %v1821_v6, %v1820_v5 }
 0x3ad   : > { %v1711_v51 = vpop.f32.mrf.mxu2 }
 0x3ae   : > { %1526 = vmatmul.bf16.gmra.mxu1 %v1438_v11  ;;  %v1712_v40 = vadd.f32 %v1711_v51, %v1579_v16 }
 0x3b0   : > { %v1751_v44 = vpack.c.bf16 %v1712_v40, %v1712_v40 }
 0x3b2   : > { %v1822_v57 = vunpack.c.l.b16 %v1751_v44 }
 0x3b5   : > { %v1713_v52 = vpop.f32.mrf.mxu2 }
 0x3b6   : > { %v1714_v55 = vadd.f32 %v1713_v52, %v1579_v16  ;;  %v1847_v52 = vld [vmem:[%s4188_s20] sm:$0x1] }
 0x3b7   : > { %vm1849_vm1 = vcmp.gt.s32.totalorder %v1847_v52, 0 }
 0x3b8   : > { %v1752_v59 = vpack.c.bf16 %v1714_v55, %v1714_v55 }
 0x3ba   : > { %v1823_v63 = vunpack.c.l.b16 %v1752_v59 }
 0x3bc   : > { %v1825_v1 = vpack.c.b16 %v1823_v63, %v1822_v57 }
 0x3be   : > { %1834 = vmatpush.bf16.xpose.msrb.mxu0 %v1825_v1 }
 0x3c6   : > { %1835 = vmatpush.bf16.xpose.msrb.mxu0 %v1824_v9  ;;  %v1848_v9 = vld [vmem:[%s4188_s20 + $0x1] sm:$0x1] }
 0x3c7   : > { %vm1850_vm3 = vcmp.gt.s32.totalorder %v1848_v9, 0 }
 0x3fb   : > { %v1423_v32 = vpop.f32.mrf.mxu0 }
 0x3fc   : > { %v4465_v42 = vadd.f32 %v1423_v32, %v785_v35 }
 0x403   : > { %v1425_v41 = vpop.f32.mrf.mxu0 }
 0x404   : > { %v4467_v23 = vadd.f32 %v1425_v41, %v786_v36 }
 0x406   : > { %v1439_v48 = vpack.c.bf16 %v4467_v23, %v4465_v42 }
 0x408   : > { %1531 = vmatmul.bf16.gmra.mxu1 %v1439_v48 }
 0x40b   : > { %v1517_v58 = vpop.f32.mrf.mxu1 }
 0x40c   : > { %v1518_v2 = vadd.f32 %v3233_v37, %v1517_v58  ;;  %v1851_v58 = vsel %vm1849_vm1, 1, %v3813_v15 }
 0x40d   : > { %v1853_v63 = vperm.slane %v1851_v58, 0 }
 0x40e   : > { %v1537_v7 = vmul.f32 0.088388346, %v1518_v2 }
 0x40f   : > { %vm4473_vm2 = vcmp.eq.s32.totalorder %v1853_v63, 1 }
 0x410   : > { %v1545_v11 = vpack.c.bf16 %v1537_v7, %v1537_v7 }
 0x412   : > { %v1765_v16 = vunpack.c.l.b16 %v1545_v11  ;;  %v2830_v11 = vld [vmem:[#allocation15 + $0x78] sm:$0xf0] }
 0x413   : > { %v1519_v8 = vpop.f32.mrf.mxu1 }
 0x414   : > { %v1520_v56 = vadd.f32 %v3233_v37, %v1519_v8 }
 0x416   : > { %v1538_v12 = vmul.f32 0.088388346, %v1520_v56  ;;  %v2958_v56 = vld [vmem:[#allocation15 + $0x74] sm:$0xf] }
 0x418   : > { %v1546_v13 = vpack.c.bf16 %v1538_v12, %v1538_v12  ;;  %v2956_v12 = vld [vmem:[#allocation15 + $0x64] sm:$0xf] }
 0x41a   : > { %v1766_v17 = vunpack.c.l.b16 %v1546_v13  ;;  %v2833_v13 = vor.u32 %v2958_v56, %v2830_v11 }
 0x41b   : > { %v1522_v19 = vpop.f32.mrf.mxu1 }
 0x41c   : > { %v1769_v0 = vpack.c.b16 %v1766_v17, %v1765_v16  ;;  %v1523_v21 = vadd.f32 %v3233_v37, %v1522_v19  ;;  %v2822_v16 = vld [vmem:[#allocation15 + $0x68] sm:$0xf0]  ;;  %1716 = vmatpush.bf16.msrb.mxu3 %v2833_v13  ;;  %v1852_v19 = vsel %vm1850_vm3, 1, %v3813_v15  ;;  %v2798_v15 = vld [vmem:[#allocation15 + $0x38] sm:$0xf0] }
 0x41d   : > { %v2825_v17 = vor.u32 %v2956_v12, %v2822_v16 }
 0x41e   : > { %1793 = vmatmul.bf16.vlgmr.msra.gmra.mxu0 %v1769_v0  ;;  %v1539_v38 = vmul.f32 0.088388346, %v1523_v21  ;;  %v2954_v0 = vld [vmem:[#allocation15 + $0x54] sm:$0xf]  ;;  %v2814_v21 = vld [vmem:[#allocation15 + $0x58] sm:$0xf0] }
 0x420   : > { %v1547_v50 = vpack.c.bf16 %v1539_v38, %v1539_v38  ;;  %1717 = vmatpush.bf16.msrb.mxu3 %v2825_v17 }
 0x422   : > { %v1767_v25 = vunpack.c.l.b16 %v1547_v50  ;;  %v2817_v50 = vor.u32 %v2954_v0, %v2814_v21 }
 0x423   : > { %v1524_v47 = vpop.f32.mrf.mxu1 }
 0x424   : > { %v1525_v49 = vadd.f32 %v3233_v37, %v1524_v47  ;;  %1718 = vmatpush.bf16.msrb.mxu3 %v2817_v50 }
 0x426   : > { %v1540_v22 = vmul.f32 0.088388346, %v1525_v49  ;;  %v1854_v49 = vperm.slane %v1852_v19, 0 }
 0x428   : > { %v1548_v24 = vpack.c.bf16 %v1540_v22, %v1540_v22  ;;  %v2952_v22 = vld [vmem:[#allocation15 + $0x44] sm:$0xf]  ;;  %vm4489_vm5 = vcmp.eq.s32.totalorder %v1854_v49, 1 }
 0x42a   : > { %v1768_v26 = vunpack.c.l.b16 %v1548_v24  ;;  %v2806_v24 = vld [vmem:[#allocation15 + $0x48] sm:$0xf0] }
 0x42b   : > { %v1527_v18 = vpop.f32.mrf.mxu1 }
 0x42c   : > { %v1770_v27 = vpack.c.b16 %v1768_v26, %v1767_v25  ;;  %v1528_v43 = vadd.f32 %v3233_v37, %v1527_v18  ;;  %v2809_v26 = vor.u32 %v2952_v22, %v2806_v24  ;;  %v2950_v18 = vld [vmem:[#allocation15 + $0x34] sm:$0xf] }
 0x42e   : > { %1798 = vmatmul.bf16.gmra.mxu0 %v1770_v27  ;;  %v1541_v20 = vmul.f32 0.088388346, %v1528_v43  ;;  %1719 = vmatpush.bf16.msrb.mxu3 %v2809_v26 }
 0x430   : > { %v1549_v32 = vpack.c.bf16 %v1541_v20, %v1541_v20 }
 0x432   : > { %v1808_v35 = vunpack.c.l.b16 %v1549_v32  ;;  %v2790_v32 = vld [vmem:[#allocation15 + $0x28] sm:$0xf0] }
 0x433   : > { %v1529_v30 = vpop.f32.mrf.mxu1 }
 0x434   : > { %v1530_v31 = vadd.f32 %v3233_v37, %v1529_v30  ;;  %v2801_v30 = vor.u32 %v2950_v18, %v2798_v15 }
 0x436   : > { %v1542_v46 = vmul.f32 0.088388346, %v1530_v31  ;;  %v2948_v31 = vld [vmem:[#allocation15 + $0x24] sm:$0xf]  ;;  %1720 = vmatpush.bf16.msrb.mxu3 %v2801_v30 }
 0x438   : > { %v1550_v51 = vpack.c.bf16 %v1542_v46, %v1542_v46  ;;  %v2793_v46 = vor.u32 %v2948_v31, %v2790_v32 }
 0x43a   : > { %v1809_v36 = vunpack.c.l.b16 %v1550_v51  ;;  %1721 = vmatpush.bf16.msrb.mxu3 %v2793_v46 }
 0x43c   : > { %v1812_v40 = vpack.c.b16 %v1809_v36, %v1808_v35  ;;  %v2946_v35 = vld [vmem:[#allocation15 + $0x14] sm:$0xf]  ;;  %v2782_v36 = vld [vmem:[#allocation15 + $0x18] sm:$0xf0] }
 0x43d   : > { %v2785_v52 = vor.u32 %v2946_v35, %v2782_v36 }
 0x43e   : > { %1836 = vmatmul.bf16.vlgmr.msrb.gmra.mxu0 %v1812_v40 }
 0x43f   : > { %1722 = vmatpush.bf16.msrb.mxu3 %v2785_v52 }
 0x485   : > { %v1532_v41 = vpop.f32.mrf.mxu1 }
 0x486   : > { %v1533_v44 = vadd.f32 %v3233_v37, %v1532_v41 }
 0x488   : > { %v1543_v48 = vmul.f32 0.088388346, %v1533_v44 }
 0x48a   : > { %v1551_v55 = vpack.c.bf16 %v1543_v48, %v1543_v48 }
 0x48c   : > { %v1810_v28 = vunpack.c.l.b16 %v1551_v55 }
 0x48d   : > { %v1534_v53 = vpop.f32.mrf.mxu1 }
 0x48e   : > { %v1535_v54 = vadd.f32 %v3233_v37, %v1534_v53  ;;  %v2944_v53 = vld [vmem:[#allocation15 + $0x4] sm:$0xf] }
 0x490   : > { %v1544_v57 = vmul.f32 0.088388346, %v1535_v54  ;;  %v2774_v54 = vld [vmem:[#allocation15 + $0x8] sm:$0xf0] }
 0x491   : > { %v2777_v55 = vor.u32 %v2944_v53, %v2774_v54 }
 0x492   : > { %v1552_v59 = vpack.c.bf16 %v1544_v57, %v1544_v57 }
 0x493   : > { %1723 = vmatpush.bf16.msrb.mxu3 %v2777_v55 }
 0x494   : > { %v1811_v62 = vunpack.c.l.b16 %v1552_v59 }
 0x496   : > { %v1813_v1 = vpack.c.b16 %v1811_v62, %v1810_v28  ;;  %1724 = vmatmul.bf16.vlgmr.msrb.gmra.mxu3 %v4416_v29 }
 0x498   : > { %1841 = vmatmul.bf16.gmra.mxu0 %v1813_v1 }
 0x49b   : > { %v1794_v5 = vpop.f32.mrf.mxu0 }
 0x49c   : > { %v4479_v37 = vsel %vm4473_vm2, %v1794_v5, -1e+09 }
 0x49d   : > { %v1865_v6 = vsel %vm1229_vm4, %v4479_v37, -inf }
 0x49e   : > { %1866 = vmax.xlane.f32.xlu0 %v1865_v6 }
 0x4a3   : > { %v1796_v7 = vpop.f32.mrf.mxu0 }
 0x4a4   : > { %v1858_v51 = vsel %vm4473_vm2, %v1796_v7, -1e+09 }
 0x4a5   : > { %v1868_v44 = vsel %vm1229_vm4, %v1858_v51, -inf }
 0x4a6   : > { %1729 = vmatmul.bf16.gmra.mxu3 %v4422_v34 }
 0x4ab   : > { %v1799_v8 = vpop.f32.mrf.mxu0 }
 0x4ac   : > { %v1859_v57 = vsel %vm4473_vm2, %v1799_v8, -1e+09 }
 0x4ad   : > { %v1871_v59 = vsel %vm1229_vm4, %v1859_v57, -inf }
 0x4b3   : > { %v1801_v38 = vpop.f32.mrf.mxu0 }
 0x4b4   : > { %v4487_v47 = vsel %vm4473_vm2, %v1801_v38, -1e+09 }
 0x4b6   : > { %1734 = vmatmul.bf16.gmra.mxu3 %v4426_v39  ;;  %v1874_v39 = vsel %vm1229_vm4, %v4487_v47, -inf }
 0x4bb   : > { %v1837_v27 = vpop.f32.mrf.mxu0 }
 0x4bc   : > { %v1861_v43 = vsel %vm4489_vm5, %v1837_v27, -1e+09 }
 0x4bd   : > { %v1877_v20 = vsel %vm1229_vm4, %v1861_v43, -inf }
 0x4be   : > { %1878 = vmax.xlane.f32.xlu1 %v1877_v20 }
 0x4c3   : > { %v1839_v40 = vpop.f32.mrf.mxu0 }
 0x4c4   : > { %v1862_v41 = vsel %vm4489_vm5, %v1839_v40, -1e+09 }
 0x4c5   : > { %v1880_v48 = vsel %vm1229_vm4, %v1862_v41, -inf }
 0x4c6   : > { %1869 = vmax.xlane.f32.xlu1 %v1868_v44  ;;  %1881 = vmax.xlane.f32.xlu2 %v1880_v48 }
 0x4c7   : > { %1739 = vmatmul.bf16.gmra.mxu3 %v4433_v45 }
 0x4ce   : > { %1872 = vmax.xlane.f32.xlu1 %v1871_v59 }
 0x511   : > { %v1867_v58 = vpop.xlane.xlu0 %1866 }
 0x512   : > { %v1889_v62 = vsub.f32 %v4479_v37, %v1867_v58 }
 0x514   : > { %v1897_v2 = vmul.f32 1.442695, %v1889_v62 }
 0x515   : > { %v1842_v28 = vpop.f32.mrf.mxu0 }
 0x516   : > { %v4512_v63 = vsel %vm4489_vm5, %v1842_v28, -1e+09  ;;  %3266 = vpow2.f32 %v1897_v2 }
 0x517   : > { %v1883_v1 = vsel %vm1229_vm4, %v4512_v63, -inf }
 0x518   : > { %1884 = vmax.xlane.f32.xlu2 %v1883_v1 }
 0x519   : > { %v1725_v18 = vpop.f32.mrf.mxu3 }
 0x51c   : > { %v4524_v5 = vpop.eup %3266 }
 0x51d   : > { %v1844_v29 = vpop.f32.mrf.mxu0  ;;  %v1913_v37 = vsel %vm1229_vm4, %v4524_v5, 0.0 }
 0x51e   : > { %v4518_v34 = vsel %vm4489_vm5, %v1844_v29, -1e+09 }
 0x51f   : > { %v1886_v45 = vsel %vm1229_vm4, %v4518_v34, -inf }
 0x520   : > { %1875 = vmax.xlane.f32.xlu2 %v1874_v39  ;;  %1887 = vmax.xlane.f32.xlu0 %v1886_v45 }
 0x521   : > { %v1727_v15 = vpop.f32.mrf.mxu3 }
 0x528   : > { %1914 = vadd.xlane.f32.xlu2 %v1913_v37 }
 0x529   : > { %v1730_v27 = vpop.f32.mrf.mxu3 }
 0x531   : > { %v1879_v6 = vpop.xlane.xlu1 %1878  ;;  %v1732_v46 = vpop.f32.mrf.mxu3 }
 0x532   : > { %v1893_v7 = vsub.f32 %v1861_v43, %v1879_v6  ;;  %v1580_v43 = vperm.slane %v4461_v14, 1 }
 0x534   : > { %v1905_v8 = vmul.f32 1.442695, %v1893_v7  ;;  %v1731_v20 = vadd.f32 %v1730_v27, %v1580_v43  ;;  %v1726_v30 = vadd.f32 %v1725_v18, %v1580_v43  ;;  %v1728_v31 = vadd.f32 %v1727_v15, %v1580_v43 }
 0x535   : > { %v1733_v36 = vadd.f32 %v1732_v46, %v1580_v43 }
 0x536   : > { %3268 = vpow2.f32 %v1905_v8  ;;  %v1755_v32 = vpack.c.bf16 %v1731_v20, %v1731_v20  ;;  %v1754_v35 = vpack.c.bf16 %v1728_v31, %v1728_v31 }
 0x538   : > { %v1985_v40 = vunpack.c.l.b16 %v1755_v32  ;;  %v1984_v48 = vunpack.c.l.b16 %v1754_v35 }
 0x539   : > { %v1870_v9 = vpop.xlane.xlu1 %1869  ;;  %v1882_v56 = vpop.xlane.xlu2 %1881 }
 0x53a   : > { %v1890_v11 = vsub.f32 %v1858_v51, %v1870_v9  ;;  %v1894_v12 = vsub.f32 %v1862_v41, %v1882_v56  ;;  %v1753_v51 = vpack.c.bf16 %v1726_v30, %v1726_v30  ;;  %v1756_v41 = vpack.c.bf16 %v1733_v36, %v1733_v36  ;;  %v1735_v55 = vpop.f32.mrf.mxu3 }
 0x53b   : > { %v1736_v45 = vadd.f32 %v1735_v55, %v1580_v43 }
 0x53c   : > { %v4528_v13 = vpop.eup %3268  ;;  %v1899_v16 = vmul.f32 1.442695, %v1890_v11  ;;  %v1907_v17 = vmul.f32 1.442695, %v1894_v12  ;;  %v1983_v44 = vunpack.c.l.b16 %v1753_v51  ;;  %v1986_v52 = vunpack.c.l.b16 %v1756_v41 }
 0x53d   : > { %v1925_v19 = vsel %vm1229_vm4, %v4528_v13, 0.0  ;;  %v1757_v11 = vpack.c.bf16 %v1736_v45, %v1736_v45 }
 0x53e   : > { %3270 = vpow2.f32 %v1899_v16  ;;  %1926 = vadd.xlane.f32.xlu0 %v1925_v19  ;;  %v1988_v53 = vpack.c.b16 %v1986_v52, %v1985_v40  ;;  %v1987_v54 = vpack.c.b16 %v1984_v48, %v1983_v44 }
 0x53f   : > { %3272 = vpow2.f32 %v1907_v17  ;;  %v2030_v19 = vunpack.c.l.b16 %v1757_v11 }
 0x540   : > { %2003 = vmatpush.bf16.msra.mxu1 %v1988_v53 }
 0x541   : > { %v1873_v0 = vpop.xlane.xlu1 %1872 }
 0x542   : > { %v1891_v21 = vsub.f32 %v1859_v57, %v1873_v0  ;;  %v1737_v57 = vpop.f32.mrf.mxu3 }
 0x543   : > { %v1738_v37 = vadd.f32 %v1737_v57, %v1580_v43 }
 0x544   : > { %v4532_v38 = vpop.eup %3270  ;;  %v1901_v49 = vmul.f32 1.442695, %v1891_v21  ;;  %2004 = vmatpush.bf16.msra.mxu1 %v1987_v54 }
 0x545   : > { %v4534_v50 = vpop.eup %3272  ;;  %v1916_v22 = vsel %vm1229_vm4, %v4532_v38, 0.0  ;;  %v1758_v12 = vpack.c.bf16 %v1738_v37, %v1738_v37 }
 0x546   : > { %3274 = vpow2.f32 %v1901_v49  ;;  %v1928_v24 = vsel %vm1229_vm4, %v4534_v50, 0.0  ;;  %1917 = vadd.xlane.f32.xlu0 %v1916_v22 }
 0x547   : > { %1929 = vadd.xlane.f32.xlu1 %v1928_v24  ;;  %v2031_v0 = vunpack.c.l.b16 %v1758_v12 }
 0x549   : > { %v2034_v18 = vpack.c.b16 %v2031_v0, %v2030_v19 }
 0x54a   : > { %v1740_v28 = vpop.f32.mrf.mxu3 }
 0x54b   : > { %v1741_v62 = vadd.f32 %v1740_v28, %v1580_v43 }
 0x54c   : > { %v4540_v25 = vpop.eup %3274 }
 0x54d   : > { %v1919_v26 = vsel %vm1229_vm4, %v4540_v25, 0.0  ;;  %v1759_v9 = vpack.c.bf16 %v1741_v62, %v1741_v62 }
 0x54e   : > { %1920 = vadd.xlane.f32.xlu0 %v1919_v26 }
 0x552   : > { %v1742_v56 = vpop.f32.mrf.mxu3 }
 0x553   : > { %v1743_v16 = vadd.f32 %v1742_v56, %v1580_v43 }
 0x555   : > { %v1760_v17 = vpack.c.bf16 %v1743_v16, %v1743_v16 }
 0x557   : > { %v2033_v21 = vunpack.c.l.b16 %v1760_v17 }
 0x58b   : > { %v1885_v14 = vpop.xlane.xlu2 %1884 }
 0x58c   : > { %v1895_v59 = vsub.f32 %v4512_v63, %v1885_v14 }
 0x58e   : > { %v1909_v58 = vmul.f32 1.442695, %v1895_v59 }
 0x590   : > { %3276 = vpow2.f32 %v1909_v58 }
 0x593   : > { %v1876_v1 = vpop.xlane.xlu2 %1875  ;;  %v1888_v2 = vpop.xlane.xlu0 %1887 }
 0x594   : > { %v1892_v29 = vsub.f32 %v4487_v47, %v1876_v1  ;;  %v1896_v39 = vsub.f32 %v4518_v34, %v1888_v2  ;;  %v2032_v47 = vunpack.c.l.b16 %v1759_v9 }
 0x596   : > { %v4548_v6 = vpop.eup %3276  ;;  %v1903_v7 = vmul.f32 1.442695, %v1892_v29  ;;  %v1911_v8 = vmul.f32 1.442695, %v1896_v39  ;;  %v2035_v22 = vpack.c.b16 %v2033_v21, %v2032_v47 }
 0x597   : > { %v1931_v63 = vsel %vm1229_vm4, %v4548_v6, 0.0 }
 0x598   : > { %3278 = vpow2.f32 %v1903_v7  ;;  %1932 = vadd.xlane.f32.xlu1 %v1931_v63  ;;  %2050 = vmatpush.bf16.msra.mxu2 %v2035_v22 }
 0x599   : > { %3280 = vpow2.f32 %v1911_v8 }
 0x59b   : > { %v1915_v34 = vpop.xlane.xlu2 %1914 }
 0x59c   : > { %3282 = vrcp.f32 %v1915_v34  ;;  %2051 = vmatpush.bf16.msra.mxu2 %v2034_v18 }
 0x59e   : > { %v3279_v49 = vpop.eup %3278 }
 0x59f   : > { %v3281_v24 = vpop.eup %3280  ;;  %v1922_v26 = vsel %vm1229_vm4, %v3279_v49, 0.0 }
 0x5a0   : > { %1923 = vadd.xlane.f32.xlu1 %v1922_v26  ;;  %v1934_v15 = vsel %vm1229_vm4, %v3281_v24, 0.0 }
 0x5a1   : > { %1935 = vadd.xlane.f32.xlu2 %v1934_v15 }
 0x5a2   : > { %v3283_v27 = vpop.eup %3282 }
 0x5a3   : > { %v1945_v43 = vmul.f32 %v3283_v27, %v4524_v5 }
 0x5a5   : > { %1953 = vst.msk [vmem:[%s4229_s23] sm:$0xff] %vm1229_vm4, %v1945_v43  ;;  %v1961_v36 = vpack.c.bf16 %v1945_v43, %v1945_v43 }
 0x5a7   : > { %v1973_v52 = vunpack.c.l.b16 %v1961_v36 }
 0x5b1   : > { %v1927_v20 = vpop.xlane.xlu0 %1926 }
 0x5b2   : > { %3284 = vrcp.f32 %v1927_v20 }
 0x5b8   : > { %v3285_v30 = vpop.eup %3284 }
 0x5b9   : > { %v1949_v31 = vmul.f32 %v3285_v30, %v4528_v13  ;;  %v1918_v32 = vpop.xlane.xlu0 %1917 }
 0x5ba   : > { %v1930_v46 = vpop.xlane.xlu1 %1929  ;;  %3286 = vrcp.f32 %v1918_v32 }
 0x5bb   : > { %1957 = vst.msk [vmem:[%s4229_s23 + $0x20] sm:$0xff] %vm1229_vm4, %v1949_v31  ;;  %3288 = vrcp.f32 %v1930_v46  ;;  %v1965_v41 = vpack.c.bf16 %v1949_v31, %v1949_v31 }
 0x5bd   : > { %v2020_v54 = vunpack.c.l.b16 %v1965_v41 }
 0x5c0   : > { %v3287_v51 = vpop.eup %3286 }
 0x5c1   : > { %v3289_v35 = vpop.eup %3288  ;;  %v1946_v5 = vmul.f32 %v3287_v51, %v4532_v38  ;;  %v1921_v40 = vpop.xlane.xlu0 %1920 }
 0x5c2   : > { %v1950_v44 = vmul.f32 %v3289_v35, %v4534_v50  ;;  %3290 = vrcp.f32 %v1921_v40 }
 0x5c3   : > { %1954 = vst.msk [vmem:[%s4229_s23 + $0x8] sm:$0xff] %vm1229_vm4, %v1946_v5  ;;  %v1962_v13 = vpack.c.bf16 %v1946_v5, %v1946_v5 }
 0x5c4   : > { %1958 = vst.msk [vmem:[%s4229_s23 + $0x28] sm:$0xff] %vm1229_vm4, %v1950_v44  ;;  %v1966_v48 = vpack.c.bf16 %v1950_v44, %v1950_v44 }
 0x5c5   : > { %v1974_v53 = vunpack.c.l.b16 %v1962_v13 }
 0x5c6   : > { %v2021_v55 = vunpack.c.l.b16 %v1966_v48 }
 0x5c7   : > { %v1977_v57 = vpack.c.b16 %v1974_v53, %v1973_v52 }
 0x5c8   : > { %v3291_v14 = vpop.eup %3290  ;;  %v2024_v38 = vpack.c.b16 %v2021_v55, %v2020_v54 }
 0x5c9   : > { %v1947_v59 = vmul.f32 %v3291_v14, %v4540_v25  ;;  %2834 = vmatmul.msk.bf16.vlgmr.msra.gmra.mxu1 %vm1229_vm4, %v1977_v57 }
 0x5ca   : > { %2836 = vmatmul.msk.bf16.vlgmr.msra.gmra.mxu2 %vm1229_vm4, %v2024_v38 }
 0x5cb   : > { %1955 = vst.msk [vmem:[%s4229_s23 + $0x10] sm:$0xff] %vm1229_vm4, %v1947_v59  ;;  %v1963_v39 = vpack.c.bf16 %v1947_v59, %v1947_v59 }
 0x5cd   : > { %v1975_v9 = vunpack.c.l.b16 %v1963_v39 }
 0x60b   : > { %v1933_v50 = vpop.xlane.xlu1 %1932 }
 0x60c   : > { %3292 = vrcp.f32 %v1933_v50 }
 0x612   : > { %v3293_v58 = vpop.eup %3292 }
 0x613   : > { %v1951_v28 = vmul.f32 %v3293_v58, %v4548_v6  ;;  %v1924_v62 = vpop.xlane.xlu1 %1923 }
 0x614   : > { %3294 = vrcp.f32 %v1924_v62  ;;  %v1936_v1 = vpop.xlane.xlu2 %1935 }
 0x615   : > { %1959 = vst.msk [vmem:[%s4229_s23 + $0x30] sm:$0xff] %vm1229_vm4, %v1951_v28  ;;  %3296 = vrcp.f32 %v1936_v1  ;;  %v1967_v37 = vpack.c.bf16 %v1951_v28, %v1951_v28 }
 0x617   : > { %v2022_v63 = vunpack.c.l.b16 %v1967_v37 }
 0x61a   : > { %v3295_v25 = vpop.eup %3294 }
 0x61b   : > { %v3297_v2 = vpop.eup %3296  ;;  %v1948_v29 = vmul.f32 %v3295_v25, %v3279_v49 }
 0x61c   : > { %v1952_v45 = vmul.f32 %v3297_v2, %v3281_v24 }
 0x61d   : > { %1956 = vst.msk [vmem:[%s4229_s23 + $0x18] sm:$0xff] %vm1229_vm4, %v1948_v29  ;;  %v1964_v7 = vpack.c.bf16 %v1948_v29, %v1948_v29 }
 0x61e   : > { %1960 = vst.msk [vmem:[%s4229_s23 + $0x38] sm:$0xff] %vm1229_vm4, %v1952_v45  ;;  %v1968_v8 = vpack.c.bf16 %v1952_v45, %v1952_v45 }
 0x61f   : > { %v1976_v6 = vunpack.c.l.b16 %v1964_v7 }
 0x620   : > { %v2023_v56 = vunpack.c.l.b16 %v1968_v8 }
 0x621   : > { %v1978_v11 = vpack.c.b16 %v1976_v6, %v1975_v9 }
 0x622   : > { %v2025_v12 = vpack.c.b16 %v2023_v56, %v2022_v63 }
 0x623   : > { %2835 = vmatmul.msk.bf16.gmra.mxu1 %vm1229_vm4, %v1978_v11 }
 0x624   : > { %2837 = vmatmul.msk.bf16.gmra.mxu2 %vm1229_vm4, %v2025_v12 }
 0x646   : > { %v2006_v16 = vpop.f32.mrf.mxu1 }
 0x647   : > { %v2063_v34 = vadd.f32 %v2006_v16, %v4438_v60 }
 0x64d   : > { %v2053_v47 = vpop.f32.mrf.mxu2 }
 0x64e   : > { %v2008_v17 = vpop.f32.mrf.mxu1  ;;  %v2067_v49 = vadd.f32 %v2053_v47, %v4454_v10 }
 0x64f   : > { %v2064_v19 = vadd.f32 %v2008_v17, %v4440_v61 }
 0x651   : > { %v2980_v0 = vpack.c.bf16 %v2064_v19, %v2063_v34 }
 0x653   : > { %2981 = vst [vmem:[#allocation2 + $0x10] sm:$0xff] %v2980_v0  }
 0x655   : > { %v2055_v21 = vpop.f32.mrf.mxu2 }
 0x656   : > { %v2068_v22 = vadd.f32 %v2055_v21, %v4452_v33 }
 0x658   : > { %v2990_v24 = vpack.c.bf16 %v2068_v22, %v2067_v49 }
 0x65a   : > { %2998 = vst [vmem:[#allocation2 + $0x18] sm:$0xff] %v2990_v24  }
 0x6a0   : > { %v2011_v26 = vpop.f32.mrf.mxu1 }
 0x6a1   : > { %v2065_v27 = vadd.f32 %v2011_v26, %v4445_v3 }
 0x6a7   : > { %v2058_v18 = vpop.f32.mrf.mxu2 }
 0x6a8   : > { %v2013_v15 = vpop.f32.mrf.mxu1  ;;  %v2069_v61 = vadd.f32 %v2058_v18, %v4465_v42 }
 0x6a9   : > { %v2066_v43 = vadd.f32 %v2013_v15, %v4447_v4 }
 0x6ab   : > { %v2985_v20 = vpack.c.bf16 %v2066_v43, %v2065_v27 }
 0x6ad   : > { %2997 = vst [vmem:[#allocation2] sm:$0xff] %v2985_v20  }
 0x6af   : > { %v2060_v60 = vpop.f32.mrf.mxu2 }
 0x6b0   : > { %v2070_v30 = vadd.f32 %v2060_v60, %v4467_v23 }
 0x6b2   : > { %v2995_v31 = vpack.c.bf16 %v2070_v30, %v2069_v61 }
 0x6b4   : > { %2999 = vst [vmem:[#allocation2 + $0x8] sm:$0xff] %v2995_v31  }
 0x6b5 PF: > { %v2971_v33 = vld [vmem:[%s4207_s9 + $0x38] sm:$0xff]  ;;  %v2970_v3 = vld [vmem:[%s4207_s9 + $0x30] sm:$0xff]  ;;  %v2969_v4 = vld [vmem:[%s4207_s9 + $0x28] sm:$0xff]  ;;  %s4855_s29 = sld [smem:[#allocation35_spill]]  ;;  %s2267_s7 = sshll.u32 %s4227_s22, 4  ;;  %s2268_s7 = int_to_ptr.vmem [resolvable:$true] %s2267_s7 }
 0x6b6   : > { %2187 = vmatpush.bf16.msra.mxu0 %v2971_v33  ;;  %3000 = vmatpush.bf16.msra.mxu1 %v2971_v33  ;;  %v2968_v10 = vld [vmem:[%s4207_s9 + $0x20] sm:$0xff]  ;;  %v2967_v42 = vld [vmem:[%s4207_s9 + $0x18] sm:$0xff]  ;;  %v2966_v23 = vld [vmem:[%s4207_s9 + $0x10] sm:$0xff]  ;;  %s4856_s20 = sld [smem:[#allocation42_spill]]  ;;  %s2230_s10 = scalar_lea.sflag [#allocation20], %s4164_s5 }
 0x6b7   : > { %3001 = vmatpush.bf16.msra.mxu2 %v2971_v33  ;;  %3002 = vmatpush.bf16.msra.mxu3 %v2971_v33  ;;  %v2965_v32 = vld [vmem:[%s4207_s9 + $0x8] sm:$0xff]  ;;  %v2964_v46 = vld [vmem:[%s4207_s9] sm:$0xff]  ;;  %v2961_v35 = vld [vmem:[#allocation2] sm:$0xff]  ;;  %s4857_s6 = sld [smem:[#allocation62_spill]] }
 0x6b8   : > { %v2960_v51 = vld [vmem:[#allocation2 + $0x10] sm:$0xff]  ;;  %v2962_v36 = vld [vmem:[#allocation2 + $0x18] sm:$0xff]  ;;  %s4858_s16 = sld [smem:[#allocation63_spill]] }
 0x6ba   : > { %2188 = vmatpush.bf16.msra.mxu0 %v2970_v3  ;;  %3003 = vmatpush.bf16.msra.mxu1 %v2970_v3 }
 0x6bb   : > { %3004 = vmatpush.bf16.msra.mxu2 %v2970_v3  ;;  %3005 = vmatpush.bf16.msra.mxu3 %v2970_v3  ;;  %v2963_v5 = vld [vmem:[#allocation2 + $0x8] sm:$0xff]  ;;  %s2974_s13 = sshll.u32 %s4855_s29, 6 }
 0x6bc   : > { %p4860_p6 = scmp.ne.s32.totalorder %s4856_s20, 0 }
 0x6bd   : > { %s2266_s12 = scalar_lea.hbm %s4857_s6, %s2974_s13  ;;  %s3589_s19 = scalar_lea.hbm %s4857_s6, 256 }
 0x6be   : > { %2189 = vmatpush.bf16.msra.mxu0 %v2969_v4  ;;  %3006 = vmatpush.bf16.msra.mxu1 %v2969_v4  ;;  %s2269_s27 = sshll.u32 %s2266_s12, 4  ;;  %s4859_s0 = smov %s4858_s16  ;;  %s2270_s27 = int_to_ptr.hbm [resolvable:$true] %s2269_s27 }
 0x6bf   : > { %3007 = vmatpush.bf16.msra.mxu2 %v2969_v4  ;;  %3008 = vmatpush.bf16.msra.mxu3 %v2969_v4  ;;  %s2284_s28 = scalar_lea.hbm %s4858_s16, %s2974_s13  ;;  %s3583_s1 = sshra.s32 %s2270_s27, 4  ;;  %s3584_s1 = int_to_ptr.hbm [resolvable:$true] %s3583_s1 }
 0x6c0   : > { %s3585_s25 = scalar_lea.hbm %s3584_s1, 64  ;;  %p3590_p0 = scmp.lt.s32.totalorder %s3584_s1, %s4857_s6 }
 0x6c1   : > { %p3586_p9 = scmp.ne.s32.totalorder %s3584_s1, %s3585_s25  ;;  %p3591_p2 = scmp.lt.s32.totalorder %s3589_s19, %s3585_s25 }
 0x6c2   : > { %2190 = vmatpush.bf16.msra.mxu0 %v2968_v10  ;;  %3009 = vmatpush.bf16.msra.mxu1 %v2968_v10 }
 0x6c3   : > { %3010 = vmatpush.bf16.msra.mxu2 %v2968_v10  ;;  %3011 = vmatpush.bf16.msra.mxu3 %v2968_v10  ;;  %p3587_p10 = pnand %p3586_p9, %p4860_p6  ;;  %p3592_p8 = por %p3591_p2, %p3590_p0 }
 0x6c5   : > { %p3588_p12 = pneg %p3587_p10 }
 0x6c6   : > { %2191 = vmatpush.bf16.msra.mxu0 %v2967_v42  ;;  %3012 = vmatpush.bf16.msra.mxu1 %v2967_v42 }
 0x6c7   : > { %3013 = vmatpush.bf16.msra.mxu2 %v2967_v42  ;;  %3014 = vmatpush.bf16.msra.mxu3 %v2967_v42  ;;  %p3593_p4 = pnand %p3592_p8, %p3588_p12 }
 0x6ca   : > { %2192 = vmatpush.bf16.msra.mxu0 %v2966_v23  ;;  %3015 = vmatpush.bf16.msra.mxu1 %v2966_v23 }
 0x6cb   : > { %3016 = vmatpush.bf16.msra.mxu2 %v2966_v23  ;;  %3017 = vmatpush.bf16.msra.mxu3 %v2966_v23 }
 0x6ce   : > { %2193 = vmatpush.bf16.msra.mxu0 %v2965_v32  ;;  %3018 = vmatpush.bf16.msra.mxu1 %v2965_v32 }
 0x6cf   : > { %3019 = vmatpush.bf16.msra.mxu2 %v2965_v32  ;;  %3020 = vmatpush.bf16.msra.mxu3 %v2965_v32 }
 0x6d2   : > { %2194 = vmatpush.bf16.msra.mxu0 %v2964_v46  ;;  %3021 = vmatpush.bf16.msra.mxu1 %v2964_v46 }
 0x6d3   : > { %3022 = vmatpush.bf16.msra.mxu2 %v2964_v46  ;;  %3023 = vmatpush.bf16.msra.mxu3 %v2964_v46 }
 0x6d5   : > { %2195 = vmatmul.bf16.vlgmr.msra.gmra.mxu0 %v2960_v51  ;;  %2200 = vmatmul.bf16.vlgmr.msra.gmra.mxu1 %v2961_v35 }
 0x6d6   : > { %2205 = vmatmul.bf16.vlgmr.msra.gmra.mxu2 %v2962_v36  ;;  %2210 = vmatmul.bf16.vlgmr.msra.gmra.mxu3 %v2963_v5 }
 0x6d7   : > { %3596 = shalt.err (!%p3593_p4)
}
 0x6d8   : > { %s3814_s13 = smov 128   ;;  %s3815_s12 = smov 8  }
 0x6d9   : > { %3051 = dma.vmem_to_hbm [thread:$0]  (%p4860_p6), %s2268_s7, 1024, %s2270_s27, %s2230_s10, %s3814_s13, %s3814_s13, %s3815_s12  }
 0x6da   : > { %s2287_s2 = sshll.u32 %s2284_s28, 4  ;;  %s2285_s24 = sshll.u32 %s4229_s23, 4  ;;  %s2288_s2 = int_to_ptr.hbm [resolvable:$true] %s2287_s2  ;;  %s2286_s24 = int_to_ptr.vmem [resolvable:$true] %s2285_s24 }
 0x6db   : > { %s3611_s1 = sshra.s32 %s2288_s2, 4  ;;  %s3617_s16 = scalar_lea.hbm %s4859_s0, 256  ;;  %s3612_s1 = int_to_ptr.hbm [resolvable:$true] %s3611_s1 }
 0x6dc   : > { %s3613_s25 = scalar_lea.hbm %s3612_s1, 64  ;;  %p3618_p5 = scmp.lt.s32.totalorder %s3612_s1, %s4859_s0 }
 0x6dd   : > { %p3614_p11 = scmp.ne.s32.totalorder %s3612_s1, %s3613_s25  ;;  %p3619_p9 = scmp.lt.s32.totalorder %s3617_s16, %s3613_s25 }
 0x6df   : > { %p3615_p13 = pnand %p3614_p11, %p4860_p6  ;;  %p3620_p10 = por %p3619_p9, %p3618_p5 }
 0x6e1   : > { %p3616_p1 = pneg %p3615_p13 }
 0x6e3   : > { %p3621_p12 = pnand %p3620_p10, %p3616_p1 }
 0x6e5   : > { %3624 = shalt.err (!%p3621_p12)
}
 0x6e6   : > { %s4861_s28 = sld [smem:[#allocation34_spill]]  ;;  %s2972_s20 = sshll.u32 %s4855_s29, 4 }
 0x6e7   : > { %3052 = dma.vmem_to_hbm [thread:$0]  (%p4860_p6), %s2286_s24, 1024, %s2288_s2, %s2230_s10, %s3814_s13, %s3814_s13, %s3815_s12  }
 0x6e8   : > { %s4862_s27 = sld [smem:[#allocation60_spill]]  ;;  %s2249_s3 = sshll.u32 %s4225_s30, 4  ;;  %s2250_s3 = int_to_ptr.vmem [resolvable:$true] %s2249_s3 }
 0x6e9   : > { %s4865_s24 = sld [smem:[#allocation61_spill]] }
 0x6ea   : > { %s4867_s14 = sld [smem:[#allocation40_spill]] }
 0x6ec   : > { %s2246_s5 = sadd.s32 %s4861_s28, %s2972_s20 }
 0x6ed   : > { %s2891_s10 = sshll.u32 %s2246_s5, 3 }
 0x6ee   : > { %s4863_s9 = scalar_lea.vmem %s4862_s27, %s4219_s8  ;;  %s4864_s8 = sld [smem:[#allocation32_spill]] }
 0x6ef   : > { %v3298_v40 = vld [vmem:[%s4863_s9] ss:$0 sm:$0xff]  ;;  %s4866_s1 = smov %s4865_s24  ;;  %s2248_s25 = scalar_lea.hbm %s4865_s24, %s2891_s10 }
 0x6f0   : > { %s2251_s16 = sshll.u32 %s2248_s25, 4  ;;  %p4869_p0 = scmp.ne.s32.totalorder %s4867_s14, 0  ;;  %s2252_s16 = int_to_ptr.hbm [resolvable:$true] %s2251_s16 }
 0x6f1   : > { %s3639_s28 = sshra.s32 %s2252_s16, 4  ;;  %s3645_s9 = scalar_lea.hbm %s4866_s1, 512  ;;  %s3640_s28 = int_to_ptr.hbm [resolvable:$true] %s3639_s28 }
 0x6f2   : > { %s3641_s23 = scalar_lea.hbm %s3640_s28, 64  ;;  %p3646_p4 = scmp.lt.s32.totalorder %s3640_s28, %s4866_s1 }
 0x6f3   : > { %p3642_p6 = scmp.ne.s32.totalorder %s3640_s28, %s3641_s23  ;;  %p3647_p11 = scmp.lt.s32.totalorder %s3645_s9, %s3641_s23 }
 0x6f4   : > { %s4868_s19 = sand.u32 1, %s4864_s8  }
 0x6f5   : > { %s2225_s22 = scalar_lea.sflag [#allocation5], %s4868_s19  ;;  %p3643_p2 = pnand %p3642_p6, %p4869_p0 }
 0x6f6   : > { %p3648_p13 = por %p3647_p11, %p3646_p4 }
 0x6f7   : > { %p3644_p8 = pneg %p3643_p2 }
 0x6f9   : > { %p3649_p1 = pnand %p3648_p13, %p3644_p8 }
 0x752   : > { %v2196_v41 = vpop.f32.mrf.mxu0  ;;  %v2201_v44 = vpop.f32.mrf.mxu1 }
 0x753   : > { %v2197_v13 = vadd.f32 %v3298_v40, %v2196_v41  ;;  %v2202_v48 = vadd.f32 %v3298_v40, %v2201_v44 }
 0x755   : > { %2216 = vst [vmem:[%s4225_s30] sm:$0xff] %v2197_v13 }
 0x756   : > { %2218 = vst [vmem:[%s4225_s30 + $0x10] sm:$0xff] %v2202_v48 }
 0x759   : > { %v2206_v52 = vpop.f32.mrf.mxu2  ;;  %v2211_v53 = vpop.f32.mrf.mxu3 }
 0x75a   : > { %v2207_v54 = vadd.f32 %v3298_v40, %v2206_v52  ;;  %v2212_v55 = vadd.f32 %v3298_v40, %v2211_v53  ;;  %v2198_v57 = vpop.f32.mrf.mxu0  ;;  %v2203_v14 = vpop.f32.mrf.mxu1 }
 0x75b   : > { %v2199_v38 = vadd.f32 %v3298_v40, %v2198_v57  ;;  %v2204_v59 = vadd.f32 %v3298_v40, %v2203_v14 }
 0x75c   : > { %2220 = vst [vmem:[%s4225_s30 + $0x20] sm:$0xff] %v2207_v54 }
 0x75d   : > { %2222 = vst [vmem:[%s4225_s30 + $0x30] sm:$0xff] %v2212_v55 }
 0x75e   : > { %2217 = vst [vmem:[%s4225_s30 + $0x8] sm:$0xff] %v2199_v38 }
 0x75f   : > { %2219 = vst [vmem:[%s4225_s30 + $0x18] sm:$0xff] %v2204_v59 }
 0x761   : > { %v2208_v50 = vpop.f32.mrf.mxu2  ;;  %v2213_v58 = vpop.f32.mrf.mxu3 }
 0x762   : > { %v2209_v28 = vadd.f32 %v3298_v40, %v2208_v50  ;;  %v2214_v62 = vadd.f32 %v3298_v40, %v2213_v58 }
 0x764   : > { %2221 = vst [vmem:[%s4225_s30 + $0x28] sm:$0xff] %v2209_v28 }
 0x765   : > { %2223 = vst [vmem:[%s4225_s30 + $0x38] sm:$0xff] %v2214_v62 }
 0x766   : > { %3652 = shalt.err (!%p3649_p1)
}
 0x767   : > { %s3816_s30 = smov 256  }
 0x768   : > { %3050 = dma.vmem_to_hbm [thread:$0]  (%p4869_p0), %s2250_s3, 1024, %s2252_s16, %s2225_s22, %s3814_s13, %s3816_s30, %s3815_s12  }
 0x769 PF: > { %s4870_s10 = sld [smem:[#allocation31_spill]]  ;;  %p3104_p5 = scmp.ge.s32.totalorder %s3799_s26, 2 }
 0x76b   : > { %p3086_p9 = pnand %p3104_p5, %p4040_p7 }
 0x76d   : > { %p3087_p10 = pneg %p3086_p9 }
 0x76f   : > { %s2302_s29 = sand.u32 1, %s4870_s10  }
 0x770   : > { %s2303_s2 = scalar_lea.sflag [#allocation5], %s2302_s29 }
 0x771   : > { %3738 = dma.done.wait (%p3087_p10), %s2303_s2, 1024  }
 0x772   : > { %3740 = vsyncadd (%p3087_p10), %s2303_s2, 4294966272  ;;  %s4872_s24 = sadd.s32 4294967294, %s3799_s26   ;;  %p3089_p12 = pnand %p3104_p5, %p4044_p3 }
 0x773   : > { %s2312_s19 = sand.u32 1, %s4872_s24  }
 0x774   : > { %p3090_p6 = pneg %p3089_p12  ;;  %s2313_s13 = scalar_lea.sflag [#allocation20], %s2312_s19 }
 0x776   : > { %3742 = dma.done.wait (%p3090_p6), %s2313_s13, 2048  }
 0x777   : > { %3744 = vsyncadd (%p3090_p6), %s2313_s13, 4294965248  ;;  %s42_s26 = sadd.s32 1, %s3799_s26   ;;  %s4875_s29 = sld [smem:[#allocation32_spill]] }
 0x778   : > { %p4678_p0 = scmp.ge.s32.totalorder %s42_s26, 10   ;;  %s4876_s19 = sld [smem:[#allocation33_spill]] }
 0x779   : > { %s4877_s14 = sld [smem:[#allocation48_spill]]  ;;  %s4882_s30 = smov %s3755_s15 }
 0x77a   : > { %s4878_s22 = sld [smem:[#allocation36_spill]]  ;;  %s4883_s15 = smov %s4150_s4 }
 0x77b   : > { %s4879_s23 = sld [smem:[#allocation37_spill]]  ;;  %s4884_s16 = smov %s3763_s17 }
 0x77c   : > { %s4880_s24 = sld [smem:[#allocation46_spill]]  ;;  %s4885_s17 = smov %s3767_s18 }
 0x77d   : > { %s4881_s25 = sld [smem:[#allocation47_spill]]  ;;  %s4886_s18 = smov %s4137_s11 }
 0x77e   : > { %s4887_s20 = smov %s3779_s21  ;;  %41 = sbr.rel (!%p4678_p0) target bundleno = 34 (0x22), region = 216 }
 0x77f   : > { %s4888_s21 = smov %s4877_s14 }
 0x783   :  { %2329 = vsyncpa [#allocation4], 1 }
 0x784   :  { %2331 = vsyncpa [#allocation4 + $0x1], 1 }
 0x785   :  { %2332 = vsyncpa [#allocation7], 1 }
 0x786   :  { %2334 = vsyncpa [#allocation7 + $0x1], 1 }
 0x787   :  { %2335 = vsyncpa [#allocation10], 1 }
 0x788   :  { %2337 = vsyncpa [#allocation10 + $0x1], 1 }
 0x789   :  { %2338 = vsyncpa [#allocation13], 1 }
 0x78a   :  { %2339 = vsyncpa [#allocation16], 1 }
 0x78b   :  { %2340 = vsyncpa [#allocation5], 1 }
 0x78c   :  { %2342 = vsyncpa [#allocation5 + $0x1], 1 }
 0x78d   :  { %2343 = vsyncpa [#allocation20], 1 }
 0x78e   :  { %2345 = vsyncpa [#allocation20 + $0x1], 1 }

// kernel: tpu_custom_call.1
= control target key start
LH: loop header
LB: loop body
LE: loop exit
PB: predicated region body
PF: predicated region fallthrough
CT: control target
= control target key end

     0   :  { %s4725_s0 = inlined_call_operand.hbm [shape: bf16[8,32,128], index: 0, kind: input, shape index: {}]   ;;  %s4726_s1 = inlined_call_operand.hbm [shape: bf16[8,32,128], index: 1, kind: input, shape index: {}]   ;;  %s4727_s2 = inlined_call_operand.hbm [shape: s32[8,1,32], index: 2, kind: input, shape index: {}]   ;;  %s4728_s3 = inlined_call_operand.hbm [shape: s32[8,1,32], index: 3, kind: input, shape index: {}]   ;;  %s4729_s4 = inlined_call_operand.hbm [shape: bf16[128,384], index: 4, kind: input, shape index: {}]   ;;  %s4730_s5 = inlined_call_operand.vmem [shape: f32[1,384], index: 5, kind: input, shape index: {}]   ;;  %s4731_s6 = inlined_call_operand.hbm [shape: bf16[128,128], index: 6, kind: input, shape index: {}]   ;;  %s4732_s7 = inlined_call_operand.hbm [shape: f32[1,128], index: 7, kind: input, shape index: {}]   ;;  %s4733_s8 = inlined_call_operand.hbm [shape: bf16[128,256], index: 8, kind: input, shape index: {}]   ;;  %s4734_s9 = inlined_call_operand.vmem [shape: f32[1,256], index: 9, kind: input, shape index: {}]   ;;  %s4735_s10 = inlined_call_operand.hbm [shape: bf16[128,256], index: 10, kind: input, shape index: {}]   ;;  %s4736_s11 = inlined_call_operand.vmem [shape: f32[1,256], index: 11, kind: input, shape index: {}]   ;;  %s4737_s12 = inlined_call_operand.hbm [shape: f32[8,32,256], index: 12, kind: output, shape index: {0}]   ;;  %s4738_s13 = inlined_call_operand.hbm [shape: f32[8,32,32], index: 13, kind: output, shape index: {1}]   ;;  %s4739_s14 = inlined_call_operand.hbm [shape: f32[8,32,32], index: 14, kind: output, shape index: {2}]  }
   0x1   :  { %4777 = sst [smem:[#allocation49_spill]] %s4725_s0 }
   0x2   :  { %4778 = sst [smem:[#allocation50_spill]] %s4726_s1 }
   0x3   :  { %4779 = sst [smem:[#allocation51_spill]] %s4727_s2 }
   0x4   :  { %4780 = sst [smem:[#allocation52_spill]] %s4728_s3 }
   0x5   :  { %4781 = sst [smem:[#allocation53_spill]] %s4729_s4 }
   0x6   :  { %4782 = sst [smem:[#allocation54_spill]] %s4730_s5 }
   0x7   :  { %4783 = sst [smem:[#allocation55_spill]] %s4731_s6 }
   0x8   :  { %4784 = sst [smem:[#allocation56_spill]] %s4732_s7 }
   0x9   :  { %4785 = sst [smem:[#allocation57_spill]] %s4733_s8 }
   0xa   :  { %4786 = sst [smem:[#allocation58_spill]] %s4734_s9 }
   0xb   :  { %4787 = sst [smem:[#allocation59_spill]] %s4735_s10 }
   0xc   :  { %4788 = sst [smem:[#allocation60_spill]] %s4736_s11 }
   0xd   :  { %4789 = sst [smem:[#allocation61_spill]] %s4737_s12 }
   0xe   :  { %4790 = sst [smem:[#allocation62_spill]] %s4738_s13 }
   0xf   :  { %4791 = sst [smem:[#allocation63_spill]] %s4739_s14 }
  0x10   :  { %20 = vsyncpa [#allocation4], 0 }
  0x11   :  { %22 = vsyncpa [#allocation4 + $0x1], 0 }
  0x12   :  { %23 = vsyncpa [#allocation7], 0 }
  0x13   :  { %25 = vsyncpa [#allocation7 + $0x1], 0 }
  0x14   :  { %26 = vsyncpa [#allocation10], 0 }
  0x15   :  { %28 = vsyncpa [#allocation10 + $0x1], 0 }
  0x16   :  { %29 = vsyncpa [#allocation13], 0 }
  0x17   :  { %30 = vsyncpa [#allocation16], 0 }
  0x18   :  { %31 = vsyncpa [#allocation5], 0 }
  0x19   :  { %33 = vsyncpa [#allocation5 + $0x1], 0 }
  0x1a   :  { %34 = vsyncpa [#allocation20], 0 }
  0x1b   :  { %36 = vsyncpa [#allocation20 + $0x1], 0  ;;  %s3892_s29 = smov 0   ;;  %s3894_s30 = smov 0  }
  0x1c   :  { %s3896_s15 = smov 0   ;;  %s3898_s16 = smov 0  }
  0x1d   :  { %s3900_s17 = smov 0   ;;  %s3902_s18 = smov 0  }
  0x1e   :  { %s3904_s19 = smov 0   ;;  %s3906_s20 = smov 0  }
  0x1f   :  { %s3908_s21 = smov 0   ;;  %s3910_s22 = smov 0  }
  0x20   :  { %s3912_s23 = smov 0   ;;  %s3914_s24 = smov 0  }
  0x21   :  { %s3916_s25 = smov 0   ;;  %s3918_s26 = smov 0  }
  0x22 LB: > { %4792 = sst [smem:[#allocation31_spill]] %s3747_s29  ;;  %s3961_s27 = sadd.s32 4294967295, %s3799_s26   ;;  %s3799_s26 = sphi %s3918_s26, %s42_s26   ;;  %s3795_s25 = sphi %s3916_s25, %s4881_s25   ;;  %s3791_s24 = sphi %s3914_s24, %s4880_s24   ;;  %s3787_s23 = sphi %s3912_s23, %s4879_s23   ;;  %s3783_s22 = sphi %s3910_s22, %s4878_s22   ;;  %s3779_s21 = sphi %s3908_s21, %s4888_s21   ;;  %s3775_s20 = sphi %s3906_s20, %s4887_s20   ;;  %s3771_s19 = sphi %s3904_s19, %s4876_s19   ;;  %s3767_s18 = sphi %s3902_s18, %s4886_s18   ;;  %s3763_s17 = sphi %s3900_s17, %s4885_s17   ;;  %s3759_s16 = sphi %s3898_s16, %s4884_s16   ;;  %s3755_s15 = sphi %s3896_s15, %s4883_s15   ;;  %s3751_s30 = sphi %s3894_s30, %s4882_s30   ;;  %s3747_s29 = sphi %s3892_s29, %s4875_s29  }
  0x23   : > { %4793 = sst [smem:[#allocation32_spill]] %s3751_s30  ;;  %p304_p0 = scmp.ne.s32.totalorder %s3763_s17, %s3759_s16 }
  0x24   : > { %4794 = sst [smem:[#allocation33_spill]] %s3775_s20  ;;  %p75_p1 = scmp.eq.s32.totalorder %s3961_s27, 0 }
  0x25   : > { %4795 = sst [smem:[#allocation34_spill]] %s3783_s22  ;;  %p355_p2 = scmp.ne.s32.totalorder %s3755_s15, %s3751_s30 }
  0x26   : > { %4796 = sst [smem:[#allocation35_spill]] %s3787_s23  ;;  %p356_p3 = scmp.eq.s32.totalorder %s3961_s27, 7 }
  0x27   : > { %4797 = sst [smem:[#allocation36_spill]] %s3791_s24  ;;  %p361_p4 = scmp.ne.s32.totalorder %s3751_s30, %s3747_s29 }
  0x28   : > { %4798 = sst [smem:[#allocation37_spill]] %s3795_s25  ;;  %p3972_p5 = por %p304_p0, %p75_p1 }
  0x29   : > { %4799 = sst [smem:[#allocation38_spill]] %s3961_s27  ;;  %p2572_p6 = scmp.ge.s32.totalorder %s3799_s26, 1 }
  0x2a   : > { %s4800_s28 = scalar_select %p3972_p5, 1, 0 }
  0x2b   : > { %p3979_p7 = por %p356_p3, %p355_p2  ;;  %p421_p8 = scmp.lt.s32.totalorder %s3799_s26, 9 }
  0x2c   : > { %4801 = sst [smem:[#allocation39_spill]] %s4800_s28  ;;  %s3801_s9 = smov [#allocation11]  }
  0x2d   : > { %s4802_s12 = scalar_select %p3979_p7, 1, 0 }
  0x2e   : > { %s4804_s4 = sld [smem:[#allocation53_spill]]  ;;  %p3987_p9 = pnand %p2572_p6, %p421_p8 }
  0x2f   : > { %4803 = sst [smem:[#allocation40_spill]] %s4802_s12  ;;  %s434_s5 = sshll.u32 %s3801_s9, 4  ;;  %s435_s5 = int_to_ptr.vmem [resolvable:$true] %s434_s5 }
  0x30   : > { %s4805_s23 = scalar_select %p3987_p9, 1, 0 }
  0x31   : > { %p3056_p10 = pneg %p3987_p9  ;;  %s4808_s6 = sld [smem:[#allocation55_spill]] }
  0x32   : > { %4806 = sst [smem:[#allocation41_spill]] %s4805_s23  ;;  %s3802_s9 = smov 192  }
  0x33   : > { %p3995_p11 = pnand %p3056_p10, %p75_p1  ;;  %s3803_s11 = smov 12  }
  0x34   : > { %s432_s16 = sshll.u32 %s4804_s4, 4  ;;  %s3804_s22 = smov [#allocation12]   ;;  %s433_s16 = int_to_ptr.hbm [resolvable:$true] %s432_s16 }
  0x35   : > { %3059 = dma.hbm_to_vmem [thread:$0]  (!%p3995_p11), %s433_s16, 3072, %s435_s5, [#allocation10], %s3802_s9, %s3802_s9, %s3803_s11  }
  0x36   : > { %s451_s28 = sshll.u32 %s3804_s22, 4  ;;  %s4753_s4 = smov 64   ;;  %s452_s28 = int_to_ptr.vmem [resolvable:$true] %s451_s28 }
  0x37   : > { %s449_s12 = sshll.u32 %s4808_s6, 4  ;;  %s4755_s14 = smov 4   ;;  %s450_s12 = int_to_ptr.hbm [resolvable:$true] %s449_s12 }
  0x38   : > { %3062 = dma.hbm_to_vmem [thread:$0]  (!%p3995_p11), %s450_s12, 1024, %s452_s28, [#allocation13], %s4753_s4, %s4753_s4, %s4755_s14  }
  0x39   : > { %s4752_s6 = sadd.s32 4294967294, %s3799_s26   ;;  %p68_p12 = scmp.ne.s32.totalorder %s3779_s21, %s3775_s20 }
  0x3a   : > { %p69_p13 = scmp.eq.s32.totalorder %s3799_s26, 0  ;;  %p74_p0 = scmp.ne.s32.totalorder %s3775_s20, %s3771_s19 }
  0x3b   : > { %p362_p2 = scmp.eq.s32.totalorder %s4752_s6, 7  ;;  %p4021_p6 = por %p356_p3, %p68_p12 }
  0x3c   : > { %p4027_p8 = por %p69_p13, %p68_p12  ;;  %p4033_p10 = por %p75_p1, %p74_p0 }
  0x3d   : > { %s4809_s11 = scalar_select %p4021_p6, 1, 0 }
  0x3e   : > { %s4812_s12 = scalar_select %p4033_p10, 1, 0 }
  0x3f   : > { %4810 = sst [smem:[#allocation42_spill]] %s4809_s11  ;;  %p4040_p7 = por %p362_p2, %p361_p4 }
  0x40   : > { %4813 = sst [smem:[#allocation43_spill]] %s4812_s12  ;;  %p4044_p3 = por %p362_p2, %p74_p0 }
  0x41   : > { %s4814_s19 = scalar_select %p4040_p7, 1, 0 }
  0x42   : > { %s4816_s28 = scalar_select %p4044_p3, 1, 0 }
  0x43   : > { %4815 = sst [smem:[#allocation44_spill]] %s4814_s19  ;;  %p3099_p6 = scmp.lt.s32.totalorder %s3799_s26, 8 }
  0x44   : > { %4817 = sst [smem:[#allocation45_spill]] %s4816_s28  ;;  %s4050_s16 = sand.u32 1, %s3799_s26  }
  0x45   : > { %s496_s9 = sand.u32 1, %s3779_s21   ;;  %s2901_s5 = sshll.u32 %s3795_s25, 5 }
  0x46   : > { %s2578_s6 = sshll.u32 %s496_s9, 5  ;;  %s4818_s0 = sld [smem:[#allocation49_spill]] }
  0x47   : > { %s498_s19 = scalar_lea.vmem [#allocation3], %s2578_s6  ;;  %p4061_p4 = pnand %p3099_p6, %p4027_p8 }
  0x48   : > { %s507_s11 = sshll.u32 %s498_s19, 4  ;;  %s4065_s30 = sshll.u32 %s496_s9, 1  ;;  %s508_s11 = int_to_ptr.vmem [resolvable:$true] %s507_s11 }
  0x49   : > { %s4820_s1 = sld [smem:[#allocation50_spill]]  ;;  %s4821_s19 = smov 4  }
  0x4a   : > { %s521_s20 = scalar_lea.vmem [#allocation6], %s2578_s6  ;;  %s4770_s9 = scalar_lea.sflag [#allocation7], %s4050_s16 }
  0x4b   : > { %s530_s27 = sshll.u32 %s521_s20, 4  ;;  %s4823_s7 = sld [smem:[#allocation56_spill]]  ;;  %s531_s27 = int_to_ptr.vmem [resolvable:$true] %s530_s27 }
  0x4c   : > { %s504_s14 = scalar_lea.hbm %s4818_s0, %s2901_s5  ;;  %s4822_s0 = smov 64  }
  0x4d   : > { %s505_s29 = sshll.u32 %s504_s14, 4  ;;  %s4769_s14 = scalar_lea.sflag [#allocation4], %s4050_s16  ;;  %s506_s29 = int_to_ptr.hbm [resolvable:$true] %s505_s29 }
  0x4e   : > { %3072 = dma.hbm_to_vmem [thread:$0]  (!%p4061_p4), %s506_s29, 512, %s508_s11, %s4769_s14, %s4822_s0, %s4822_s0, %s4821_s19  }
  0x4f   : > { %s527_s4 = scalar_lea.hbm %s4820_s1, %s2901_s5  ;;  %s3807_s29 = smov [#allocation14]  }
  0x50   : > { %s528_s22 = sshll.u32 %s527_s4, 4  ;;  %s466_s6 = sshll.u32 %s3807_s29, 4  ;;  %s529_s22 = int_to_ptr.hbm [resolvable:$true] %s528_s22  ;;  %s467_s6 = int_to_ptr.vmem [resolvable:$true] %s466_s6 }
  0x51   : > { %3075 = dma.hbm_to_vmem [thread:$0]  (!%p4061_p4), %s529_s22, 512, %s531_s27, %s4770_s9, %s4822_s0, %s4822_s0, %s4821_s19  }
  0x52   : > { %s464_s23 = sshll.u32 %s4823_s7, 4  ;;  %s4824_s8 = sld [smem:[#allocation57_spill]]  ;;  %s465_s23 = int_to_ptr.hbm [resolvable:$true] %s464_s23 }
  0x53   : > { %3065 = dma.hbm_to_vmem [thread:$0]  (!%p3995_p11), %s465_s23, 16, %s467_s6, [#allocation13]  }
  0x54   : > { %s3808_s14 = smov [#allocation15]   ;;  %s4771_s22 = smov 128  }
  0x55   : > { %s477_s27 = sshll.u32 %s3808_s14, 4  ;;  %s3810_s5 = smov 8   ;;  %s478_s27 = int_to_ptr.vmem [resolvable:$true] %s477_s27 }
  0x56   : > { %s2587_s12 = sshll.u32 %s3795_s25, 1  ;;  %s4825_s2 = sld [smem:[#allocation51_spill]] }
  0x57   : > { %s544_s23 = scalar_lea.vmem [#allocation8], %s4065_s30  ;;  %s3811_s13 = smov 16  }
  0x58   : > { %s475_s4 = sshll.u32 %s4824_s8, 4  ;;  %s551_s6 = sshll.u32 %s544_s23, 4  ;;  %s476_s4 = int_to_ptr.hbm [resolvable:$true] %s475_s4  ;;  %s552_s6 = int_to_ptr.vmem [resolvable:$true] %s551_s6 }
  0x59   : > { %3068 = dma.hbm_to_vmem [thread:$0]  (!%p3995_p11), %s476_s4, 2048, %s478_s27, [#allocation16], %s4771_s22, %s4771_s22, %s3810_s5  }
  0x5a   : > { %s3812_s11 = smov 1   ;;  %s4826_s4 = scalar_lea.sflag [#allocation7], %s4050_s16 }
  0x5b   : > { %s4827_s3 = sld [smem:[#allocation52_spill]]  ;;  %s562_s22 = scalar_lea.sflag [#allocation10], %s4050_s16 }
  0x5c   : > { %s548_s20 = scalar_lea.hbm %s4825_s2, %s2587_s12  ;;  %s51_s1 = sadd.s32 1, %s3791_s24 }
  0x5d   : > { %s549_s14 = sshll.u32 %s548_s20, 4  ;;  %s565_s20 = scalar_lea.vmem [#allocation9], %s4065_s30  ;;  %s550_s14 = int_to_ptr.hbm [resolvable:$true] %s549_s14 }
  0x5e   : > { %3078 = dma.hbm_to_vmem [thread:$0]  (!%p4061_p4), %s550_s14, 32, %s552_s6, %s4826_s4, %s3811_s13, %s3811_s13, %s3812_s11  }
  0x5f   : > { %s572_s23 = sshll.u32 %s565_s20, 4  ;;  %s291_s6 = sadd.s32 1, %s3767_s18  ;;  %s573_s23 = int_to_ptr.vmem [resolvable:$true] %s572_s23 }
  0x60   : > { %p52_p11 = scmp.ge.s32.totalorder %s51_s1, 2  ;;  %p298_p12 = scmp.ne.s32.totalorder %s3767_s18, %s3763_s17 }
  0x61   : > { %s569_s5 = scalar_lea.hbm %s4827_s3, %s2587_s12  ;;  %s345_s14 = sadd.s32 1, %s3755_s15 }
  0x62   : > { %s570_s29 = sshll.u32 %s569_s5, 4  ;;  %s584_s4 = sand.u32 1, %s3767_s18   ;;  %s571_s29 = int_to_ptr.hbm [resolvable:$true] %s570_s29 }
  0x63   : > { %3081 = dma.hbm_to_vmem [thread:$0]  (!%p4061_p4), %s571_s29, 32, %s573_s23, %s562_s22, %s3811_s13, %s3811_s13, %s3812_s11  }
  0x64   : > { %s4890_s1 = smov (%p52_p11, %s51_s1), 0  ;;  %s4829_s30 = sadd.s32 1, %s3795_s25 }
  0x65   : > { %4828 = sst [smem:[#allocation46_spill]] %s4890_s1  ;;  %s4892_s30 = smov (!%p52_p11, %s4829_s30), %s3795_s25 }
  0x66   : > { %s288_s12 = ssub.s32 %s3791_s24, %s4890_s1  ;;  %p4129_p0 = por %p298_p12, %p69_p13 }
  0x67   : > { %p56_p2 = scmp.ge.s32.totalorder %s4892_s30, 4  ;;  %p289_p8 = scmp.eq.s32.totalorder %s288_s12, 0 }
  0x68   : > { %s2590_s22 = sshll.u32 %s584_s4, 6  ;;  %s2591_s13 = sshll.u32 %s3791_s24, 2 }
  0x69   : > { %s4894_s30 = smov (%p56_p2, %s4892_s30), 0  ;;  %s4832_s10 = sld [smem:[#allocation59_spill]] }
  0x6a   : > { %4831 = sst [smem:[#allocation47_spill]] %s4894_s30  ;;  %s58_s9 = ssub.s32 %s3795_s25, %s4894_s30 }
  0x6b   : > { %s4137_s11 = scalar_select %p289_p8, %s3767_s18, %s291_s6  }
  0x6c   : > { %p59_p4 = scmp.eq.s32.totalorder %s58_s9, 0  ;;  %s342_s27 = sor.u32 %s288_s12, %s58_s9 }
  0x6d   : > { %p343_p11 = scmp.eq.s32.totalorder %s342_s27, 0  ;;  %s4833_s23 = sadd.s32 1, %s3779_s21 }
  0x6e   : > { %s4147_s2 = scalar_select %p59_p4, %s3779_s21, %s4833_s23  }
  0x6f   : > { %s590_s20 = scalar_lea.hbm %s4832_s10, %s2591_s13  ;;  %s586_s7 = scalar_lea.vmem [#allocation17], %s2590_s22 }
  0x70   : > { %4834 = sst [smem:[#allocation48_spill]] %s4147_s2  ;;  %s591_s3 = sshll.u32 %s590_s20, 4  ;;  %s592_s3 = int_to_ptr.hbm [resolvable:$true] %s591_s3 }
  0x71   : > { %s4150_s4 = scalar_select %p343_p11, %s3755_s15, %s345_s14  }
  0x72   : > { %s593_s8 = sshll.u32 %s586_s7, 4  ;;  %p3082_p13 = pnand %p3099_p6, %p4129_p0  ;;  %s594_s8 = int_to_ptr.vmem [resolvable:$true] %s593_s8 }
  0x73   : > { %s4835_s6 = smov 128   ;;  %s4836_s12 = scalar_lea.sflag [#allocation4], %s4050_s16 }
  0x74   : > { %3084 = dma.hbm_to_vmem [thread:$0]  (!%p3082_p13), %s592_s3, 1024, %s594_s8, %s4836_s12, %s4835_s6, %s4822_s0, %s4821_s19  }
  0x75   : > { %611 = sbr.rel (%p3987_p9) target bundleno = 1897 (0x769), region = 68  ;;  %s4838_s13 = sld [smem:[#allocation38_spill]] (!%p3987_p9) }
  0x76   : > { %s4839_s27 = sld [smem:[#allocation33_spill]] (!%p3987_p9) }
  0x7b   : > { %s4164_s5 = sand.u32 1, %s4838_s13  }
  0x7c   : > { %s4167_s7 = sand.u32 1, %s4839_s27   ;;  %s614_s22 = scalar_lea.sflag [#allocation4], %s4164_s5 }
  0x7d   : > { %s2593_s28 = sshll.u32 %s4167_s7, 5 }
  0x7e   : > { %s4171_s29 = scalar_lea.vmem [#allocation3], %s2593_s28 }
  0x7f   : > { %3710 = dma.done.wait (%p4033_p10), %s614_s22, 512  }
  0x80   : > { %3712 = vsyncadd (%p4033_p10), %s614_s22, 4294966784  ;;  %s624_s0 = scalar_lea.sflag [#allocation7], %s4164_s5  ;;  %s4178_s3 = scalar_lea.vmem [#allocation6], %s2593_s28 }
  0x81   : > { %3714 = dma.done.wait (%p4033_p10), %s624_s0, 544  }
  0x82   : > { %3716 = vsyncadd (%p4033_p10), %s624_s0, 4294966752  ;;  %s2595_s8 = sshll.u32 %s4167_s7, 1  ;;  %s644_s19 = scalar_lea.sflag [#allocation10], %s4164_s5 }
  0x83   : > { %s4185_s16 = scalar_lea.vmem [#allocation8], %s2595_s8  ;;  %s4188_s20 = scalar_lea.vmem [#allocation9], %s2595_s8 }
  0x84   : > { %3718 = dma.done.wait (%p4033_p10), %s644_s19, 32  }
  0x85   : > { %3720 = vsyncadd (%p4033_p10), %s644_s19, 4294967264 }
  0x86   : > { %3722 = dma.done.wait (%p75_p1), [#allocation10], 3072  }
  0x87   : > { %3724 = vsyncadd (%p75_p1), [#allocation10], 4294964224 }
  0x88   : > { %3726 = dma.done.wait (%p75_p1), [#allocation13], 1040  }
  0x89   : > { %3728 = vsyncadd (%p75_p1), [#allocation13], 4294966256 }
  0x8a   : > { %3730 = dma.done.wait (%p75_p1), [#allocation16], 2048  }
  0x8b   : > { %3732 = vsyncadd (%p75_p1), [#allocation16], 4294965248  ;;  %s675_s6 = sand.u32 1, %s3763_s17  }
  0x8c   : > { %s2601_s12 = sshll.u32 %s675_s6, 6 }
  0x8d   : > { %s4207_s9 = scalar_lea.vmem [#allocation17], %s2601_s12 }
  0x8e   : > { %3734 = dma.done.wait (%p3972_p5), %s614_s22, 1024  }
  0x8f   : > { %3736 = vsyncadd (%p3972_p5), %s614_s22, 4294966272  ;;  %s4842_s27 = sld [smem:[#allocation32_spill]]  ;;  %s2603_s0 = sshll.u32 %s4167_s7, 6 }
  0x90   : > { %s4843_s14 = sld [smem:[#allocation34_spill]]  ;;  %s4227_s22 = scalar_lea.vmem [#allocation19], %s2603_s0 }
  0x91   : > { %s4229_s23 = scalar_lea.vmem [#allocation21], %s2603_s0 }
  0x95   : > { %s4773_s28 = sand.u32 1, %s4842_s27  }
  0x96   : > { %s2602_s13 = sshll.u32 %s4773_s28, 6  ;;  %p760_p1 = scmp.lt.s32.totalorder %s4843_s14, 1 }
  0x97   : > { %s4225_s30 = scalar_lea.vmem [#allocation18], %s2602_s13  ;;  %p2605_p5 = scmp.ne.s32.totalorder %s4843_s14, 0 }
  0x98   : > { %s4219_s8 = scalar_select %p760_p1, %s4843_s14, 1 }
  0x99   : > { %770 = sbr.rel (%p2605_p5) target bundleno = 1717 (0x6b5), region = 108  ;;  %s4845_s14 = sld [smem:[#allocation54_spill]] (!%p2605_p5) }
  0x9a   : > { %s4850_s0 = sld [smem:[#allocation58_spill]] (!%p2605_p5) }
  0x9e   : > { %v2929_v0 = vld [vmem:[#allocation11 + $0xac] sm:$0xf]  ;;  %v2710_v1 = vld [vmem:[#allocation11 + $0xb4] sm:$0xf0]  ;;  %v2926_v2 = vld [vmem:[#allocation11 + $0x94] sm:$0xf] }
  0x9f   : > { %v2713_v3 = vor.u32 %v2929_v0, %v2710_v1  ;;  %v2698_v4 = vld [vmem:[#allocation11 + $0x9c] sm:$0xf0]  ;;  %v2923_v6 = vld [vmem:[#allocation11 + $0x7c] sm:$0xf]  ;;  %v2686_v7 = vld [vmem:[#allocation11 + $0x84] sm:$0xf0] }
  0xa0   : > { %v2701_v5 = vor.u32 %v2926_v2, %v2698_v4  ;;  %v2708_v8 = vld [vmem:[#allocation11 + $0xa8] sm:$0xf]  ;;  %v2930_v9 = vld [vmem:[#allocation11 + $0xb0] sm:$0xf0]  ;;  %v2696_v11 = vld [vmem:[#allocation11 + $0x90] sm:$0xf]  ;;  %v2689_v13 = vor.u32 %v2923_v6, %v2686_v7 }
  0xa1   : > { %1008 = vmatpush.bf16.msra.mxu1 %v2713_v3  ;;  %v2709_v10 = vor.u32 %v2930_v9, %v2708_v8  ;;  %v2927_v12 = vld [vmem:[#allocation11 + $0x98] sm:$0xf0]  ;;  %v2920_v14 = vld [vmem:[#allocation11 + $0x64] sm:$0xf]  ;;  %v2674_v16 = vld [vmem:[#allocation11 + $0x6c] sm:$0xf0] }
  0xa2   : > { %v2697_v15 = vor.u32 %v2927_v12, %v2696_v11  ;;  %v2684_v17 = vld [vmem:[#allocation11 + $0x78] sm:$0xf]  ;;  %v2924_v18 = vld [vmem:[#allocation11 + $0x80] sm:$0xf0]  ;;  %v2677_v19 = vor.u32 %v2920_v14, %v2674_v16  ;;  %v2917_v20 = vld [vmem:[#allocation11 + $0x4c] sm:$0xf] }
  0xa3   : > { %979 = vmatpush.bf16.msra.mxu0 %v2709_v10  ;;  %v2685_v21 = vor.u32 %v2924_v18, %v2684_v17  ;;  %v2662_v22 = vld [vmem:[#allocation11 + $0x54] sm:$0xf0]  ;;  %v2672_v23 = vld [vmem:[#allocation11 + $0x60] sm:$0xf]  ;;  %v2921_v24 = vld [vmem:[#allocation11 + $0x68] sm:$0xf0] }
  0xa4   : > { %v2665_v25 = vor.u32 %v2917_v20, %v2662_v22  ;;  %v2914_v26 = vld [vmem:[#allocation11 + $0x34] sm:$0xf]  ;;  %v2673_v27 = vor.u32 %v2921_v24, %v2672_v23  ;;  %v2650_v28 = vld [vmem:[#allocation11 + $0x3c] sm:$0xf0]  ;;  %v2660_v29 = vld [vmem:[#allocation11 + $0x48] sm:$0xf] }
  0xa5   : > { %1009 = vmatpush.bf16.msra.mxu1 %v2701_v5  ;;  %v2918_v30 = vld [vmem:[#allocation11 + $0x50] sm:$0xf0]  ;;  %v2653_v31 = vor.u32 %v2914_v26, %v2650_v28  ;;  %v2911_v32 = vld [vmem:[#allocation11 + $0x1c] sm:$0xf]  ;;  %v2638_v34 = vld [vmem:[#allocation11 + $0x24] sm:$0xf0] }
  0xa6   : > { %v2661_v33 = vor.u32 %v2918_v30, %v2660_v29  ;;  %v2648_v35 = vld [vmem:[#allocation11 + $0x30] sm:$0xf]  ;;  %v2915_v36 = vld [vmem:[#allocation11 + $0x38] sm:$0xf0]  ;;  %v2641_v37 = vor.u32 %v2911_v32, %v2638_v34  ;;  %v2908_v38 = vld [vmem:[#allocation11 + $0x4] sm:$0xf] }
  0xa7   : > { %980 = vmatpush.bf16.msra.mxu0 %v2697_v15  ;;  %v2649_v39 = vor.u32 %v2915_v36, %v2648_v35  ;;  %v2626_v40 = vld [vmem:[#allocation11 + $0xc] sm:$0xf0]  ;;  %v2636_v41 = vld [vmem:[#allocation11 + $0x18] sm:$0xf]  ;;  %v2912_v42 = vld [vmem:[#allocation11 + $0x20] sm:$0xf0] }
  0xa8   : > { %v2629_v43 = vor.u32 %v2908_v38, %v2626_v40  ;;  %v2637_v44 = vor.u32 %v2912_v42, %v2636_v41  ;;  %v2624_v45 = vld [vmem:[#allocation11] sm:$0xf]  ;;  %v2909_v46 = vld [vmem:[#allocation11 + $0x8] sm:$0xf0]  ;;  %v4233_v47 = vld [vmem:[%s4171_s29] sm:$0xff]  ;;  %vm1229_vm4 = vcmask 261120  }
  0xa9   : > { %1010 = vmatpush.bf16.msra.mxu1 %v2689_v13  ;;  %v2625_v48 = vor.u32 %v2909_v46, %v2624_v45  ;;  %v4238_v49 = vld [vmem:[%s4171_s29 + $0x8] sm:$0xff]  ;;  %v4243_v50 = vld [vmem:[%s4171_s29 + $0x10] sm:$0xff]  ;;  %v4248_v51 = vld [vmem:[%s4171_s29 + $0x18] sm:$0xff] }
  0xaa   : > { %v4255_v56 = vld [vmem:[%s4845_s14] sm:$0x7] }
  0xab   : > { %981 = vmatpush.bf16.msra.mxu0 %v2685_v21  ;;  %v822_v58 = vperm.slane %v4255_v56, 1  ;;  %v4259_v0 = vperm.slane %v4255_v56, 0 }
  0xad   : > { %1011 = vmatpush.bf16.msra.mxu1 %v2677_v19 }
  0xaf   : > { %982 = vmatpush.bf16.msra.mxu0 %v2673_v27 }
  0xb1   : > { %1012 = vmatpush.bf16.msra.mxu1 %v2665_v25 }
  0xb3   : > { %983 = vmatpush.bf16.msra.mxu0 %v2661_v33 }
  0xb5   : > { %1013 = vmatpush.bf16.msra.mxu1 %v2653_v31 }
  0xb7   : > { %984 = vmatpush.bf16.msra.mxu0 %v2649_v39 }
  0xb9   : > { %1014 = vmatpush.bf16.msra.mxu1 %v2641_v37 }
  0xbb   : > { %985 = vmatpush.bf16.msra.mxu0 %v2637_v44 }
  0xbd   : > { %1015 = vmatpush.bf16.msra.mxu1 %v2629_v43 }
  0xbf   : > { %986 = vmatpush.bf16.msra.mxu0 %v2625_v48 }
  0xc0   : > { %1016 = vmatmul.bf16.vlgmr.msra.gmra.mxu1 %v4233_v47 }
  0xc2   : > { %987 = vmatmul.bf16.vlgmr.msra.gmra.mxu0 %v4233_v47 }
  0xd0   : > { %1021 = vmatmul.bf16.gmra.mxu1 %v4238_v49 }
  0xd2   : > { %992 = vmatmul.bf16.gmra.mxu0 %v4238_v49 }
  0xe0   : > { %1026 = vmatmul.bf16.gmra.mxu1 %v4243_v50 }
  0xe2   : > { %997 = vmatmul.bf16.gmra.mxu0 %v4243_v50 }
  0xf0   : > { %1031 = vmatmul.bf16.gmra.mxu1 %v4248_v51 }
  0xf2   : > { %1002 = vmatmul.bf16.gmra.mxu0 %v4248_v51 }
 0x13d   : > { %v1017_v52 = vpop.f32.mrf.mxu1 }
 0x13e   : > { %v1018_v3 = vadd.f32 %v1017_v52, %v822_v58 }
 0x13f   : > { %v988_v53 = vpop.f32.mrf.mxu0 }
 0x140   : > { %v989_v6 = vadd.f32 %v988_v53, %v4259_v0  ;;  %v1082_v11 = vpack.c.bf16 %v1018_v3, %v1018_v3 }
 0x142   : > { %v1066_v13 = vmul.f32 0.088388346, %v989_v6  ;;  %v1114_v16 = vunpack.c.l.b16 %v1082_v11 }
 0x144   : > { %v1074_v17 = vpack.c.bf16 %v1066_v13, %v1066_v13  ;;  %v1195_v13 = vld [vmem:[%s4185_s16] sm:$0x1] }
 0x145   : > { %v1019_v54 = vpop.f32.mrf.mxu1  ;;  %vm1197_vm0 = vcmp.gt.s32.totalorder %v1195_v13, 0 }
 0x146   : > { %v1020_v1 = vadd.f32 %v1019_v54, %v822_v58  ;;  %v1102_v21 = vunpack.c.l.b16 %v1074_v17 }
 0x147   : > { %v990_v55 = vpop.f32.mrf.mxu0 }
 0x148   : > { %v991_v7 = vadd.f32 %v990_v55, %v4259_v0  ;;  %v1083_v8 = vpack.c.bf16 %v1020_v1, %v1020_v1 }
 0x14a   : > { %v1067_v14 = vmul.f32 0.088388346, %v991_v7  ;;  %v1115_v15 = vunpack.c.l.b16 %v1083_v8 }
 0x14c   : > { %v1075_v18 = vpack.c.bf16 %v1067_v14, %v1067_v14  ;;  %v1118_v19 = vpack.c.b16 %v1115_v15, %v1114_v16  ;;  %v1184_v14 = vlaneseq  ;;  %v3813_v15 = vmov 0  }
 0x14d   : > { %v1022_v57 = vpop.f32.mrf.mxu1  ;;  %v1199_v16 = vsel %vm1197_vm0, 1, %v3813_v15 }
 0x14e   : > { %v1023_v59 = vadd.f32 %v1022_v57, %v822_v58  ;;  %v1103_v22 = vunpack.c.l.b16 %v1075_v18  ;;  %v1185_v17 = vshrl.u32 %v1184_v14, 7  ;;  %v4271_v18 = vand.u32 127, %v1184_v14 }
 0x14f   : > { %v993_v60 = vpop.f32.mrf.mxu0 }
 0x150   : > { %v1084_v62 = vpack.c.bf16 %v1023_v59, %v1023_v59  ;;  %v994_v24 = vadd.f32 %v993_v60, %v4259_v0  ;;  %v1106_v26 = vpack.c.b16 %v1103_v22, %v1102_v21  ;;  %vm1191_vm1 = vcmp.le.s32.totalorder %v4271_v18, %v1185_v17 }
 0x152   : > { %v1116_v4 = vunpack.c.l.b16 %v1084_v62  ;;  %v1068_v27 = vmul.f32 0.088388346, %v994_v24  ;;  %v1187_v24 = vadd.s32 16, %v1185_v17 }
 0x154   : > { %v1076_v31 = vpack.c.bf16 %v1068_v27, %v1068_v27  ;;  %vm1193_vm7 = vcmp.le.s32.totalorder %v4271_v18, %v1187_v24 }
 0x155   : > { %v1024_v61 = vpop.f32.mrf.mxu1 }
 0x156   : > { %v1025_v63 = vadd.f32 %v1024_v61, %v822_v58  ;;  %v1104_v35 = vunpack.c.l.b16 %v1076_v31 }
 0x157   : > { %v995_v12 = vpop.f32.mrf.mxu0 }
 0x158   : > { %v1085_v2 = vpack.c.bf16 %v1025_v63, %v1025_v63  ;;  %v996_v25 = vadd.f32 %v995_v12, %v4259_v0 }
 0x15a   : > { %v1117_v5 = vunpack.c.l.b16 %v1085_v2  ;;  %v1069_v29 = vmul.f32 0.088388346, %v996_v25 }
 0x15c   : > { %v1119_v9 = vpack.c.b16 %v1117_v5, %v1116_v4  ;;  %v1077_v32 = vpack.c.bf16 %v1069_v29, %v1069_v29  ;;  %v4301_v29 = vadd.s32 24, %v1185_v17 }
 0x15d   : > { %v1027_v10 = vpop.f32.mrf.mxu1 }
 0x15e   : > { %1128 = vmatpush.bf16.xpose.msra.mxu3 %v1119_v9  ;;  %v1105_v36 = vunpack.c.l.b16 %v1077_v32  ;;  %v1028_v38 = vadd.f32 %v1027_v10, %v822_v58  ;;  %vm1194_vm10 = vcmp.le.s32.totalorder %v4271_v18, %v4301_v29 }
 0x15f   : > { %v998_v23 = vpop.f32.mrf.mxu0 }
 0x160   : > { %v999_v43 = vadd.f32 %v998_v23, %v4259_v0  ;;  %v1107_v44 = vpack.c.b16 %v1105_v36, %v1104_v35  ;;  %v1086_v46 = vpack.c.bf16 %v1028_v38, %v1028_v38  ;;  %v2704_v35 = vld [vmem:[#allocation11 + $0x98] sm:$0xf]  ;;  %v2928_v38 = vld [vmem:[#allocation11 + $0xa0] sm:$0xf0] }
 0x162   : > { %v1070_v55 = vmul.f32 0.088388346, %v999_v43  ;;  %v1157_v59 = vunpack.c.l.b16 %v1086_v46 }
 0x164   : > { %v1078_v61 = vpack.c.bf16 %v1070_v55, %v1070_v55  ;;  %v2668_v55 = vld [vmem:[#allocation11 + $0x50] sm:$0xf] }
 0x165   : > { %v1029_v20 = vpop.f32.mrf.mxu1 }
 0x166   : > { %1129 = vmatpush.bf16.xpose.msra.mxu3 %v1118_v19  ;;  %v1030_v39 = vadd.f32 %v1029_v20, %v822_v58  ;;  %v1145_v63 = vunpack.c.l.b16 %v1078_v61  ;;  %v1201_v19 = vperm.slane %v1199_v16, 0  ;;  %v1186_v20 = vadd.s32 8, %v1185_v17 }
 0x167   : > { %v1000_v33 = vpop.f32.mrf.mxu0 }
 0x168   : > { %v1001_v45 = vadd.f32 %v1000_v33, %v4259_v0  ;;  %v1087_v48 = vpack.c.bf16 %v1030_v39, %v1030_v39  ;;  %vm4274_vm2 = vcmp.eq.s32.totalorder %v1201_v19, 1  ;;  %vm1192_vm5 = vcmp.le.s32.totalorder %v4271_v18, %v1186_v20  ;;  %v2716_v33 = vld [vmem:[#allocation11 + $0xb0] sm:$0xf] }
 0x169   : > { %vm1213_vm3 = vmand %vm4274_vm2, %vm1191_vm1  ;;  %v2705_v39 = vor.u32 %v2928_v38, %v2704_v35 }
 0x16a   : > { %v1071_v57 = vmul.f32 0.088388346, %v1001_v45  ;;  %v1158_v60 = vunpack.c.l.b16 %v1087_v48  ;;  %vm1214_vm6 = vmand %vm4274_vm2, %vm1192_vm5 }
 0x16b   : > { %vm1215_vm8 = vmand %vm4274_vm2, %vm1193_vm7 }
 0x16c   : > { %v1161_v62 = vpack.c.b16 %v1158_v60, %v1157_v59  ;;  %vm1216_vm11 = vmand %vm4274_vm2, %vm1194_vm10 }
 0x16d   : > { %v1032_v28 = vpop.f32.mrf.mxu1  ;;  %1130 = vmatmul.bf16.vlgmr.msra.gmra.mxu3 %v1106_v26 }
 0x16e   : > { %v1033_v30 = vadd.f32 %v1032_v28, %v822_v58  ;;  %v1196_v28 = vld [vmem:[%s4185_s16 + $0x1] sm:$0x1] }
 0x16f   : > { %v1003_v54 = vpop.f32.mrf.mxu0  ;;  %vm1198_vm9 = vcmp.gt.s32.totalorder %v1196_v28, 0 }
 0x170   : > { %v1088_v34 = vpack.c.bf16 %v1033_v30, %v1033_v30  ;;  %v1004_v3 = vadd.f32 %v1003_v54, %v4259_v0  ;;  %v1200_v36 = vsel %vm1198_vm9, 1, %v3813_v15 }
 0x172   : > { %v1159_v41 = vunpack.c.l.b16 %v1088_v34  ;;  %v1072_v6 = vmul.f32 0.088388346, %v1004_v3  ;;  %v2931_v34 = vld [vmem:[#allocation11 + $0xb8] sm:$0xf0]  ;;  %v2913_v3 = vld [vmem:[#allocation11 + $0x28] sm:$0xf0] }
 0x174   : > { %v1080_v8 = vpack.c.bf16 %v1072_v6, %v1072_v6 }
 0x175   : > { %v1034_v37 = vpop.f32.mrf.mxu1 }
 0x176   : > { %v1035_v40 = vadd.f32 %v1034_v37, %v822_v58  ;;  %v1079_v58 = vpack.c.bf16 %v1071_v57, %v1071_v57  ;;  %v1147_v10 = vunpack.c.l.b16 %v1080_v8  ;;  %v2717_v37 = vor.u32 %v2931_v34, %v2716_v33  ;;  %v2919_v57 = vld [vmem:[#allocation11 + $0x58] sm:$0xf0]  ;;  %v2632_v8 = vld [vmem:[#allocation11 + $0x8] sm:$0xf] }
 0x177   : > { %v1005_v2 = vpop.f32.mrf.mxu0 }
 0x178   : > { %v1089_v42 = vpack.c.bf16 %v1035_v40, %v1035_v40  ;;  %v1146_v1 = vunpack.c.l.b16 %v1079_v58  ;;  %v1006_v5 = vadd.f32 %v1005_v2, %v4259_v0  ;;  %1037 = vmatpush.bf16.msra.mxu2 %v2717_v37  ;;  %v1202_v40 = vperm.slane %v1200_v36, 0  ;;  %v2644_v2 = vld [vmem:[#allocation11 + $0x20] sm:$0xf] }
 0x179   : > { %v2669_v58 = vor.u32 %v2919_v57, %v2668_v55  ;;  %v823_v55 = vperm.slane %v4255_v56, 2 }
 0x17a   : > { %v1160_v52 = vunpack.c.l.b16 %v1089_v42  ;;  %v1149_v4 = vpack.c.b16 %v1146_v1, %v1145_v63  ;;  %v1073_v7 = vmul.f32 0.088388346, %v1006_v5  ;;  %v2925_v42 = vld [vmem:[#allocation11 + $0x88] sm:$0xf0]  ;;  %vm4319_vm12 = vcmp.eq.s32.totalorder %v1202_v40, 1 }
 0x17b   : > { %vm1217_vm13 = vmand %vm4319_vm12, %vm1191_vm1  ;;  %v2916_v63 = vld [vmem:[#allocation11 + $0x40] sm:$0xf0] }
 0x17c   : > { %v1162_v53 = vpack.c.b16 %v1160_v52, %v1159_v41  ;;  %v1081_v9 = vpack.c.bf16 %v1073_v7, %v1073_v7  ;;  %v2692_v41 = vld [vmem:[#allocation11 + $0x80] sm:$0xf]  ;;  %1038 = vmatpush.bf16.msra.mxu2 %v2705_v39  ;;  %v2680_v52 = vld [vmem:[#allocation11 + $0x68] sm:$0xf]  ;;  %vm1218_vm14 = vmand %vm4319_vm12, %vm1192_vm5  ;;  %v2645_v7 = vor.u32 %v2913_v3, %v2644_v2 }
 0x17d   : > { %1135 = vmatmul.bf16.gmra.mxu3 %v1107_v44  ;;  %v2693_v46 = vor.u32 %v2925_v42, %v2692_v41  ;;  %vm1219_vm15 = vmand %vm4319_vm12, %vm1193_vm7 }
 0x17e   : > { %1171 = vmatpush.bf16.xpose.msrb.mxu3 %v1162_v53  ;;  %v1148_v11 = vunpack.c.l.b16 %v1081_v9  ;;  %v2922_v53 = vld [vmem:[#allocation11 + $0x70] sm:$0xf0]  ;;  %vm1220_vm0 = vmand %vm4319_vm12, %vm1194_vm10 }
 0x17f   : > { %v2681_v54 = vor.u32 %v2922_v53, %v2680_v52  ;;  %v2910_v9 = vld [vmem:[#allocation11 + $0x10] sm:$0xf0] }
 0x180   : > { %v1150_v12 = vpack.c.b16 %v1148_v11, %v1147_v10  ;;  %1039 = vmatpush.bf16.msra.mxu2 %v2693_v46  ;;  %v2633_v10 = vor.u32 %v2910_v9, %v2632_v8 }
 0x184   : > { %1040 = vmatpush.bf16.msra.mxu2 %v2681_v54 }
 0x186   : > { %1172 = vmatpush.bf16.xpose.msrb.mxu3 %v1161_v62  ;;  %v2656_v62 = vld [vmem:[#allocation11 + $0x38] sm:$0xf] }
 0x187   : > { %v2657_v1 = vor.u32 %v2916_v63, %v2656_v62 }
 0x188   : > { %1041 = vmatpush.bf16.msra.mxu2 %v2669_v58 }
 0x18c   : > { %1042 = vmatpush.bf16.msra.mxu2 %v2657_v1 }
 0x18d   : > { %1173 = vmatmul.bf16.vlgmr.msrb.gmra.mxu3 %v1149_v4 }
 0x190   : > { %1043 = vmatpush.bf16.msra.mxu2 %v2645_v7 }
 0x194   : > { %1044 = vmatpush.bf16.msra.mxu2 %v2633_v10 }
 0x197   : > { %1045 = vmatmul.bf16.vlgmr.msra.gmra.mxu2 %v4233_v47 }
 0x19d   : > { %1178 = vmatmul.bf16.gmra.mxu3 %v1150_v12 }
 0x1a7   : > { %1050 = vmatmul.bf16.gmra.mxu2 %v4238_v49 }
 0x1b7   : > { %1055 = vmatmul.bf16.gmra.mxu2 %v4243_v50 }
 0x1c7   : > { %1060 = vmatmul.bf16.gmra.mxu2 %v4248_v51 }
 0x1f0   : > { %v1131_v21 = vpop.f32.mrf.mxu3 }
 0x1f1   : > { %v4282_v22 = vsel %vm1213_vm3, %v1131_v21, -1e+09 }
 0x1f2   : > { %v1230_v23 = vsel %vm1229_vm4, %v4282_v22, -inf }
 0x1f3   : > { %1231 = vmax.xlane.f32.xlu0 %v1230_v23 }
 0x1f8   : > { %v1133_v25 = vpop.f32.mrf.mxu3 }
 0x1f9   : > { %v4291_v26 = vsel %vm1214_vm6, %v1133_v25, -1e+09 }
 0x1fa   : > { %v1233_v27 = vsel %vm1229_vm4, %v4291_v26, -inf }
 0x1fb   : > { %1234 = vmax.xlane.f32.xlu0 %v1233_v27 }
 0x200   : > { %v1136_v30 = vpop.f32.mrf.mxu3 }
 0x201   : > { %v4303_v31 = vsel %vm1215_vm8, %v1136_v30, -1e+09 }
 0x202   : > { %v1236_v32 = vsel %vm1229_vm4, %v4303_v31, -inf }
 0x203   : > { %1237 = vmax.xlane.f32.xlu1 %v1236_v32 }
 0x208   : > { %v1138_v43 = vpop.f32.mrf.mxu3 }
 0x209   : > { %v4315_v44 = vsel %vm1216_vm11, %v1138_v43, -1e+09 }
 0x20a   : > { %v1239_v45 = vsel %vm1229_vm4, %v4315_v44, -inf }
 0x20b   : > { %1240 = vmax.xlane.f32.xlu1 %v1239_v45 }
 0x210   : > { %v1174_v59 = vpop.f32.mrf.mxu3 }
 0x211   : > { %v4327_v60 = vsel %vm1217_vm13, %v1174_v59, -1e+09 }
 0x212   : > { %v1242_v61 = vsel %vm1229_vm4, %v4327_v60, -inf }
 0x213   : > { %1243 = vmax.xlane.f32.xlu2 %v1242_v61 }
 0x218   : > { %v1176_v4 = vpop.f32.mrf.mxu3 }
 0x219   : > { %v1226_v5 = vsel %vm1218_vm14, %v1176_v4, -1e+09 }
 0x21a   : > { %v1245_v6 = vsel %vm1229_vm4, %v1226_v5, -inf  ;;  %v1046_v52 = vpop.f32.mrf.mxu2 }
 0x21b   : > { %1246 = vmax.xlane.f32.xlu2 %v1245_v6  ;;  %v1047_v59 = vadd.f32 %v1046_v52, %v823_v55  ;;  %v2959_v52 = vld [vmem:[#allocation15 + $0x74] sm:$0xf0] }
 0x21d   : > { %v1090_v62 = vpack.c.bf16 %v1047_v59, %v1047_v59  ;;  %v2812_v59 = vld [vmem:[#allocation15 + $0x50] sm:$0xf] }
 0x21f   : > { %v1348_v4 = vunpack.c.l.b16 %v1090_v62 }
 0x220   : > { %v1179_v11 = vpop.f32.mrf.mxu3 }
 0x221   : > { %v1227_v12 = vsel %vm1219_vm15, %v1179_v11, -1e+09 }
 0x222   : > { %v1248_v13 = vsel %vm1229_vm4, %v1227_v12, -inf  ;;  %v1048_v53 = vpop.f32.mrf.mxu2 }
 0x223   : > { %1249 = vmax.xlane.f32.xlu2 %v1248_v13 }
 0x228   : > { %v1181_v49 = vpop.f32.mrf.mxu3 }
 0x229   : > { %v4356_v51 = vsel %vm1220_vm0, %v1181_v49, -1e+09 }
 0x22a   : > { %v1051_v54 = vpop.f32.mrf.mxu2 }
 0x22b   : > { %v1052_v57 = vadd.f32 %v1051_v54, %v823_v55  ;;  %v2820_v54 = vld [vmem:[#allocation15 + $0x60] sm:$0xf] }
 0x22d   : > { %v1092_v61 = vpack.c.bf16 %v1052_v57, %v1052_v57 }
 0x22f   : > { %v1350_v2 = vunpack.c.l.b16 %v1092_v61 }
 0x232   : > { %v1053_v58 = vpop.f32.mrf.mxu2 }
 0x233   : > { %v1054_v1 = vadd.f32 %v1053_v58, %v823_v55 }
 0x235   : > { %v1093_v3 = vpack.c.bf16 %v1054_v1, %v1054_v1 }
 0x237   : > { %v1351_v6 = vunpack.c.l.b16 %v1093_v3  ;;  %v2953_v3 = vld [vmem:[#allocation15 + $0x44] sm:$0xf0] }
 0x239   : > { %v1353_v7 = vpack.c.b16 %v1351_v6, %v1350_v2  ;;  %v2804_v2 = vld [vmem:[#allocation15 + $0x40] sm:$0xf] }
 0x23a   : > { %v1056_v8 = vpop.f32.mrf.mxu2  ;;  %v2805_v6 = vor.u32 %v2953_v3, %v2804_v2 }
 0x23b   : > { %1368 = vmatpush.bf16.msra.mxu3 %v1353_v7  ;;  %v1057_v13 = vadd.f32 %v1056_v8, %v823_v55  ;;  %v2796_v8 = vld [vmem:[#allocation15 + $0x30] sm:$0xf] }
 0x242   : > { %v1058_v56 = vpop.f32.mrf.mxu2 }
 0x24a   : > { %v1061_v11 = vpop.f32.mrf.mxu2 }
 0x252   : > { %v1063_v49 = vpop.f32.mrf.mxu2 }
 0x266   : > { %v1232_v14 = vpop.xlane.xlu0 %1231 }
 0x267   : > { %v1254_v16 = vsub.f32 %v4282_v22, %v1232_v14  ;;  %v1059_v14 = vadd.f32 %v1058_v56, %v823_v55 }
 0x269   : > { %v1262_v17 = vmul.f32 1.442695, %v1254_v16 }
 0x26b   : > { %3234 = vpow2.f32 %v1262_v17 }
 0x26e   : > { %v1235_v19 = vpop.xlane.xlu0 %1234 }
 0x26f   : > { %v1255_v0 = vsub.f32 %v4291_v26, %v1235_v19  ;;  %v1251_v26 = vsel %vm1229_vm4, %v4356_v51, -inf }
 0x271   : > { %v4347_v20 = vpop.eup %3234  ;;  %v1264_v21 = vmul.f32 1.442695, %v1255_v0 }
 0x272   : > { %v1278_v47 = vsel %vm1229_vm4, %v4347_v20, 0.0 }
 0x273   : > { %3236 = vpow2.f32 %v1264_v21  ;;  %1279 = vadd.xlane.f32.xlu0 %v1278_v47 }
 0x276   : > { %v1238_v50 = vpop.xlane.xlu1 %1237 }
 0x277   : > { %v1256_v22 = vsub.f32 %v4303_v31, %v1238_v50  ;;  %v1094_v50 = vpack.c.bf16 %v1057_v13, %v1057_v13  ;;  %v2949_v13 = vld [vmem:[#allocation15 + $0x24] sm:$0xf0] }
 0x279   : > { %v4359_v23 = vpop.eup %3236  ;;  %v1266_v24 = vmul.f32 1.442695, %v1256_v22  ;;  %v1095_v22 = vpack.c.bf16 %v1059_v14, %v1059_v14 }
 0x27a   : > { %v1281_v25 = vsel %vm1229_vm4, %v4359_v23, 0.0 }
 0x27b   : > { %3238 = vpow2.f32 %v1266_v24  ;;  %1282 = vadd.xlane.f32.xlu1 %v1281_v25  ;;  %1252 = vmax.xlane.f32.xlu0 %v1251_v26  ;;  %v1064_v24 = vadd.f32 %v1063_v49, %v823_v55 }
 0x27e   : > { %v1241_v18 = vpop.xlane.xlu1 %1240 }
 0x27f   : > { %v1257_v27 = vsub.f32 %v4315_v44, %v1241_v18  ;;  %v1097_v18 = vpack.c.bf16 %v1064_v24, %v1064_v24 }
 0x281   : > { %v4366_v28 = vpop.eup %3238  ;;  %v1268_v29 = vmul.f32 1.442695, %v1257_v27  ;;  %v1395_v27 = vunpack.c.l.b16 %v1094_v50  ;;  %v2772_v50 = vld [vmem:[#allocation15] sm:$0xf] }
 0x282   : > { %v1284_v30 = vsel %vm1229_vm4, %v4366_v28, 0.0 }
 0x283   : > { %3240 = vpow2.f32 %v1268_v29  ;;  %1285 = vadd.xlane.f32.xlu1 %v1284_v30  ;;  %v1396_v29 = vunpack.c.l.b16 %v1095_v22  ;;  %v2945_v22 = vld [vmem:[#allocation15 + $0x4] sm:$0xf0] }
 0x286   : > { %v1244_v31 = vpop.xlane.xlu2 %1243 }
 0x287   : > { %v1258_v32 = vsub.f32 %v4327_v60, %v1244_v31  ;;  %v1049_v60 = vadd.f32 %v1048_v53, %v823_v55 }
 0x289   : > { %v4371_v33 = vpop.eup %3240  ;;  %v1270_v34 = vmul.f32 1.442695, %v1258_v32  ;;  %v1091_v63 = vpack.c.bf16 %v1049_v60, %v1049_v60  ;;  %v2955_v60 = vld [vmem:[#allocation15 + $0x54] sm:$0xf0] }
 0x28a   : > { %v1287_v35 = vsel %vm1229_vm4, %v4371_v33, 0.0 }
 0x28b   : > { %3242 = vpow2.f32 %v1270_v34  ;;  %1288 = vadd.xlane.f32.xlu2 %v1287_v35 }
 0x28e   : > { %v1247_v36 = vpop.xlane.xlu2 %1246 }
 0x28f   : > { %v1259_v37 = vsub.f32 %v1226_v5, %v1247_v36  ;;  %v1349_v5 = vunpack.c.l.b16 %v1091_v63  ;;  %v1399_v36 = vpack.c.b16 %v1396_v29, %v1395_v27  ;;  %v2813_v63 = vor.u32 %v2955_v60, %v2812_v59  ;;  %v4416_v29 = vld [vmem:[%s4178_s3] sm:$0xff] }
 0x291   : > { %v4375_v38 = vpop.eup %3242  ;;  %v1272_v39 = vmul.f32 1.442695, %v1259_v37  ;;  %v1352_v9 = vpack.c.b16 %v1349_v5, %v1348_v4 }
 0x292   : > { %v1290_v40 = vsel %vm1229_vm4, %v4375_v38, 0.0 }
 0x293   : > { %3244 = vpow2.f32 %v1272_v39  ;;  %1291 = vadd.xlane.f32.xlu0 %v1290_v40  ;;  %1369 = vmatpush.bf16.msra.mxu3 %v1352_v9  ;;  %v2951_v9 = vld [vmem:[#allocation15 + $0x34] sm:$0xf0] }
 0x296   : > { %v1250_v41 = vpop.xlane.xlu2 %1249 }
 0x297   : > { %v1260_v42 = vsub.f32 %v1227_v12, %v1250_v41  ;;  %v1062_v12 = vadd.f32 %v1061_v11, %v823_v55  ;;  %v2957_v55 = vld [vmem:[#allocation15 + $0x64] sm:$0xf0]  ;;  %v2797_v11 = vor.u32 %v2951_v9, %v2796_v8 }
 0x298   : > { %v2821_v57 = vor.u32 %v2957_v55, %v2820_v54  ;;  %v771_v55 = vld [vmem:[%s4171_s29] sm:$0xff]  }
 0x299   : > { %v4379_v43 = vpop.eup %3244  ;;  %v1274_v44 = vmul.f32 1.442695, %v1260_v42  ;;  %v1096_v21 = vpack.c.bf16 %v1062_v12, %v1062_v12  ;;  %v2788_v12 = vld [vmem:[#allocation15 + $0x20] sm:$0xf]  ;;  %v780_v59 = vunpack.c.h.bf16 %v771_v55 }
 0x29a   : > { %v1293_v45 = vsel %vm1229_vm4, %v4379_v43, 0.0  ;;  %v2789_v14 = vor.u32 %v2949_v13, %v2788_v12 }
 0x29b   : > { %3246 = vpow2.f32 %v1274_v44  ;;  %1294 = vadd.xlane.f32.xlu1 %v1293_v45  ;;  %v1397_v26 = vunpack.c.l.b16 %v1096_v21 }
 0x2a1   : > { %v4383_v46 = vpop.eup %3246 }
 0x2a2   : > { %v1296_v48 = vsel %vm1229_vm4, %v4383_v46, 0.0 }
 0x2a3   : > { %1297 = vadd.xlane.f32.xlu2 %v1296_v48  ;;  %v2828_v48 = vld [vmem:[#allocation15 + $0x70] sm:$0xf] }
 0x2a4   : > { %v2829_v53 = vor.u32 %v2959_v52, %v2828_v48 }
 0x2a6   : > { %1687 = vmatpush.bf16.msrb.mxu2 %v2829_v53 }
 0x2aa   : > { %1688 = vmatpush.bf16.msrb.mxu2 %v2821_v57  ;;  %v779_v57 = vunpack.c.l.bf16 %v771_v55 }
 0x2ae   : > { %1689 = vmatpush.bf16.msrb.mxu2 %v2813_v63 }
 0x2b2   : > { %1690 = vmatpush.bf16.msrb.mxu2 %v2805_v6 }
 0x2b6   : > { %1691 = vmatpush.bf16.msrb.mxu2 %v2797_v11 }
 0x2ba   : > { %1692 = vmatpush.bf16.msrb.mxu2 %v2789_v14  ;;  %v4461_v14 = vld [vmem:[%s4850_s0] sm:$0x3] }
 0x2e6   : > { %v1280_v10 = vpop.xlane.xlu0 %1279 }
 0x2e7   : > { %3248 = vrcp.f32 %v1280_v10 }
 0x2ed   : > { %v3249_v16 = vpop.eup %3248 }
 0x2ee   : > { %v1310_v17 = vmul.f32 %v3249_v16, %v4347_v20  ;;  %v1283_v19 = vpop.xlane.xlu1 %1282  ;;  %v1253_v0 = vpop.xlane.xlu0 %1252  ;;  %v1398_v20 = vunpack.c.l.b16 %v1097_v18  ;;  %v2780_v16 = vld [vmem:[#allocation15 + $0x10] sm:$0xf] }
 0x2ef   : > { %3250 = vrcp.f32 %v1283_v19  ;;  %v1261_v47 = vsub.f32 %v4356_v51, %v1253_v0 }
 0x2f0   : > { %1318 = vst.msk [vmem:[%s4227_s22] sm:$0xff] %vm1229_vm4, %v1310_v17  ;;  %v1326_v31 = vpack.c.bf16 %v1310_v17, %v1310_v17  ;;  %v1400_v51 = vpack.c.b16 %v1398_v20, %v1397_v26  ;;  %v2947_v17 = vld [vmem:[#allocation15 + $0x14] sm:$0xf0]  ;;  %v2773_v26 = vor.u32 %v2945_v22, %v2772_v50 }
 0x2f1   : > { %v1276_v25 = vmul.f32 1.442695, %v1261_v47  ;;  %v2781_v47 = vor.u32 %v2947_v17, %v2780_v16  ;;  %v2939_v20 = vld [vmem:[#allocation12 + $0x38] sm:$0xff]  ;;  %v1579_v16 = vperm.slane %v4461_v14, 0 }
 0x2f2   : > { %1415 = vmatpush.bf16.msrb.mxu0 %v1400_v51  ;;  %v1338_v39 = vunpack.c.l.b16 %v1326_v31  ;;  %1508 = vmatpush.bf16.msrb.mxu1 %v2939_v20  ;;  %v2937_v31 = vld [vmem:[#allocation12 + $0x28] sm:$0xff]  ;;  %v2934_v51 = vld [vmem:[#allocation12 + $0x10] sm:$0xff] }
 0x2f3   : > { %3252 = vpow2.f32 %v1276_v25  ;;  %1693 = vmatpush.bf16.msrb.mxu2 %v2781_v47 }
 0x2f5   : > { %v3251_v30 = vpop.eup %3250 }
 0x2f6   : > { %v1311_v32 = vmul.f32 %v3251_v30, %v4359_v23  ;;  %v1286_v34 = vpop.xlane.xlu1 %1285  ;;  %1416 = vmatpush.bf16.msrb.mxu0 %v1399_v36  ;;  %v2938_v30 = vld [vmem:[#allocation12 + $0x30] sm:$0xff]  ;;  %v2932_v36 = vld [vmem:[#allocation12] sm:$0xff] }
 0x2f7   : > { %3254 = vrcp.f32 %v1286_v34  ;;  %1694 = vmatpush.bf16.msrb.mxu2 %v2773_v26  ;;  %1509 = vmatpush.bf16.msrb.mxu1 %v2938_v30  ;;  %v4422_v34 = vld [vmem:[%s4178_s3 + $0x8] sm:$0xff] }
 0x2f8   : > { %1319 = vst.msk [vmem:[%s4227_s22 + $0x8] sm:$0xff] %vm1229_vm4, %v1311_v32  ;;  %v1327_v35 = vpack.c.bf16 %v1311_v32, %v1311_v32  ;;  %v2936_v32 = vld [vmem:[#allocation12 + $0x20] sm:$0xff] }
 0x2f9   : > { %v4395_v37 = vpop.eup %3252 }
 0x2fa   : > { %v1339_v40 = vunpack.c.l.b16 %v1327_v35  ;;  %v1299_v41 = vsel %vm1229_vm4, %v4395_v37, 0.0  ;;  %1695 = vmatmul.bf16.vlgmr.msrb.gmra.mxu2 %v4416_v29  ;;  %v2933_v35 = vld [vmem:[#allocation12 + $0x8] sm:$0xff] }
 0x2fb   : > { %1300 = vadd.xlane.f32.xlu0 %v1299_v41  ;;  %1510 = vmatpush.bf16.msrb.mxu1 %v2937_v31 }
 0x2fc   : > { %v1342_v42 = vpack.c.b16 %v1339_v40, %v1338_v39  ;;  %v4426_v39 = vld [vmem:[%s4178_s3 + $0x10] sm:$0xff] }
 0x2fd   : > { %v3255_v23 = vpop.eup %3254 }
 0x2fe   : > { %v1312_v44 = vmul.f32 %v3255_v23, %v4366_v28  ;;  %2718 = vmatmul.msk.bf16.vlgmr.msra.gmra.mxu3 %vm1229_vm4, %v1342_v42  ;;  %v1289_v45 = vpop.xlane.xlu2 %1288 }
 0x2ff   : > { %3256 = vrcp.f32 %v1289_v45  ;;  %1511 = vmatpush.bf16.msrb.mxu1 %v2936_v32  ;;  %v4433_v45 = vld [vmem:[%s4178_s3 + $0x18] sm:$0xff] }
 0x300   : > { %1320 = vst.msk [vmem:[%s4227_s22 + $0x10] sm:$0xff] %vm1229_vm4, %v1312_v44  ;;  %v1328_v62 = vpack.c.bf16 %v1312_v44, %v1312_v44 }
 0x302   : > { %v1340_v4 = vunpack.c.l.b16 %v1328_v62  ;;  %v773_v62 = vld [vmem:[%s4171_s29 + $0x8] sm:$0xff]  }
 0x303   : > { %v781_v63 = vunpack.c.l.bf16 %v773_v62 }
 0x305   : > { %v3257_v61 = vpop.eup %3256 }
 0x306   : > { %v1313_v58 = vmul.f32 %v3257_v61, %v4371_v33  ;;  %v1292_v28 = vpop.xlane.xlu0 %1291 }
 0x307   : > { %3258 = vrcp.f32 %v1292_v28 }
 0x308   : > { %1321 = vst.msk [vmem:[%s4227_s22 + $0x18] sm:$0xff] %vm1229_vm4, %v1313_v58  ;;  %v1329_v1 = vpack.c.bf16 %v1313_v58, %v1313_v58 }
 0x30a   : > { %v1341_v5 = vunpack.c.l.b16 %v1329_v1  ;;  %1700 = vmatmul.bf16.gmra.mxu2 %v4422_v34  ;;  %v782_v1 = vunpack.c.h.bf16 %v773_v62 }
 0x30c   : > { %v1343_v7 = vpack.c.b16 %v1341_v5, %v1340_v4 }
 0x30d   : > { %v3259_v56 = vpop.eup %3258 }
 0x30e   : > { %v1314_v33 = vmul.f32 %v3259_v56, %v4375_v38  ;;  %v1295_v10 = vpop.xlane.xlu1 %1294  ;;  %2719 = vmatmul.msk.bf16.gmra.mxu3 %vm1229_vm4, %v1343_v7  ;;  %v775_v7 = vld [vmem:[%s4171_s29 + $0x10] sm:$0xff]  }
 0x30f   : > { %3260 = vrcp.f32 %v1295_v10  ;;  %v784_v8 = vunpack.c.h.bf16 %v775_v7  ;;  %v783_v56 = vunpack.c.l.bf16 %v775_v7 }
 0x310   : > { %1322 = vst.msk [vmem:[%s4227_s22 + $0x20] sm:$0xff] %vm1229_vm4, %v1314_v33  ;;  %v1330_v0 = vpack.c.bf16 %v1314_v33, %v1314_v33 }
 0x312   : > { %v1385_v24 = vunpack.c.l.b16 %v1330_v0 }
 0x315   : > { %v3261_v19 = vpop.eup %3260 }
 0x316   : > { %v1315_v21 = vmul.f32 %v3261_v19, %v4379_v43  ;;  %v1298_v38 = vpop.xlane.xlu2 %1297 }
 0x317   : > { %3262 = vrcp.f32 %v1298_v38 }
 0x318   : > { %1323 = vst.msk [vmem:[%s4227_s22 + $0x28] sm:$0xff] %vm1229_vm4, %v1315_v21  ;;  %v1331_v49 = vpack.c.bf16 %v1315_v21, %v1315_v21 }
 0x31a   : > { %v1386_v25 = vunpack.c.l.b16 %v1331_v49  ;;  %1705 = vmatmul.bf16.gmra.mxu2 %v4426_v39 }
 0x31c   : > { %v1389_v18 = vpack.c.b16 %v1386_v25, %v1385_v24 }
 0x31d   : > { %v3263_v27 = vpop.eup %3262 }
 0x31e   : > { %v1316_v43 = vmul.f32 %v3263_v27, %v4383_v46  ;;  %2720 = vmatmul.msk.bf16.vlgmr.msrb.gmra.mxu0 %vm1229_vm4, %v1389_v18  ;;  %v2935_v46 = vld [vmem:[#allocation12 + $0x18] sm:$0xff] }
 0x31f   : > { %1512 = vmatpush.bf16.msrb.mxu1 %v2935_v46  ;;  %v777_v46 = vld [vmem:[%s4171_s29 + $0x18] sm:$0xff]  }
 0x320   : > { %1324 = vst.msk [vmem:[%s4227_s22 + $0x30] sm:$0xff] %vm1229_vm4, %v1316_v43  ;;  %v1332_v23 = vpack.c.bf16 %v1316_v43, %v1316_v43 }
 0x322   : > { %v1387_v48 = vunpack.c.l.b16 %v1332_v23 }
 0x323   : > { %1513 = vmatpush.bf16.msrb.mxu1 %v2934_v51 }
 0x327   : > { %1514 = vmatpush.bf16.msrb.mxu1 %v2933_v35  ;;  %v785_v35 = vunpack.c.l.bf16 %v777_v46 }
 0x32a   : > { %1710 = vmatmul.bf16.gmra.mxu2 %v4433_v45 }
 0x32b   : > { %1515 = vmatpush.bf16.msrb.mxu1 %v2932_v36  ;;  %v786_v36 = vunpack.c.h.bf16 %v777_v46 }
 0x36e   : > { %v1301_v40 = vpop.xlane.xlu0 %1300 }
 0x36f   : > { %3264 = vrcp.f32 %v1301_v40 }
 0x375   : > { %v3265_v41 = vpop.eup %3264 }
 0x376   : > { %v1317_v42 = vmul.f32 %v3265_v41, %v4395_v37 }
 0x378   : > { %1325 = vst.msk [vmem:[%s4227_s22 + $0x38] sm:$0xff] %vm1229_vm4, %v1317_v42  ;;  %v1333_v44 = vpack.c.bf16 %v1317_v42, %v1317_v42 }
 0x37a   : > { %v1388_v52 = vunpack.c.l.b16 %v1333_v44 }
 0x37c   : > { %v1390_v53 = vpack.c.b16 %v1388_v52, %v1387_v48 }
 0x37d   : > { %v1696_v12 = vpop.f32.mrf.mxu2 }
 0x37e   : > { %2721 = vmatmul.msk.bf16.gmra.mxu0 %vm1229_vm4, %v1390_v53  ;;  %v1697_v38 = vadd.f32 %v1696_v12, %v1579_v16 }
 0x380   : > { %v1745_v24 = vpack.c.bf16 %v1697_v38, %v1697_v38 }
 0x381   : > { %v1371_v54 = vpop.f32.mrf.mxu3 }
 0x382   : > { %v4438_v60 = vadd.f32 %v1371_v54, %v779_v57  ;;  %v1777_v27 = vunpack.c.l.b16 %v1745_v24 }
 0x385   : > { %v1698_v13 = vpop.f32.mrf.mxu2 }
 0x386   : > { %v1699_v47 = vadd.f32 %v1698_v13, %v1579_v16 }
 0x388   : > { %v1746_v25 = vpack.c.bf16 %v1699_v47, %v1699_v47 }
 0x389   : > { %v1373_v37 = vpop.f32.mrf.mxu3 }
 0x38a   : > { %v4440_v61 = vadd.f32 %v1373_v37, %v780_v59  ;;  %v1778_v43 = vunpack.c.l.b16 %v1746_v25  ;;  %v3233_v37 = vld [vmem:[#allocation14] ss:$0 sm:$0xff] }
 0x38c   : > { %v1436_v58 = vpack.c.bf16 %v4440_v61, %v4438_v60  ;;  %v1781_v30 = vpack.c.b16 %v1778_v43, %v1777_v27 }
 0x38d   : > { %v1701_v17 = vpop.f32.mrf.mxu2 }
 0x38e   : > { %1516 = vmatmul.bf16.vlgmr.msrb.gmra.mxu1 %v1436_v58  ;;  %v1702_v19 = vadd.f32 %v1701_v17, %v1579_v16 }
 0x390   : > { %v1747_v0 = vpack.c.bf16 %v1702_v19, %v1702_v19 }
 0x391   : > { %v1376_v28 = vpop.f32.mrf.mxu3 }
 0x392   : > { %v4445_v3 = vadd.f32 %v1376_v28, %v781_v63  ;;  %v1779_v50 = vunpack.c.l.b16 %v1747_v0 }
 0x395   : > { %v1703_v21 = vpop.f32.mrf.mxu2 }
 0x396   : > { %v1704_v49 = vadd.f32 %v1703_v21, %v1579_v16 }
 0x398   : > { %v1748_v22 = vpack.c.bf16 %v1704_v49, %v1704_v49 }
 0x399   : > { %v1378_v2 = vpop.f32.mrf.mxu3 }
 0x39a   : > { %v4447_v4 = vadd.f32 %v1378_v2, %v782_v1  ;;  %v1780_v26 = vunpack.c.l.b16 %v1748_v22 }
 0x39b   : > { %v1418_v5 = vpop.f32.mrf.mxu0 }
 0x39c   : > { %v1437_v6 = vpack.c.bf16 %v4447_v4, %v4445_v3  ;;  %v4454_v10 = vadd.f32 %v1418_v5, %v783_v56  ;;  %v1782_v18 = vpack.c.b16 %v1780_v26, %v1779_v50 }
 0x39d   : > { %v1706_v20 = vpop.f32.mrf.mxu2 }
 0x39e   : > { %1521 = vmatmul.bf16.gmra.mxu1 %v1437_v6  ;;  %1791 = vmatpush.bf16.xpose.msra.mxu0 %v1782_v18  ;;  %v1707_v53 = vadd.f32 %v1706_v20, %v1579_v16 }
 0x3a0   : > { %v1749_v28 = vpack.c.bf16 %v1707_v53, %v1707_v53 }
 0x3a2   : > { %v1820_v5 = vunpack.c.l.b16 %v1749_v28 }
 0x3a3   : > { %v1420_v9 = vpop.f32.mrf.mxu0 }
 0x3a4   : > { %v4452_v33 = vadd.f32 %v1420_v9, %v784_v8 }
 0x3a5   : > { %v1708_v31 = vpop.f32.mrf.mxu2 }
 0x3a6   : > { %v1438_v11 = vpack.c.bf16 %v4452_v33, %v4454_v10  ;;  %1792 = vmatpush.bf16.xpose.msra.mxu0 %v1781_v30  ;;  %v1709_v54 = vadd.f32 %v1708_v31, %v1579_v16 }
 0x3a8   : > { %v1750_v62 = vpack.c.bf16 %v1709_v54, %v1709_v54 }
 0x3aa   : > { %v1821_v6 = vunpack.c.l.b16 %v1750_v62 }
 0x3ac   : > { %v1824_v9 = vpack.c.b16 %v1821_v6, %v1820_v5 }
 0x3ad   : > { %v1711_v51 = vpop.f32.mrf.mxu2 }
 0x3ae   : > { %1526 = vmatmul.bf16.gmra.mxu1 %v1438_v11  ;;  %v1712_v40 = vadd.f32 %v1711_v51, %v1579_v16 }
 0x3b0   : > { %v1751_v44 = vpack.c.bf16 %v1712_v40, %v1712_v40 }
 0x3b2   : > { %v1822_v57 = vunpack.c.l.b16 %v1751_v44 }
 0x3b5   : > { %v1713_v52 = vpop.f32.mrf.mxu2 }
 0x3b6   : > { %v1714_v55 = vadd.f32 %v1713_v52, %v1579_v16  ;;  %v1847_v52 = vld [vmem:[%s4188_s20] sm:$0x1] }
 0x3b7   : > { %vm1849_vm1 = vcmp.gt.s32.totalorder %v1847_v52, 0 }
 0x3b8   : > { %v1752_v59 = vpack.c.bf16 %v1714_v55, %v1714_v55 }
 0x3ba   : > { %v1823_v63 = vunpack.c.l.b16 %v1752_v59 }
 0x3bc   : > { %v1825_v1 = vpack.c.b16 %v1823_v63, %v1822_v57 }
 0x3be   : > { %1834 = vmatpush.bf16.xpose.msrb.mxu0 %v1825_v1 }
 0x3c6   : > { %1835 = vmatpush.bf16.xpose.msrb.mxu0 %v1824_v9  ;;  %v1848_v9 = vld [vmem:[%s4188_s20 + $0x1] sm:$0x1] }
 0x3c7   : > { %vm1850_vm3 = vcmp.gt.s32.totalorder %v1848_v9, 0 }
 0x3fb   : > { %v1423_v32 = vpop.f32.mrf.mxu0 }
 0x3fc   : > { %v4465_v42 = vadd.f32 %v1423_v32, %v785_v35 }
 0x403   : > { %v1425_v41 = vpop.f32.mrf.mxu0 }
 0x404   : > { %v4467_v23 = vadd.f32 %v1425_v41, %v786_v36 }
 0x406   : > { %v1439_v48 = vpack.c.bf16 %v4467_v23, %v4465_v42 }
 0x408   : > { %1531 = vmatmul.bf16.gmra.mxu1 %v1439_v48 }
 0x40b   : > { %v1517_v58 = vpop.f32.mrf.mxu1 }
 0x40c   : > { %v1518_v2 = vadd.f32 %v3233_v37, %v1517_v58  ;;  %v1851_v58 = vsel %vm1849_vm1, 1, %v3813_v15 }
 0x40d   : > { %v1853_v63 = vperm.slane %v1851_v58, 0 }
 0x40e   : > { %v1537_v7 = vmul.f32 0.088388346, %v1518_v2 }
 0x40f   : > { %vm4473_vm2 = vcmp.eq.s32.totalorder %v1853_v63, 1 }
 0x410   : > { %v1545_v11 = vpack.c.bf16 %v1537_v7, %v1537_v7 }
 0x412   : > { %v1765_v16 = vunpack.c.l.b16 %v1545_v11  ;;  %v2830_v11 = vld [vmem:[#allocation15 + $0x78] sm:$0xf0] }
 0x413   : > { %v1519_v8 = vpop.f32.mrf.mxu1 }
 0x414   : > { %v1520_v56 = vadd.f32 %v3233_v37, %v1519_v8 }
 0x416   : > { %v1538_v12 = vmul.f32 0.088388346, %v1520_v56  ;;  %v2958_v56 = vld [vmem:[#allocation15 + $0x74] sm:$0xf] }
 0x418   : > { %v1546_v13 = vpack.c.bf16 %v1538_v12, %v1538_v12  ;;  %v2956_v12 = vld [vmem:[#allocation15 + $0x64] sm:$0xf] }
 0x41a   : > { %v1766_v17 = vunpack.c.l.b16 %v1546_v13  ;;  %v2833_v13 = vor.u32 %v2958_v56, %v2830_v11 }
 0x41b   : > { %v1522_v19 = vpop.f32.mrf.mxu1 }
 0x41c   : > { %v1769_v0 = vpack.c.b16 %v1766_v17, %v1765_v16  ;;  %v1523_v21 = vadd.f32 %v3233_v37, %v1522_v19  ;;  %v2822_v16 = vld [vmem:[#allocation15 + $0x68] sm:$0xf0]  ;;  %1716 = vmatpush.bf16.msrb.mxu3 %v2833_v13  ;;  %v1852_v19 = vsel %vm1850_vm3, 1, %v3813_v15  ;;  %v2798_v15 = vld [vmem:[#allocation15 + $0x38] sm:$0xf0] }
 0x41d   : > { %v2825_v17 = vor.u32 %v2956_v12, %v2822_v16 }
 0x41e   : > { %1793 = vmatmul.bf16.vlgmr.msra.gmra.mxu0 %v1769_v0  ;;  %v1539_v38 = vmul.f32 0.088388346, %v1523_v21  ;;  %v2954_v0 = vld [vmem:[#allocation15 + $0x54] sm:$0xf]  ;;  %v2814_v21 = vld [vmem:[#allocation15 + $0x58] sm:$0xf0] }
 0x420   : > { %v1547_v50 = vpack.c.bf16 %v1539_v38, %v1539_v38  ;;  %1717 = vmatpush.bf16.msrb.mxu3 %v2825_v17 }
 0x422   : > { %v1767_v25 = vunpack.c.l.b16 %v1547_v50  ;;  %v2817_v50 = vor.u32 %v2954_v0, %v2814_v21 }
 0x423   : > { %v1524_v47 = vpop.f32.mrf.mxu1 }
 0x424   : > { %v1525_v49 = vadd.f32 %v3233_v37, %v1524_v47  ;;  %1718 = vmatpush.bf16.msrb.mxu3 %v2817_v50 }
 0x426   : > { %v1540_v22 = vmul.f32 0.088388346, %v1525_v49  ;;  %v1854_v49 = vperm.slane %v1852_v19, 0 }
 0x428   : > { %v1548_v24 = vpack.c.bf16 %v1540_v22, %v1540_v22  ;;  %v2952_v22 = vld [vmem:[#allocation15 + $0x44] sm:$0xf]  ;;  %vm4489_vm5 = vcmp.eq.s32.totalorder %v1854_v49, 1 }
 0x42a   : > { %v1768_v26 = vunpack.c.l.b16 %v1548_v24  ;;  %v2806_v24 = vld [vmem:[#allocation15 + $0x48] sm:$0xf0] }
 0x42b   : > { %v1527_v18 = vpop.f32.mrf.mxu1 }
 0x42c   : > { %v1770_v27 = vpack.c.b16 %v1768_v26, %v1767_v25  ;;  %v1528_v43 = vadd.f32 %v3233_v37, %v1527_v18  ;;  %v2809_v26 = vor.u32 %v2952_v22, %v2806_v24  ;;  %v2950_v18 = vld [vmem:[#allocation15 + $0x34] sm:$0xf] }
 0x42e   : > { %1798 = vmatmul.bf16.gmra.mxu0 %v1770_v27  ;;  %v1541_v20 = vmul.f32 0.088388346, %v1528_v43  ;;  %1719 = vmatpush.bf16.msrb.mxu3 %v2809_v26 }
 0x430   : > { %v1549_v32 = vpack.c.bf16 %v1541_v20, %v1541_v20 }
 0x432   : > { %v1808_v35 = vunpack.c.l.b16 %v1549_v32  ;;  %v2790_v32 = vld [vmem:[#allocation15 + $0x28] sm:$0xf0] }
 0x433   : > { %v1529_v30 = vpop.f32.mrf.mxu1 }
 0x434   : > { %v1530_v31 = vadd.f32 %v3233_v37, %v1529_v30  ;;  %v2801_v30 = vor.u32 %v2950_v18, %v2798_v15 }
 0x436   : > { %v1542_v46 = vmul.f32 0.088388346, %v1530_v31  ;;  %v2948_v31 = vld [vmem:[#allocation15 + $0x24] sm:$0xf]  ;;  %1720 = vmatpush.bf16.msrb.mxu3 %v2801_v30 }
 0x438   : > { %v1550_v51 = vpack.c.bf16 %v1542_v46, %v1542_v46  ;;  %v2793_v46 = vor.u32 %v2948_v31, %v2790_v32 }
 0x43a   : > { %v1809_v36 = vunpack.c.l.b16 %v1550_v51  ;;  %1721 = vmatpush.bf16.msrb.mxu3 %v2793_v46 }
 0x43c   : > { %v1812_v40 = vpack.c.b16 %v1809_v36, %v1808_v35  ;;  %v2946_v35 = vld [vmem:[#allocation15 + $0x14] sm:$0xf]  ;;  %v2782_v36 = vld [vmem:[#allocation15 + $0x18] sm:$0xf0] }
 0x43d   : > { %v2785_v52 = vor.u32 %v2946_v35, %v2782_v36 }
 0x43e   : > { %1836 = vmatmul.bf16.vlgmr.msrb.gmra.mxu0 %v1812_v40 }
 0x43f   : > { %1722 = vmatpush.bf16.msrb.mxu3 %v2785_v52 }
 0x485   : > { %v1532_v41 = vpop.f32.mrf.mxu1 }
 0x486   : > { %v1533_v44 = vadd.f32 %v3233_v37, %v1532_v41 }
 0x488   : > { %v1543_v48 = vmul.f32 0.088388346, %v1533_v44 }
 0x48a   : > { %v1551_v55 = vpack.c.bf16 %v1543_v48, %v1543_v48 }
 0x48c   : > { %v1810_v28 = vunpack.c.l.b16 %v1551_v55 }
 0x48d   : > { %v1534_v53 = vpop.f32.mrf.mxu1 }
 0x48e   : > { %v1535_v54 = vadd.f32 %v3233_v37, %v1534_v53  ;;  %v2944_v53 = vld [vmem:[#allocation15 + $0x4] sm:$0xf] }
 0x490   : > { %v1544_v57 = vmul.f32 0.088388346, %v1535_v54  ;;  %v2774_v54 = vld [vmem:[#allocation15 + $0x8] sm:$0xf0] }
 0x491   : > { %v2777_v55 = vor.u32 %v2944_v53, %v2774_v54 }
 0x492   : > { %v1552_v59 = vpack.c.bf16 %v1544_v57, %v1544_v57 }
 0x493   : > { %1723 = vmatpush.bf16.msrb.mxu3 %v2777_v55 }
 0x494   : > { %v1811_v62 = vunpack.c.l.b16 %v1552_v59 }
 0x496   : > { %v1813_v1 = vpack.c.b16 %v1811_v62, %v1810_v28  ;;  %1724 = vmatmul.bf16.vlgmr.msrb.gmra.mxu3 %v4416_v29 }
 0x498   : > { %1841 = vmatmul.bf16.gmra.mxu0 %v1813_v1 }
 0x49b   : > { %v1794_v5 = vpop.f32.mrf.mxu0 }
 0x49c   : > { %v4479_v37 = vsel %vm4473_vm2, %v1794_v5, -1e+09 }
 0x49d   : > { %v1865_v6 = vsel %vm1229_vm4, %v4479_v37, -inf }
 0x49e   : > { %1866 = vmax.xlane.f32.xlu0 %v1865_v6 }
 0x4a3   : > { %v1796_v7 = vpop.f32.mrf.mxu0 }
 0x4a4   : > { %v1858_v51 = vsel %vm4473_vm2, %v1796_v7, -1e+09 }
 0x4a5   : > { %v1868_v44 = vsel %vm1229_vm4, %v1858_v51, -inf }
 0x4a6   : > { %1729 = vmatmul.bf16.gmra.mxu3 %v4422_v34 }
 0x4ab   : > { %v1799_v8 = vpop.f32.mrf.mxu0 }
 0x4ac   : > { %v1859_v57 = vsel %vm4473_vm2, %v1799_v8, -1e+09 }
 0x4ad   : > { %v1871_v59 = vsel %vm1229_vm4, %v1859_v57, -inf }
 0x4b3   : > { %v1801_v38 = vpop.f32.mrf.mxu0 }
 0x4b4   : > { %v4487_v47 = vsel %vm4473_vm2, %v1801_v38, -1e+09 }
 0x4b6   : > { %1734 = vmatmul.bf16.gmra.mxu3 %v4426_v39  ;;  %v1874_v39 = vsel %vm1229_vm4, %v4487_v47, -inf }
 0x4bb   : > { %v1837_v27 = vpop.f32.mrf.mxu0 }
 0x4bc   : > { %v1861_v43 = vsel %vm4489_vm5, %v1837_v27, -1e+09 }
 0x4bd   : > { %v1877_v20 = vsel %vm1229_vm4, %v1861_v43, -inf }
 0x4be   : > { %1878 = vmax.xlane.f32.xlu1 %v1877_v20 }
 0x4c3   : > { %v1839_v40 = vpop.f32.mrf.mxu0 }
 0x4c4   : > { %v1862_v41 = vsel %vm4489_vm5, %v1839_v40, -1e+09 }
 0x4c5   : > { %v1880_v48 = vsel %vm1229_vm4, %v1862_v41, -inf }
 0x4c6   : > { %1869 = vmax.xlane.f32.xlu1 %v1868_v44  ;;  %1881 = vmax.xlane.f32.xlu2 %v1880_v48 }
 0x4c7   : > { %1739 = vmatmul.bf16.gmra.mxu3 %v4433_v45 }
 0x4ce   : > { %1872 = vmax.xlane.f32.xlu1 %v1871_v59 }
 0x511   : > { %v1867_v58 = vpop.xlane.xlu0 %1866 }
 0x512   : > { %v1889_v62 = vsub.f32 %v4479_v37, %v1867_v58 }
 0x514   : > { %v1897_v2 = vmul.f32 1.442695, %v1889_v62 }
 0x515   : > { %v1842_v28 = vpop.f32.mrf.mxu0 }
 0x516   : > { %v4512_v63 = vsel %vm4489_vm5, %v1842_v28, -1e+09  ;;  %3266 = vpow2.f32 %v1897_v2 }
 0x517   : > { %v1883_v1 = vsel %vm1229_vm4, %v4512_v63, -inf }
 0x518   : > { %1884 = vmax.xlane.f32.xlu2 %v1883_v1 }
 0x519   : > { %v1725_v18 = vpop.f32.mrf.mxu3 }
 0x51c   : > { %v4524_v5 = vpop.eup %3266 }
 0x51d   : > { %v1844_v29 = vpop.f32.mrf.mxu0  ;;  %v1913_v37 = vsel %vm1229_vm4, %v4524_v5, 0.0 }
 0x51e   : > { %v4518_v34 = vsel %vm4489_vm5, %v1844_v29, -1e+09 }
 0x51f   : > { %v1886_v45 = vsel %vm1229_vm4, %v4518_v34, -inf }
 0x520   : > { %1875 = vmax.xlane.f32.xlu2 %v1874_v39  ;;  %1887 = vmax.xlane.f32.xlu0 %v1886_v45 }
 0x521   : > { %v1727_v15 = vpop.f32.mrf.mxu3 }
 0x528   : > { %1914 = vadd.xlane.f32.xlu2 %v1913_v37 }
 0x529   : > { %v1730_v27 = vpop.f32.mrf.mxu3 }
 0x531   : > { %v1879_v6 = vpop.xlane.xlu1 %1878  ;;  %v1732_v46 = vpop.f32.mrf.mxu3 }
 0x532   : > { %v1893_v7 = vsub.f32 %v1861_v43, %v1879_v6  ;;  %v1580_v43 = vperm.slane %v4461_v14, 1 }
 0x534   : > { %v1905_v8 = vmul.f32 1.442695, %v1893_v7  ;;  %v1731_v20 = vadd.f32 %v1730_v27, %v1580_v43  ;;  %v1726_v30 = vadd.f32 %v1725_v18, %v1580_v43  ;;  %v1728_v31 = vadd.f32 %v1727_v15, %v1580_v43 }
 0x535   : > { %v1733_v36 = vadd.f32 %v1732_v46, %v1580_v43 }
 0x536   : > { %3268 = vpow2.f32 %v1905_v8  ;;  %v1755_v32 = vpack.c.bf16 %v1731_v20, %v1731_v20  ;;  %v1754_v35 = vpack.c.bf16 %v1728_v31, %v1728_v31 }
 0x538   : > { %v1985_v40 = vunpack.c.l.b16 %v1755_v32  ;;  %v1984_v48 = vunpack.c.l.b16 %v1754_v35 }
 0x539   : > { %v1870_v9 = vpop.xlane.xlu1 %1869  ;;  %v1882_v56 = vpop.xlane.xlu2 %1881 }
 0x53a   : > { %v1890_v11 = vsub.f32 %v1858_v51, %v1870_v9  ;;  %v1894_v12 = vsub.f32 %v1862_v41, %v1882_v56  ;;  %v1753_v51 = vpack.c.bf16 %v1726_v30, %v1726_v30  ;;  %v1756_v41 = vpack.c.bf16 %v1733_v36, %v1733_v36  ;;  %v1735_v55 = vpop.f32.mrf.mxu3 }
 0x53b   : > { %v1736_v45 = vadd.f32 %v1735_v55, %v1580_v43 }
 0x53c   : > { %v4528_v13 = vpop.eup %3268  ;;  %v1899_v16 = vmul.f32 1.442695, %v1890_v11  ;;  %v1907_v17 = vmul.f32 1.442695, %v1894_v12  ;;  %v1983_v44 = vunpack.c.l.b16 %v1753_v51  ;;  %v1986_v52 = vunpack.c.l.b16 %v1756_v41 }
 0x53d   : > { %v1925_v19 = vsel %vm1229_vm4, %v4528_v13, 0.0  ;;  %v1757_v11 = vpack.c.bf16 %v1736_v45, %v1736_v45 }
 0x53e   : > { %3270 = vpow2.f32 %v1899_v16  ;;  %1926 = vadd.xlane.f32.xlu0 %v1925_v19  ;;  %v1988_v53 = vpack.c.b16 %v1986_v52, %v1985_v40  ;;  %v1987_v54 = vpack.c.b16 %v1984_v48, %v1983_v44 }
 0x53f   : > { %3272 = vpow2.f32 %v1907_v17  ;;  %v2030_v19 = vunpack.c.l.b16 %v1757_v11 }
 0x540   : > { %2003 = vmatpush.bf16.msra.mxu1 %v1988_v53 }
 0x541   : > { %v1873_v0 = vpop.xlane.xlu1 %1872 }
 0x542   : > { %v1891_v21 = vsub.f32 %v1859_v57, %v1873_v0  ;;  %v1737_v57 = vpop.f32.mrf.mxu3 }
 0x543   : > { %v1738_v37 = vadd.f32 %v1737_v57, %v1580_v43 }
 0x544   : > { %v4532_v38 = vpop.eup %3270  ;;  %v1901_v49 = vmul.f32 1.442695, %v1891_v21  ;;  %2004 = vmatpush.bf16.msra.mxu1 %v1987_v54 }
 0x545   : > { %v4534_v50 = vpop.eup %3272  ;;  %v1916_v22 = vsel %vm1229_vm4, %v4532_v38, 0.0  ;;  %v1758_v12 = vpack.c.bf16 %v1738_v37, %v1738_v37 }
 0x546   : > { %3274 = vpow2.f32 %v1901_v49  ;;  %v1928_v24 = vsel %vm1229_vm4, %v4534_v50, 0.0  ;;  %1917 = vadd.xlane.f32.xlu0 %v1916_v22 }
 0x547   : > { %1929 = vadd.xlane.f32.xlu1 %v1928_v24  ;;  %v2031_v0 = vunpack.c.l.b16 %v1758_v12 }
 0x549   : > { %v2034_v18 = vpack.c.b16 %v2031_v0, %v2030_v19 }
 0x54a   : > { %v1740_v28 = vpop.f32.mrf.mxu3 }
 0x54b   : > { %v1741_v62 = vadd.f32 %v1740_v28, %v1580_v43 }
 0x54c   : > { %v4540_v25 = vpop.eup %3274 }
 0x54d   : > { %v1919_v26 = vsel %vm1229_vm4, %v4540_v25, 0.0  ;;  %v1759_v9 = vpack.c.bf16 %v1741_v62, %v1741_v62 }
 0x54e   : > { %1920 = vadd.xlane.f32.xlu0 %v1919_v26 }
 0x552   : > { %v1742_v56 = vpop.f32.mrf.mxu3 }
 0x553   : > { %v1743_v16 = vadd.f32 %v1742_v56, %v1580_v43 }
 0x555   : > { %v1760_v17 = vpack.c.bf16 %v1743_v16, %v1743_v16 }
 0x557   : > { %v2033_v21 = vunpack.c.l.b16 %v1760_v17 }
 0x58b   : > { %v1885_v14 = vpop.xlane.xlu2 %1884 }
 0x58c   : > { %v1895_v59 = vsub.f32 %v4512_v63, %v1885_v14 }
 0x58e   : > { %v1909_v58 = vmul.f32 1.442695, %v1895_v59 }
 0x590   : > { %3276 = vpow2.f32 %v1909_v58 }
 0x593   : > { %v1876_v1 = vpop.xlane.xlu2 %1875  ;;  %v1888_v2 = vpop.xlane.xlu0 %1887 }
 0x594   : > { %v1892_v29 = vsub.f32 %v4487_v47, %v1876_v1  ;;  %v1896_v39 = vsub.f32 %v4518_v34, %v1888_v2  ;;  %v2032_v47 = vunpack.c.l.b16 %v1759_v9 }
 0x596   : > { %v4548_v6 = vpop.eup %3276  ;;  %v1903_v7 = vmul.f32 1.442695, %v1892_v29  ;;  %v1911_v8 = vmul.f32 1.442695, %v1896_v39  ;;  %v2035_v22 = vpack.c.b16 %v2033_v21, %v2032_v47 }
 0x597   : > { %v1931_v63 = vsel %vm1229_vm4, %v4548_v6, 0.0 }
 0x598   : > { %3278 = vpow2.f32 %v1903_v7  ;;  %1932 = vadd.xlane.f32.xlu1 %v1931_v63  ;;  %2050 = vmatpush.bf16.msra.mxu2 %v2035_v22 }
 0x599   : > { %3280 = vpow2.f32 %v1911_v8 }
 0x59b   : > { %v1915_v34 = vpop.xlane.xlu2 %1914 }
 0x59c   : > { %3282 = vrcp.f32 %v1915_v34  ;;  %2051 = vmatpush.bf16.msra.mxu2 %v2034_v18 }
 0x59e   : > { %v3279_v49 = vpop.eup %3278 }
 0x59f   : > { %v3281_v24 = vpop.eup %3280  ;;  %v1922_v26 = vsel %vm1229_vm4, %v3279_v49, 0.0 }
 0x5a0   : > { %1923 = vadd.xlane.f32.xlu1 %v1922_v26  ;;  %v1934_v15 = vsel %vm1229_vm4, %v3281_v24, 0.0 }
 0x5a1   : > { %1935 = vadd.xlane.f32.xlu2 %v1934_v15 }
 0x5a2   : > { %v3283_v27 = vpop.eup %3282 }
 0x5a3   : > { %v1945_v43 = vmul.f32 %v3283_v27, %v4524_v5 }
 0x5a5   : > { %1953 = vst.msk [vmem:[%s4229_s23] sm:$0xff] %vm1229_vm4, %v1945_v43  ;;  %v1961_v36 = vpack.c.bf16 %v1945_v43, %v1945_v43 }
 0x5a7   : > { %v1973_v52 = vunpack.c.l.b16 %v1961_v36 }
 0x5b1   : > { %v1927_v20 = vpop.xlane.xlu0 %1926 }
 0x5b2   : > { %3284 = vrcp.f32 %v1927_v20 }
 0x5b8   : > { %v3285_v30 = vpop.eup %3284 }
 0x5b9   : > { %v1949_v31 = vmul.f32 %v3285_v30, %v4528_v13  ;;  %v1918_v32 = vpop.xlane.xlu0 %1917 }
 0x5ba   : > { %v1930_v46 = vpop.xlane.xlu1 %1929  ;;  %3286 = vrcp.f32 %v1918_v32 }
 0x5bb   : > { %1957 = vst.msk [vmem:[%s4229_s23 + $0x20] sm:$0xff] %vm1229_vm4, %v1949_v31  ;;  %3288 = vrcp.f32 %v1930_v46  ;;  %v1965_v41 = vpack.c.bf16 %v1949_v31, %v1949_v31 }
 0x5bd   : > { %v2020_v54 = vunpack.c.l.b16 %v1965_v41 }
 0x5c0   : > { %v3287_v51 = vpop.eup %3286 }
 0x5c1   : > { %v3289_v35 = vpop.eup %3288  ;;  %v1946_v5 = vmul.f32 %v3287_v51, %v4532_v38  ;;  %v1921_v40 = vpop.xlane.xlu0 %1920 }
 0x5c2   : > { %v1950_v44 = vmul.f32 %v3289_v35, %v4534_v50  ;;  %3290 = vrcp.f32 %v1921_v40 }
 0x5c3   : > { %1954 = vst.msk [vmem:[%s4229_s23 + $0x8] sm:$0xff] %vm1229_vm4, %v1946_v5  ;;  %v1962_v13 = vpack.c.bf16 %v1946_v5, %v1946_v5 }
 0x5c4   : > { %1958 = vst.msk [vmem:[%s4229_s23 + $0x28] sm:$0xff] %vm1229_vm4, %v1950_v44  ;;  %v1966_v48 = vpack.c.bf16 %v1950_v44, %v1950_v44 }
 0x5c5   : > { %v1974_v53 = vunpack.c.l.b16 %v1962_v13 }
 0x5c6   : > { %v2021_v55 = vunpack.c.l.b16 %v1966_v48 }
 0x5c7   : > { %v1977_v57 = vpack.c.b16 %v1974_v53, %v1973_v52 }
 0x5c8   : > { %v3291_v14 = vpop.eup %3290  ;;  %v2024_v38 = vpack.c.b16 %v2021_v55, %v2020_v54 }
 0x5c9   : > { %v1947_v59 = vmul.f32 %v3291_v14, %v4540_v25  ;;  %2834 = vmatmul.msk.bf16.vlgmr.msra.gmra.mxu1 %vm1229_vm4, %v1977_v57 }
 0x5ca   : > { %2836 = vmatmul.msk.bf16.vlgmr.msra.gmra.mxu2 %vm1229_vm4, %v2024_v38 }
 0x5cb   : > { %1955 = vst.msk [vmem:[%s4229_s23 + $0x10] sm:$0xff] %vm1229_vm4, %v1947_v59  ;;  %v1963_v39 = vpack.c.bf16 %v1947_v59, %v1947_v59 }
 0x5cd   : > { %v1975_v9 = vunpack.c.l.b16 %v1963_v39 }
 0x60b   : > { %v1933_v50 = vpop.xlane.xlu1 %1932 }
 0x60c   : > { %3292 = vrcp.f32 %v1933_v50 }
 0x612   : > { %v3293_v58 = vpop.eup %3292 }
 0x613   : > { %v1951_v28 = vmul.f32 %v3293_v58, %v4548_v6  ;;  %v1924_v62 = vpop.xlane.xlu1 %1923 }
 0x614   : > { %3294 = vrcp.f32 %v1924_v62  ;;  %v1936_v1 = vpop.xlane.xlu2 %1935 }
 0x615   : > { %1959 = vst.msk [vmem:[%s4229_s23 + $0x30] sm:$0xff] %vm1229_vm4, %v1951_v28  ;;  %3296 = vrcp.f32 %v1936_v1  ;;  %v1967_v37 = vpack.c.bf16 %v1951_v28, %v1951_v28 }
 0x617   : > { %v2022_v63 = vunpack.c.l.b16 %v1967_v37 }
 0x61a   : > { %v3295_v25 = vpop.eup %3294 }
 0x61b   : > { %v3297_v2 = vpop.eup %3296  ;;  %v1948_v29 = vmul.f32 %v3295_v25, %v3279_v49 }
 0x61c   : > { %v1952_v45 = vmul.f32 %v3297_v2, %v3281_v24 }
 0x61d   : > { %1956 = vst.msk [vmem:[%s4229_s23 + $0x18] sm:$0xff] %vm1229_vm4, %v1948_v29  ;;  %v1964_v7 = vpack.c.bf16 %v1948_v29, %v1948_v29 }
 0x61e   : > { %1960 = vst.msk [vmem:[%s4229_s23 + $0x38] sm:$0xff] %vm1229_vm4, %v1952_v45  ;;  %v1968_v8 = vpack.c.bf16 %v1952_v45, %v1952_v45 }
 0x61f   : > { %v1976_v6 = vunpack.c.l.b16 %v1964_v7 }
 0x620   : > { %v2023_v56 = vunpack.c.l.b16 %v1968_v8 }
 0x621   : > { %v1978_v11 = vpack.c.b16 %v1976_v6, %v1975_v9 }
 0x622   : > { %v2025_v12 = vpack.c.b16 %v2023_v56, %v2022_v63 }
 0x623   : > { %2835 = vmatmul.msk.bf16.gmra.mxu1 %vm1229_vm4, %v1978_v11 }
 0x624   : > { %2837 = vmatmul.msk.bf16.gmra.mxu2 %vm1229_vm4, %v2025_v12 }
 0x646   : > { %v2006_v16 = vpop.f32.mrf.mxu1 }
 0x647   : > { %v2063_v34 = vadd.f32 %v2006_v16, %v4438_v60 }
 0x64d   : > { %v2053_v47 = vpop.f32.mrf.mxu2 }
 0x64e   : > { %v2008_v17 = vpop.f32.mrf.mxu1  ;;  %v2067_v49 = vadd.f32 %v2053_v47, %v4454_v10 }
 0x64f   : > { %v2064_v19 = vadd.f32 %v2008_v17, %v4440_v61 }
 0x651   : > { %v2980_v0 = vpack.c.bf16 %v2064_v19, %v2063_v34 }
 0x653   : > { %2981 = vst [vmem:[#allocation2 + $0x10] sm:$0xff] %v2980_v0  }
 0x655   : > { %v2055_v21 = vpop.f32.mrf.mxu2 }
 0x656   : > { %v2068_v22 = vadd.f32 %v2055_v21, %v4452_v33 }
 0x658   : > { %v2990_v24 = vpack.c.bf16 %v2068_v22, %v2067_v49 }
 0x65a   : > { %2998 = vst [vmem:[#allocation2 + $0x18] sm:$0xff] %v2990_v24  }
 0x6a0   : > { %v2011_v26 = vpop.f32.mrf.mxu1 }
 0x6a1   : > { %v2065_v27 = vadd.f32 %v2011_v26, %v4445_v3 }
 0x6a7   : > { %v2058_v18 = vpop.f32.mrf.mxu2 }
 0x6a8   : > { %v2013_v15 = vpop.f32.mrf.mxu1  ;;  %v2069_v61 = vadd.f32 %v2058_v18, %v4465_v42 }
 0x6a9   : > { %v2066_v43 = vadd.f32 %v2013_v15, %v4447_v4 }
 0x6ab   : > { %v2985_v20 = vpack.c.bf16 %v2066_v43, %v2065_v27 }
 0x6ad   : > { %2997 = vst [vmem:[#allocation2] sm:$0xff] %v2985_v20  }
 0x6af   : > { %v2060_v60 = vpop.f32.mrf.mxu2 }
 0x6b0   : > { %v2070_v30 = vadd.f32 %v2060_v60, %v4467_v23 }
 0x6b2   : > { %v2995_v31 = vpack.c.bf16 %v2070_v30, %v2069_v61 }
 0x6b4   : > { %2999 = vst [vmem:[#allocation2 + $0x8] sm:$0xff] %v2995_v31  }
 0x6b5 PF: > { %v2971_v33 = vld [vmem:[%s4207_s9 + $0x38] sm:$0xff]  ;;  %v2970_v3 = vld [vmem:[%s4207_s9 + $0x30] sm:$0xff]  ;;  %v2969_v4 = vld [vmem:[%s4207_s9 + $0x28] sm:$0xff]  ;;  %s4855_s29 = sld [smem:[#allocation35_spill]]  ;;  %s2267_s7 = sshll.u32 %s4227_s22, 4  ;;  %s2268_s7 = int_to_ptr.vmem [resolvable:$true] %s2267_s7 }
 0x6b6   : > { %2187 = vmatpush.bf16.msra.mxu0 %v2971_v33  ;;  %3000 = vmatpush.bf16.msra.mxu1 %v2971_v33  ;;  %v2968_v10 = vld [vmem:[%s4207_s9 + $0x20] sm:$0xff]  ;;  %v2967_v42 = vld [vmem:[%s4207_s9 + $0x18] sm:$0xff]  ;;  %v2966_v23 = vld [vmem:[%s4207_s9 + $0x10] sm:$0xff]  ;;  %s4856_s20 = sld [smem:[#allocation42_spill]]  ;;  %s2230_s10 = scalar_lea.sflag [#allocation20], %s4164_s5 }
 0x6b7   : > { %3001 = vmatpush.bf16.msra.mxu2 %v2971_v33  ;;  %3002 = vmatpush.bf16.msra.mxu3 %v2971_v33  ;;  %v2965_v32 = vld [vmem:[%s4207_s9 + $0x8] sm:$0xff]  ;;  %v2964_v46 = vld [vmem:[%s4207_s9] sm:$0xff]  ;;  %v2961_v35 = vld [vmem:[#allocation2] sm:$0xff]  ;;  %s4857_s6 = sld [smem:[#allocation62_spill]] }
 0x6b8   : > { %v2960_v51 = vld [vmem:[#allocation2 + $0x10] sm:$0xff]  ;;  %v2962_v36 = vld [vmem:[#allocation2 + $0x18] sm:$0xff]  ;;  %s4858_s16 = sld [smem:[#allocation63_spill]] }
 0x6ba   : > { %2188 = vmatpush.bf16.msra.mxu0 %v2970_v3  ;;  %3003 = vmatpush.bf16.msra.mxu1 %v2970_v3 }
 0x6bb   : > { %3004 = vmatpush.bf16.msra.mxu2 %v2970_v3  ;;  %3005 = vmatpush.bf16.msra.mxu3 %v2970_v3  ;;  %v2963_v5 = vld [vmem:[#allocation2 + $0x8] sm:$0xff]  ;;  %s2974_s13 = sshll.u32 %s4855_s29, 6 }
 0x6bc   : > { %p4860_p6 = scmp.ne.s32.totalorder %s4856_s20, 0 }
 0x6bd   : > { %s2266_s12 = scalar_lea.hbm %s4857_s6, %s2974_s13  ;;  %s3589_s19 = scalar_lea.hbm %s4857_s6, 256 }
 0x6be   : > { %2189 = vmatpush.bf16.msra.mxu0 %v2969_v4  ;;  %3006 = vmatpush.bf16.msra.mxu1 %v2969_v4  ;;  %s2269_s27 = sshll.u32 %s2266_s12, 4  ;;  %s4859_s0 = smov %s4858_s16  ;;  %s2270_s27 = int_to_ptr.hbm [resolvable:$true] %s2269_s27 }
 0x6bf   : > { %3007 = vmatpush.bf16.msra.mxu2 %v2969_v4  ;;  %3008 = vmatpush.bf16.msra.mxu3 %v2969_v4  ;;  %s2284_s28 = scalar_lea.hbm %s4858_s16, %s2974_s13  ;;  %s3583_s1 = sshra.s32 %s2270_s27, 4  ;;  %s3584_s1 = int_to_ptr.hbm [resolvable:$true] %s3583_s1 }
 0x6c0   : > { %s3585_s25 = scalar_lea.hbm %s3584_s1, 64  ;;  %p3590_p0 = scmp.lt.s32.totalorder %s3584_s1, %s4857_s6 }
 0x6c1   : > { %p3586_p9 = scmp.ne.s32.totalorder %s3584_s1, %s3585_s25  ;;  %p3591_p2 = scmp.lt.s32.totalorder %s3589_s19, %s3585_s25 }
 0x6c2   : > { %2190 = vmatpush.bf16.msra.mxu0 %v2968_v10  ;;  %3009 = vmatpush.bf16.msra.mxu1 %v2968_v10 }
 0x6c3   : > { %3010 = vmatpush.bf16.msra.mxu2 %v2968_v10  ;;  %3011 = vmatpush.bf16.msra.mxu3 %v2968_v10  ;;  %p3587_p10 = pnand %p3586_p9, %p4860_p6  ;;  %p3592_p8 = por %p3591_p2, %p3590_p0 }
 0x6c5   : > { %p3588_p12 = pneg %p3587_p10 }
 0x6c6   : > { %2191 = vmatpush.bf16.msra.mxu0 %v2967_v42  ;;  %3012 = vmatpush.bf16.msra.mxu1 %v2967_v42 }
 0x6c7   : > { %3013 = vmatpush.bf16.msra.mxu2 %v2967_v42  ;;  %3014 = vmatpush.bf16.msra.mxu3 %v2967_v42  ;;  %p3593_p4 = pnand %p3592_p8, %p3588_p12 }
 0x6ca   : > { %2192 = vmatpush.bf16.msra.mxu0 %v2966_v23  ;;  %3015 = vmatpush.bf16.msra.mxu1 %v2966_v23 }
 0x6cb   : > { %3016 = vmatpush.bf16.msra.mxu2 %v2966_v23  ;;  %3017 = vmatpush.bf16.msra.mxu3 %v2966_v23 }
 0x6ce   : > { %2193 = vmatpush.bf16.msra.mxu0 %v2965_v32  ;;  %3018 = vmatpush.bf16.msra.mxu1 %v2965_v32 }
 0x6cf   : > { %3019 = vmatpush.bf16.msra.mxu2 %v2965_v32  ;;  %3020 = vmatpush.bf16.msra.mxu3 %v2965_v32 }
 0x6d2   : > { %2194 = vmatpush.bf16.msra.mxu0 %v2964_v46  ;;  %3021 = vmatpush.bf16.msra.mxu1 %v2964_v46 }
 0x6d3   : > { %3022 = vmatpush.bf16.msra.mxu2 %v2964_v46  ;;  %3023 = vmatpush.bf16.msra.mxu3 %v2964_v46 }
 0x6d5   : > { %2195 = vmatmul.bf16.vlgmr.msra.gmra.mxu0 %v2960_v51  ;;  %2200 = vmatmul.bf16.vlgmr.msra.gmra.mxu1 %v2961_v35 }
 0x6d6   : > { %2205 = vmatmul.bf16.vlgmr.msra.gmra.mxu2 %v2962_v36  ;;  %2210 = vmatmul.bf16.vlgmr.msra.gmra.mxu3 %v2963_v5 }
 0x6d7   : > { %3596 = shalt.err (!%p3593_p4)
}
 0x6d8   : > { %s3814_s13 = smov 128   ;;  %s3815_s12 = smov 8  }
 0x6d9   : > { %3051 = dma.vmem_to_hbm [thread:$0]  (%p4860_p6), %s2268_s7, 1024, %s2270_s27, %s2230_s10, %s3814_s13, %s3814_s13, %s3815_s12  }
 0x6da   : > { %s2287_s2 = sshll.u32 %s2284_s28, 4  ;;  %s2285_s24 = sshll.u32 %s4229_s23, 4  ;;  %s2288_s2 = int_to_ptr.hbm [resolvable:$true] %s2287_s2  ;;  %s2286_s24 = int_to_ptr.vmem [resolvable:$true] %s2285_s24 }
 0x6db   : > { %s3611_s1 = sshra.s32 %s2288_s2, 4  ;;  %s3617_s16 = scalar_lea.hbm %s4859_s0, 256  ;;  %s3612_s1 = int_to_ptr.hbm [resolvable:$true] %s3611_s1 }
 0x6dc   : > { %s3613_s25 = scalar_lea.hbm %s3612_s1, 64  ;;  %p3618_p5 = scmp.lt.s32.totalorder %s3612_s1, %s4859_s0 }
 0x6dd   : > { %p3614_p11 = scmp.ne.s32.totalorder %s3612_s1, %s3613_s25  ;;  %p3619_p9 = scmp.lt.s32.totalorder %s3617_s16, %s3613_s25 }
 0x6df   : > { %p3615_p13 = pnand %p3614_p11, %p4860_p6  ;;  %p3620_p10 = por %p3619_p9, %p3618_p5 }
 0x6e1   : > { %p3616_p1 = pneg %p3615_p13 }
 0x6e3   : > { %p3621_p12 = pnand %p3620_p10, %p3616_p1 }
 0x6e5   : > { %3624 = shalt.err (!%p3621_p12)
}
 0x6e6   : > { %s4861_s28 = sld [smem:[#allocation34_spill]]  ;;  %s2972_s20 = sshll.u32 %s4855_s29, 4 }
 0x6e7   : > { %3052 = dma.vmem_to_hbm [thread:$0]  (%p4860_p6), %s2286_s24, 1024, %s2288_s2, %s2230_s10, %s3814_s13, %s3814_s13, %s3815_s12  }
 0x6e8   : > { %s4862_s27 = sld [smem:[#allocation60_spill]]  ;;  %s2249_s3 = sshll.u32 %s4225_s30, 4  ;;  %s2250_s3 = int_to_ptr.vmem [resolvable:$true] %s2249_s3 }
 0x6e9   : > { %s4865_s24 = sld [smem:[#allocation61_spill]] }
 0x6ea   : > { %s4867_s14 = sld [smem:[#allocation40_spill]] }
 0x6ec   : > { %s2246_s5 = sadd.s32 %s4861_s28, %s2972_s20 }
 0x6ed   : > { %s2891_s10 = sshll.u32 %s2246_s5, 3 }
 0x6ee   : > { %s4863_s9 = scalar_lea.vmem %s4862_s27, %s4219_s8  ;;  %s4864_s8 = sld [smem:[#allocation32_spill]] }
 0x6ef   : > { %v3298_v40 = vld [vmem:[%s4863_s9] ss:$0 sm:$0xff]  ;;  %s4866_s1 = smov %s4865_s24  ;;  %s2248_s25 = scalar_lea.hbm %s4865_s24, %s2891_s10 }
 0x6f0   : > { %s2251_s16 = sshll.u32 %s2248_s25, 4  ;;  %p4869_p0 = scmp.ne.s32.totalorder %s4867_s14, 0  ;;  %s2252_s16 = int_to_ptr.hbm [resolvable:$true] %s2251_s16 }
 0x6f1   : > { %s3639_s28 = sshra.s32 %s2252_s16, 4  ;;  %s3645_s9 = scalar_lea.hbm %s4866_s1, 512  ;;  %s3640_s28 = int_to_ptr.hbm [resolvable:$true] %s3639_s28 }
 0x6f2   : > { %s3641_s23 = scalar_lea.hbm %s3640_s28, 64  ;;  %p3646_p4 = scmp.lt.s32.totalorder %s3640_s28, %s4866_s1 }
 0x6f3   : > { %p3642_p6 = scmp.ne.s32.totalorder %s3640_s28, %s3641_s23  ;;  %p3647_p11 = scmp.lt.s32.totalorder %s3645_s9, %s3641_s23 }
 0x6f4   : > { %s4868_s19 = sand.u32 1, %s4864_s8  }
 0x6f5   : > { %s2225_s22 = scalar_lea.sflag [#allocation5], %s4868_s19  ;;  %p3643_p2 = pnand %p3642_p6, %p4869_p0 }
 0x6f6   : > { %p3648_p13 = por %p3647_p11, %p3646_p4 }
 0x6f7   : > { %p3644_p8 = pneg %p3643_p2 }
 0x6f9   : > { %p3649_p1 = pnand %p3648_p13, %p3644_p8 }
 0x752   : > { %v2196_v41 = vpop.f32.mrf.mxu0  ;;  %v2201_v44 = vpop.f32.mrf.mxu1 }
 0x753   : > { %v2197_v13 = vadd.f32 %v3298_v40, %v2196_v41  ;;  %v2202_v48 = vadd.f32 %v3298_v40, %v2201_v44 }
 0x755   : > { %2216 = vst [vmem:[%s4225_s30] sm:$0xff] %v2197_v13 }
 0x756   : > { %2218 = vst [vmem:[%s4225_s30 + $0x10] sm:$0xff] %v2202_v48 }
 0x759   : > { %v2206_v52 = vpop.f32.mrf.mxu2  ;;  %v2211_v53 = vpop.f32.mrf.mxu3 }
 0x75a   : > { %v2207_v54 = vadd.f32 %v3298_v40, %v2206_v52  ;;  %v2212_v55 = vadd.f32 %v3298_v40, %v2211_v53  ;;  %v2198_v57 = vpop.f32.mrf.mxu0  ;;  %v2203_v14 = vpop.f32.mrf.mxu1 }
 0x75b   : > { %v2199_v38 = vadd.f32 %v3298_v40, %v2198_v57  ;;  %v2204_v59 = vadd.f32 %v3298_v40, %v2203_v14 }
 0x75c   : > { %2220 = vst [vmem:[%s4225_s30 + $0x20] sm:$0xff] %v2207_v54 }
 0x75d   : > { %2222 = vst [vmem:[%s4225_s30 + $0x30] sm:$0xff] %v2212_v55 }
 0x75e   : > { %2217 = vst [vmem:[%s4225_s30 + $0x8] sm:$0xff] %v2199_v38 }
 0x75f   : > { %2219 = vst [vmem:[%s4225_s30 + $0x18] sm:$0xff] %v2204_v59 }
 0x761   : > { %v2208_v50 = vpop.f32.mrf.mxu2  ;;  %v2213_v58 = vpop.f32.mrf.mxu3 }
 0x762   : > { %v2209_v28 = vadd.f32 %v3298_v40, %v2208_v50  ;;  %v2214_v62 = vadd.f32 %v3298_v40, %v2213_v58 }
 0x764   : > { %2221 = vst [vmem:[%s4225_s30 + $0x28] sm:$0xff] %v2209_v28 }
 0x765   : > { %2223 = vst [vmem:[%s4225_s30 + $0x38] sm:$0xff] %v2214_v62 }
 0x766   : > { %3652 = shalt.err (!%p3649_p1)
}
 0x767   : > { %s3816_s30 = smov 256  }
 0x768   : > { %3050 = dma.vmem_to_hbm [thread:$0]  (%p4869_p0), %s2250_s3, 1024, %s2252_s16, %s2225_s22, %s3814_s13, %s3816_s30, %s3815_s12  }
 0x769 PF: > { %s4870_s10 = sld [smem:[#allocation31_spill]]  ;;  %p3104_p5 = scmp.ge.s32.totalorder %s3799_s26, 2 }
 0x76b   : > { %p3086_p9 = pnand %p3104_p5, %p4040_p7 }
 0x76d   : > { %p3087_p10 = pneg %p3086_p9 }
 0x76f   : > { %s2302_s29 = sand.u32 1, %s4870_s10  }
 0x770   : > { %s2303_s2 = scalar_lea.sflag [#allocation5], %s2302_s29 }
 0x771   : > { %3738 = dma.done.wait (%p3087_p10), %s2303_s2, 1024  }
 0x772   : > { %3740 = vsyncadd (%p3087_p10), %s2303_s2, 4294966272  ;;  %s4872_s24 = sadd.s32 4294967294, %s3799_s26   ;;  %p3089_p12 = pnand %p3104_p5, %p4044_p3 }
 0x773   : > { %s2312_s19 = sand.u32 1, %s4872_s24  }
 0x774   : > { %p3090_p6 = pneg %p3089_p12  ;;  %s2313_s13 = scalar_lea.sflag [#allocation20], %s2312_s19 }
 0x776   : > { %3742 = dma.done.wait (%p3090_p6), %s2313_s13, 2048  }
 0x777   : > { %3744 = vsyncadd (%p3090_p6), %s2313_s13, 4294965248  ;;  %s42_s26 = sadd.s32 1, %s3799_s26   ;;  %s4875_s29 = sld [smem:[#allocation32_spill]] }
 0x778   : > { %p4678_p0 = scmp.ge.s32.totalorder %s42_s26, 10   ;;  %s4876_s19 = sld [smem:[#allocation33_spill]] }
 0x779   : > { %s4877_s14 = sld [smem:[#allocation48_spill]]  ;;  %s4882_s30 = smov %s3755_s15 }
 0x77a   : > { %s4878_s22 = sld [smem:[#allocation36_spill]]  ;;  %s4883_s15 = smov %s4150_s4 }
 0x77b   : > { %s4879_s23 = sld [smem:[#allocation37_spill]]  ;;  %s4884_s16 = smov %s3763_s17 }
 0x77c   : > { %s4880_s24 = sld [smem:[#allocation46_spill]]  ;;  %s4885_s17 = smov %s3767_s18 }
 0x77d   : > { %s4881_s25 = sld [smem:[#allocation47_spill]]  ;;  %s4886_s18 = smov %s4137_s11 }
 0x77e   : > { %s4887_s20 = smov %s3779_s21  ;;  %41 = sbr.rel (!%p4678_p0) target bundleno = 34 (0x22), region = 216 }
 0x77f   : > { %s4888_s21 = smov %s4877_s14 }
 0x783   :  { %2329 = vsyncpa [#allocation4], 1 }
 0x784   :  { %2331 = vsyncpa [#allocation4 + $0x1], 1 }
 0x785   :  { %2332 = vsyncpa [#allocation7], 1 }
 0x786   :  { %2334 = vsyncpa [#allocation7 + $0x1], 1 }
 0x787   :  { %2335 = vsyncpa [#allocation10], 1 }
 0x788   :  { %2337 = vsyncpa [#allocation10 + $0x1], 1 }
 0x789   :  { %2338 = vsyncpa [#allocation13], 1 }
 0x78a   :  { %2339 = vsyncpa [#allocation16], 1 }
 0x78b   :  { %2340 = vsyncpa [#allocation5], 1 }
 0x78c   :  { %2342 = vsyncpa [#allocation5 + $0x1], 1 }
 0x78d   :  { %2343 = vsyncpa [#allocation20], 1 }
 0x78e   :  { %2345 = vsyncpa [#allocation20 + $0x1], 1 }

</bundles_post_ra>
